<compile_context>
chip_gen: v7x
topology: tpu7x:2x2x1
jax: 0.10.0
libtpu: 0.0.40
codegen_flags: <defaults>
</compile_context>

<pallas_src>
import jax
import jax.numpy as jnp
from jax.experimental import pallas as pl
from jax.experimental.pallas import tpu as pltpu

GRID_SIZE = 10
INPUT_CHANNELS = 1            # conv1 im2col formulation assumes a single input channel
OUTPUT_DIM = 4                # len(['up', 'down', 'left', 'right'])

_HW = GRID_SIZE * GRID_SIZE   # 100 valid positions per image
_PW = GRID_SIZE + 2           # padded width/height (x, y in -1..10)
_PPI = _PW * _PW              # 144 padded positions per image (multiple of 8)
_HALO = 16                    # scratch halo rows, multiple of 8/16 for aligned stores
_C1, _C2, _HID = 32, 64, 256
# flat-row offset of tap (ky, kx) in the width-12 padded layout
_OFFS = tuple((ky - 1) * _PW + (kx - 1) for ky in range(3) for kx in range(3))


# ---------------------------------------------------------------------------
# Kernel A: conv1 + ReLU + conv2 + ReLU, one image per grid step, all in VMEM
# ---------------------------------------------------------------------------
def _conv_stack_kernel(xcol_ref, w1_ref, w2_ref, b2_ref, o_ref, h1pad_ref, col_ref):
    rows = o_ref.shape[0]                                     # 144 padded positions

    # conv1 (1 -> 32) + ReLU: one small MXU dot. Bias is folded into w1 via the
    # interior-indicator column of xcol, so pad-position rows come out exactly 0
    # (they are conv2's zero padding).
    h1 = jnp.maximum(
        jnp.dot(xcol_ref[...], w1_ref[...], preferred_element_type=jnp.float32),
        0.0)                                                  # (144, 32) f32

    # Stage h1 as bf16 in the halo-padded scratch; zero only the halo rows.
    zero_halo = jnp.zeros((_HALO, _C1), jnp.bfloat16)
    h1pad_ref[0:_HALO, :] = zero_halo
    h1pad_ref[_HALO + rows:_HALO + rows + _HALO, :] = zero_halo
    h1pad_ref[_HALO:_HALO + rows, :] = h1.astype(jnp.bfloat16)

    # conv2 (32 -> 64) + ReLU: im2col of 9 shifted tap blocks -> one K=288 bf16
    # MXU contraction (f32 accumulate).
    for t, off in enumerate(_OFFS):
        col_ref[:, t * _C1:(t + 1) * _C1] = h1pad_ref[_HALO + off:_HALO + off + rows, :]
    h2 = jnp.dot(col_ref[...], w2_ref[...], preferred_element_type=jnp.float32)
    o_ref[...] = jnp.maximum(h2 + b2_ref[...], 0.0).astype(o_ref.dtype)


# ---------------------------------------------------------------------------
# Kernel B: Linear(6400->256)+ReLU+Linear(256->4), w3 streamed over a K-grid
# ---------------------------------------------------------------------------
def _fc_head_kernel(x_ref, w3_ref, b3_ref, w4_ref, b4_ref, o_ref, acc_ref):
    k = pl.program_id(0)

    @pl.when(k == 0)
    def _init():
        acc_ref[...] = jnp.zeros_like(acc_ref)

    acc_ref[...] += jnp.dot(x_ref[...], w3_ref[...],
                            preferred_element_type=jnp.float32)

    @pl.when(k == pl.num_programs(0) - 1)
    def _finalize():
        h = jnp.maximum(acc_ref[...] + b3_ref[...], 0.0)      # (B, 256) f32
        out = jnp.dot(h, w4_ref[...], preferred_element_type=jnp.float32)
        o_ref[...] = (out + b4_ref[...]).astype(o_ref.dtype)


# ---------------------------------------------------------------------------
# Wrappers
# ---------------------------------------------------------------------------
def _build_xcol(x_nchw):
    """(B,1,10,10) -> (B*144, 16) f32 conv1 im2col in the 12x12 padded layout.

    Columns 0..8 hold the 9 taps, column 9 is the interior indicator (it
    carries the conv1 bias through the matmul), columns 10..15 are zero.
    Pad-position rows are all-zero so conv1's output is exactly 0 there.
    Tiny (B*144*16 f32) pure data movement, done in XLA.
    """
    B = x_nchw.shape[0]
    img = x_nchw.reshape(B, GRID_SIZE, GRID_SIZE)
    xp2 = jnp.pad(img, ((0, 0), (2, 2), (2, 2)))                      # y, x in -2..11
    taps = [xp2[:, ky:ky + _PW, kx:kx + _PW]                          # (B, 12, 12) each
            for ky in range(3) for kx in range(3)]
    ind = jnp.zeros((1, _PW, _PW), jnp.float32)
    ind = ind.at[:, 1:GRID_SIZE + 1, 1:GRID_SIZE + 1].set(1.0)
    ind = jnp.broadcast_to(ind, (B, _PW, _PW))
    cols = jnp.stack(taps + [ind], axis=-1) * ind[..., None]          # (B, 12, 12, 10)
    cols = jnp.pad(cols, ((0, 0), (0, 0), (0, 0), (0, 6)))            # lanes -> 16
    return cols.reshape(B * _PPI, 16)


def conv_stack(x_nchw, w1_aug, w2, b2):
    B = x_nchw.shape[0]
    xcol = _build_xcol(x_nchw)                                        # (B*144, 16) f32
    return pl.pallas_call(
        _conv_stack_kernel,
        out_shape=jax.ShapeDtypeStruct((B * _PPI, _C2), jnp.bfloat16),
        grid=(B,),
        in_specs=[
            pl.BlockSpec((_PPI, 16), lambda b: (b, 0)),               # per-image im2col
            pl.BlockSpec((16, _C1), lambda b: (0, 0)),                # w1 (+bias row)
            pl.BlockSpec((9 * _C1, _C2), lambda b: (0, 0)),           # bf16 w2
            pl.BlockSpec((1, _C2), lambda b: (0, 0)),                 # b2
        ],
        out_specs=pl.BlockSpec((_PPI, _C2), lambda b: (b, 0)),
        scratch_shapes=[
            pltpu.VMEM((_PPI + 2 * _HALO, _C1), jnp.bfloat16),        # halo-padded h1
            pltpu.VMEM((_PPI, 9 * _C1), jnp.bfloat16),                # conv2 im2col
        ],
        compiler_params=pltpu.CompilerParams(
            dimension_semantics=("parallel",)),                       # v7x: 2nd core
    )(xcol, w1_aug, w2, b2)


def fc_head(h2_flat, w3, b3, w4, b4, *, tk=3200):
    # tk=3200 -> 2 K-steps: per-step overhead < w3 DMA on v6e/v7x; double-
    # buffered (3200,256) bf16 tiles (3.2 MB total) fit v5e's 16 MiB scoped
    # VMEM default too (drop to 1280-2560 on v5e if overlap matters more).
    B, K = h2_flat.shape
    H = w3.shape[1]
    N = w4.shape[1]
    assert K % tk == 0 and tk % 128 == 0
    return pl.pallas_call(
        _fc_head_kernel,
        out_shape=jax.ShapeDtypeStruct((B, N), jnp.float32),
        grid=(K // tk,),
        in_specs=[
            pl.BlockSpec((B, tk), lambda k: (0, k)),                  # activations (tiny)
            pl.BlockSpec((tk, H), lambda k: (k, 0)),                  # streamed bf16 w3
            pl.BlockSpec((1, H), lambda k: (0, 0)),                   # b3 (resident)
            pl.BlockSpec((H, N), lambda k: (0, 0)),                   # w4 (resident)
            pl.BlockSpec((1, N), lambda k: (0, 0)),                   # b4 (resident)
        ],
        out_specs=pl.BlockSpec((B, N), lambda k: (0, 0)),
        scratch_shapes=[pltpu.VMEM((B, H), jnp.float32)],             # f32 accumulator
        compiler_params=pltpu.CompilerParams(
            dimension_semantics=("arbitrary",)),                      # K axis = reduction
    )(h2_flat, w3, b3, w4, b4)


# ---------------------------------------------------------------------------
# Deterministic parameter init (PyTorch layouts, repacked for the kernels)
# ---------------------------------------------------------------------------
def init_params(key):
    ks = jax.random.split(key, 8)
    w1_t = jax.random.normal(ks[0], (_C1, INPUT_CHANNELS, 3, 3), jnp.float32) * 0.1   # OIHW
    b1 = jax.random.normal(ks[1], (_C1,), jnp.float32) * 0.1
    w2_t = jax.random.normal(ks[2], (_C2, _C1, 3, 3), jnp.float32) * 0.05             # OIHW
    b2 = jax.random.normal(ks[3], (_C2,), jnp.float32) * 0.05
    w3_t = jax.random.normal(ks[4], (_HID, _C2 * _HW), jnp.float32) * 0.01
    b3 = jax.random.normal(ks[5], (_HID,), jnp.float32) * 0.01
    w4_t = jax.random.normal(ks[6], (OUTPUT_DIM, _HID), jnp.float32) * 0.05
    b4 = jax.random.normal(ks[7], (OUTPUT_DIM,), jnp.float32) * 0.05

    # conv1: (tap, out_ch) rows 0..8, bias as row 9 (matched by the indicator
    # column of the im2col), zero-padded to 16 rows.
    w1_taps = w1_t.transpose(2, 3, 1, 0).reshape(9 * INPUT_CHANNELS, _C1)   # (9, 32)
    w1_aug = jnp.concatenate(
        [w1_taps, b1.reshape(1, _C1), jnp.zeros((6, _C1), jnp.float32)], axis=0)  # (16, 32)

    # conv2: (tap*32 + in_ch, out_ch) rows, bf16 for a single-pass MXU matmul.
    w2_k = w2_t.transpose(2, 3, 1, 0).reshape(9 * _C1, _C2).astype(jnp.bfloat16)  # (288, 64)

    # w3 rows reordered from PyTorch's (c, h, w) flatten to the kernel's
    # (h, w, c) flatten, bf16 to halve the dominant HBM stream.
    w3_hwc = (w3_t.reshape(_HID, _C2, _HW).transpose(2, 1, 0)
              .reshape(_C2 * _HW, _HID).astype(jnp.bfloat16))                     # (6400, 256)

    return dict(
        w1=w1_aug,
        w2=w2_k,
        b2=b2.reshape(1, _C2),
        w3=w3_hwc,
        b3=b3.reshape(1, _HID),
        w4=w4_t.T,                                                    # (256, 4) f32
        b4=b4.reshape(1, OUTPUT_DIM),
        # PyTorch-layout copies for the pure-JAX reference check
        _w1_t=w1_t, _b1=b1, _w2_t=w2_t, _b2=b2, _w3_t=w3_t, _b3=b3,
        _w4_t=w4_t, _b4=b4,
    )


# ---------------------------------------------------------------------------
# Forward pass (matches PyTorch DQN.forward semantics)
# ---------------------------------------------------------------------------
@jax.jit
def dqn_forward(x_nchw, p):
    B = x_nchw.shape[0]
    h2pad = conv_stack(x_nchw, p["w1"], p["w2"], p["b2"])             # (B*144, 64) bf16
    # Drop the 44 pad positions per image; the row-major (h, w, c) flatten
    # matches the w3 row repack done at init (no runtime transpose).
    h2 = (h2pad.reshape(B, _PW, _PW, _C2)
          [:, 1:GRID_SIZE + 1, 1:GRID_SIZE + 1, :]
          .reshape(B, _HW * _C2))
    return fc_head(h2, p["w3"], p["b3"], p["w4"], p["b4"])            # (B, 4)


def dqn_reference(x_nchw, p):
    """Pure-JAX reference mirroring the PyTorch module (f32 throughout)."""
    dn = jax.lax.conv_dimension_numbers(x_nchw.shape, p["_w1_t"].shape,
                                        ("NCHW", "OIHW", "NCHW"))
    h = jax.lax.conv_general_dilated(x_nchw, p["_w1_t"], (1, 1), ((1, 1), (1, 1)),
                                     dimension_numbers=dn)
    h = jnp.maximum(h + p["_b1"].reshape(1, -1, 1, 1), 0.0)
    dn2 = jax.lax.conv_dimension_numbers(h.shape, p["_w2_t"].shape,
                                         ("NCHW", "OIHW", "NCHW"))
    h = jax.lax.conv_general_dilated(h, p["_w2_t"], (1, 1), ((1, 1), (1, 1)),
                                     dimension_numbers=dn2)
    h = jnp.maximum(h + p["_b2"].reshape(1, -1, 1, 1), 0.0)
    h = h.reshape(h.shape[0], -1)
    h = jnp.maximum(h @ p["_w3_t"].T + p["_b3"], 0.0)
    return h @ p["_w4_t"].T + p["_b4"]


if __name__ == "__main__":
    x = jax.random.normal(jax.random.PRNGKey(0),
                          (2, INPUT_CHANNELS, GRID_SIZE, GRID_SIZE), jnp.float32)
    params = init_params(jax.random.PRNGKey(42))

    out = dqn_forward(x, params)
    out = jax.block_until_ready(out)
    assert out.shape == (2, OUTPUT_DIM)

    ref = dqn_reference(x, params)
    # bf16 h1/h2/w2/w3 are an intentional precision tradeoff vs the f32 reference.
    assert jnp.allclose(out, ref, rtol=5e-2, atol=5e-2)

    print("KERNEL_OK")
</pallas_src>

<mosaic_0001>
module attributes {stable_mosaic.version = 11 : i64} {
  func.func @_conv_stack_kernel(%arg0: i32, %arg1: memref<144x16xf32, #tpu.memory_space<vmem>>, %arg2: memref<16x32xf32, #tpu.memory_space<vmem>>, %arg3: memref<288x64xbf16, #tpu.memory_space<vmem>>, %arg4: memref<1x64xf32, #tpu.memory_space<vmem>>, %arg5: memref<144x64xbf16, #tpu.memory_space<vmem>>, %arg6: memref<176x32xbf16, #tpu.memory_space<vmem>>, %arg7: memref<144x288xbf16, #tpu.memory_space<vmem>>) attributes {dimension_semantics = [#tpu.dimension_semantics<parallel>], iteration_bounds = array<i64: 2>, scalar_prefetch = 0 : i64, scratch_operands = 2 : i64, tpu.core_type = #tpu.core_type<tc>, window_params = [{transform_indices = @transform_0, window_bounds = array<i64: 144, 16>}, {pipeline_mode = #tpu.pipeline_mode<synchronous>, transform_indices = @transform_1, window_bounds = array<i64: 16, 32>}, {pipeline_mode = #tpu.pipeline_mode<synchronous>, transform_indices = @transform_2, window_bounds = array<i64: 288, 64>}, {pipeline_mode = #tpu.pipeline_mode<synchronous>, transform_indices = @transform_3, window_bounds = array<i64: 1, 64>}, {transform_indices = @transform_4, window_bounds = array<i64: 144, 64>}]} {
    %c0 = arith.constant 0 : index
    %c0_0 = arith.constant 0 : index
    %0 = vector.load %arg1[%c0, %c0_0] : memref<144x16xf32, #tpu.memory_space<vmem>>, vector<144x16xf32>
    %c0_1 = arith.constant 0 : index
    %c0_2 = arith.constant 0 : index
    %1 = vector.load %arg2[%c0_1, %c0_2] : memref<16x32xf32, #tpu.memory_space<vmem>>, vector<16x32xf32>
    %cst = arith.constant dense<0.000000e+00> : vector<144x32xf32>
    %2 = tpu.matmul %0, %1, %cst {dimension_numbers = #tpu.dot_dimension_numbers<[1], [0], [0], [1], [0, 0, 1, 1], [], []>} : vector<144x16xf32>, vector<16x32xf32>, vector<144x32xf32> -> vector<144x32xf32>
    %cst_3 = arith.constant 0.000000e+00 : f32
    %3 = vector.broadcast %cst_3 : f32 to vector<144x32xf32>
    %4 = arith.maximumf %2, %3 : vector<144x32xf32>
    %cst_4 = arith.constant 0.000000e+00 : bf16
    %5 = vector.broadcast %cst_4 : bf16 to vector<16x32xbf16>
    %c0_5 = arith.constant 0 : index
    %c0_6 = arith.constant 0 : index
    %6 = vector.load %arg6[%c0_5, %c0_6] : memref<176x32xbf16, #tpu.memory_space<vmem>>, vector<16x32xbf16>
    tpu.vector_store %arg6[%c0_5, %c0_6], %5 {strides = array<i32>} : memref<176x32xbf16, #tpu.memory_space<vmem>>, vector<16x32xbf16>,
    %c160 = arith.constant 160 : index
    %c0_7 = arith.constant 0 : index
    %7 = vector.load %arg6[%c160, %c0_7] : memref<176x32xbf16, #tpu.memory_space<vmem>>, vector<16x32xbf16>
    tpu.vector_store %arg6[%c160, %c0_7], %5 {strides = array<i32>} : memref<176x32xbf16, #tpu.memory_space<vmem>>, vector<16x32xbf16>,
    %8 = arith.truncf %4 : vector<144x32xf32> to vector<144x32xbf16>
    %c16 = arith.constant 16 : index
    %c0_8 = arith.constant 0 : index
    %9 = vector.load %arg6[%c16, %c0_8] : memref<176x32xbf16, #tpu.memory_space<vmem>>, vector<144x32xbf16>
    tpu.vector_store %arg6[%c16, %c0_8], %8 {strides = array<i32>} : memref<176x32xbf16, #tpu.memory_space<vmem>>, vector<144x32xbf16>,
    %c3 = arith.constant 3 : index
    %c0_9 = arith.constant 0 : index
    %10 = vector.load %arg6[%c3, %c0_9] : memref<176x32xbf16, #tpu.memory_space<vmem>>, vector<144x32xbf16>
    %c0_10 = arith.constant 0 : index
    %c0_11 = arith.constant 0 : index
    %11 = vector.load %arg7[%c0_10, %c0_11] : memref<144x288xbf16, #tpu.memory_space<vmem>>, vector<144x32xbf16>
    tpu.vector_store %arg7[%c0_10, %c0_11], %10 {strides = array<i32>} : memref<144x288xbf16, #tpu.memory_space<vmem>>, vector<144x32xbf16>,
    %c4 = arith.constant 4 : index
    %c0_12 = arith.constant 0 : index
    %12 = vector.load %arg6[%c4, %c0_12] : memref<176x32xbf16, #tpu.memory_space<vmem>>, vector<144x32xbf16>
    %c0_13 = arith.constant 0 : index
    %c32 = arith.constant 32 : index
    %13 = vector.load %arg7[%c0_13, %c32] : memref<144x288xbf16, #tpu.memory_space<vmem>>, vector<144x32xbf16>
    tpu.vector_store %arg7[%c0_13, %c32], %12 {strides = array<i32>} : memref<144x288xbf16, #tpu.memory_space<vmem>>, vector<144x32xbf16>,
    %c5 = arith.constant 5 : index
    %c0_14 = arith.constant 0 : index
    %14 = vector.load %arg6[%c5, %c0_14] : memref<176x32xbf16, #tpu.memory_space<vmem>>, vector<144x32xbf16>
    %c0_15 = arith.constant 0 : index
    %c64 = arith.constant 64 : index
    %15 = vector.load %arg7[%c0_15, %c64] : memref<144x288xbf16, #tpu.memory_space<vmem>>, vector<144x32xbf16>
    tpu.vector_store %arg7[%c0_15, %c64], %14 {strides = array<i32>} : memref<144x288xbf16, #tpu.memory_space<vmem>>, vector<144x32xbf16>,
    %c15 = arith.constant 15 : index
    %c0_16 = arith.constant 0 : index
    %16 = vector.load %arg6[%c15, %c0_16] : memref<176x32xbf16, #tpu.memory_space<vmem>>, vector<144x32xbf16>
    %c0_17 = arith.constant 0 : index
    %c96 = arith.constant 96 : index
    %17 = vector.load %arg7[%c0_17, %c96] : memref<144x288xbf16, #tpu.memory_space<vmem>>, vector<144x32xbf16>
    tpu.vector_store %arg7[%c0_17, %c96], %16 {strides = array<i32>} : memref<144x288xbf16, #tpu.memory_space<vmem>>, vector<144x32xbf16>,
    %c16_18 = arith.constant 16 : index
    %c0_19 = arith.constant 0 : index
    %18 = vector.load %arg6[%c16_18, %c0_19] : memref<176x32xbf16, #tpu.memory_space<vmem>>, vector<144x32xbf16>
    %c0_20 = arith.constant 0 : index
    %c128 = arith.constant 128 : index
    %19 = vector.load %arg7[%c0_20, %c128] : memref<144x288xbf16, #tpu.memory_space<vmem>>, vector<144x32xbf16>
    tpu.vector_store %arg7[%c0_20, %c128], %18 {strides = array<i32>} : memref<144x288xbf16, #tpu.memory_space<vmem>>, vector<144x32xbf16>,
    %c17 = arith.constant 17 : index
    %c0_21 = arith.constant 0 : index
    %20 = vector.load %arg6[%c17, %c0_21] : memref<176x32xbf16, #tpu.memory_space<vmem>>, vector<144x32xbf16>
    %c0_22 = arith.constant 0 : index
    %c160_23 = arith.constant 160 : index
    %21 = vector.load %arg7[%c0_22, %c160_23] : memref<144x288xbf16, #tpu.memory_space<vmem>>, vector<144x32xbf16>
    tpu.vector_store %arg7[%c0_22, %c160_23], %20 {strides = array<i32>} : memref<144x288xbf16, #tpu.memory_space<vmem>>, vector<144x32xbf16>,
    %c27 = arith.constant 27 : index
    %c0_24 = arith.constant 0 : index
    %22 = vector.load %arg6[%c27, %c0_24] : memref<176x32xbf16, #tpu.memory_space<vmem>>, vector<144x32xbf16>
    %c0_25 = arith.constant 0 : index
    %c192 = arith.constant 192 : index
    %23 = vector.load %arg7[%c0_25, %c192] : memref<144x288xbf16, #tpu.memory_space<vmem>>, vector<144x32xbf16>
    tpu.vector_store %arg7[%c0_25, %c192], %22 {strides = array<i32>} : memref<144x288xbf16, #tpu.memory_space<vmem>>, vector<144x32xbf16>,
    %c28 = arith.constant 28 : index
    %c0_26 = arith.constant 0 : index
    %24 = vector.load %arg6[%c28, %c0_26] : memref<176x32xbf16, #tpu.memory_space<vmem>>, vector<144x32xbf16>
    %c0_27 = arith.constant 0 : index
    %c224 = arith.constant 224 : index
    %25 = vector.load %arg7[%c0_27, %c224] : memref<144x288xbf16, #tpu.memory_space<vmem>>, vector<144x32xbf16>
    tpu.vector_store %arg7[%c0_27, %c224], %24 {strides = array<i32>} : memref<144x288xbf16, #tpu.memory_space<vmem>>, vector<144x32xbf16>,
    %c29 = arith.constant 29 : index
    %c0_28 = arith.constant 0 : index
    %26 = vector.load %arg6[%c29, %c0_28] : memref<176x32xbf16, #tpu.memory_space<vmem>>, vector<144x32xbf16>
    %c0_29 = arith.constant 0 : index
    %c256 = arith.constant 256 : index
    %27 = vector.load %arg7[%c0_29, %c256] : memref<144x288xbf16, #tpu.memory_space<vmem>>, vector<144x32xbf16>
    tpu.vector_store %arg7[%c0_29, %c256], %26 {strides = array<i32>} : memref<144x288xbf16, #tpu.memory_space<vmem>>, vector<144x32xbf16>,
    %c0_30 = arith.constant 0 : index
    %c0_31 = arith.constant 0 : index
    %28 = vector.load %arg7[%c0_30, %c0_31] : memref<144x288xbf16, #tpu.memory_space<vmem>>, vector<144x288xbf16>
    %c0_32 = arith.constant 0 : index
    %c0_33 = arith.constant 0 : index
    %29 = vector.load %arg3[%c0_32, %c0_33] : memref<288x64xbf16, #tpu.memory_space<vmem>>, vector<288x64xbf16>
    %cst_34 = arith.constant dense<0.000000e+00> : vector<144x64xf32>
    %30 = tpu.matmul %28, %29, %cst_34 {dimension_numbers = #tpu.dot_dimension_numbers<[1], [0], [0], [1], [0, 0, 1, 1], [], []>} : vector<144x288xbf16>, vector<288x64xbf16>, vector<144x64xf32> -> vector<144x64xf32>
    %c0_35 = arith.constant 0 : index
    %c0_36 = arith.constant 0 : index
    %31 = vector.load %arg4[%c0_35, %c0_36] : memref<1x64xf32, #tpu.memory_space<vmem>>, vector<1x64xf32>
    %32 = vector.broadcast %31 : vector<1x64xf32> to vector<144x64xf32>
    %33 = arith.addf %30, %32 : vector<144x64xf32>
    %cst_37 = arith.constant 0.000000e+00 : f32
    %34 = vector.broadcast %cst_37 : f32 to vector<144x64xf32>
    %35 = arith.maximumf %33, %34 : vector<144x64xf32>
    %36 = arith.truncf %35 : vector<144x64xf32> to vector<144x64xbf16>
    %c0_38 = arith.constant 0 : index
    %c0_39 = arith.constant 0 : index
    %37 = vector.load %arg5[%c0_38, %c0_39] : memref<144x64xbf16, #tpu.memory_space<vmem>>, vector<144x64xbf16>
    tpu.vector_store %arg5[%c0_38, %c0_39], %36 {strides = array<i32>} : memref<144x64xbf16, #tpu.memory_space<vmem>>, vector<144x64xbf16>,
    return
  }
  func.func @transform_0(%arg0: i32) -> (i32, i32) {
    %c0_i32 = arith.constant 0 : i32
    %c0_i32_0 = arith.constant 0 : i32
    return %arg0, %c0_i32 : i32, i32
  }
  func.func @transform_1(%arg0: i32) -> (i32, i32) {
    %c0_i32 = arith.constant 0 : i32
    %c0_i32_0 = arith.constant 0 : i32
    %c0_i32_1 = arith.constant 0 : i32
    return %c0_i32, %c0_i32_0 : i32, i32
  }
  func.func @transform_2(%arg0: i32) -> (i32, i32) {
    %c0_i32 = arith.constant 0 : i32
    %c0_i32_0 = arith.constant 0 : i32
    %c0_i32_1 = arith.constant 0 : i32
    return %c0_i32, %c0_i32_0 : i32, i32
  }
  func.func @transform_3(%arg0: i32) -> (i32, i32) {
    %c0_i32 = arith.constant 0 : i32
    %c0_i32_0 = arith.constant 0 : i32
    %c0_i32_1 = arith.constant 0 : i32
    return %c0_i32, %c0_i32_0 : i32, i32
  }
  func.func @transform_4(%arg0: i32) -> (i32, i32) {
    %c0_i32 = arith.constant 0 : i32
    %c0_i32_0 = arith.constant 0 : i32
    return %arg0, %c0_i32 : i32, i32
  }
}

module attributes {stable_mosaic.version = 11 : i64} {
  func.func @_fc_head_kernel(%arg0: i32, %arg1: memref<2x3200xbf16, #tpu.memory_space<vmem>>, %arg2: memref<3200x256xbf16, #tpu.memory_space<vmem>>, %arg3: memref<1x256xf32, #tpu.memory_space<vmem>>, %arg4: memref<256x4xf32, #tpu.memory_space<vmem>>, %arg5: memref<1x4xf32, #tpu.memory_space<vmem>>, %arg6: memref<2x4xf32, #tpu.memory_space<vmem>>, %arg7: memref<2x256xf32, #tpu.memory_space<vmem>>) attributes {dimension_semantics = [#tpu.dimension_semantics<arbitrary>], iteration_bounds = array<i64: 2>, scalar_prefetch = 0 : i64, scratch_operands = 1 : i64, tpu.core_type = #tpu.core_type<tc>, window_params = [{transform_indices = @transform_0, window_bounds = array<i64: 2, 3200>}, {transform_indices = @transform_1, window_bounds = array<i64: 3200, 256>}, {pipeline_mode = #tpu.pipeline_mode<synchronous>, transform_indices = @transform_2, window_bounds = array<i64: 1, 256>}, {pipeline_mode = #tpu.pipeline_mode<synchronous>, transform_indices = @transform_3, window_bounds = array<i64: 256, 4>}, {pipeline_mode = #tpu.pipeline_mode<synchronous>, transform_indices = @transform_4, window_bounds = array<i64: 1, 4>}, {pipeline_mode = #tpu.pipeline_mode<synchronous>, transform_indices = @transform_5, window_bounds = array<i64: 2, 4>}]} {
    %c0_i32 = arith.constant 0 : i32
    %0 = arith.cmpi eq, %arg0, %c0_i32 : i32
    %1 = arith.extui %0 : i1 to i32
    %c0_i32_0 = arith.constant 0 : i32
    %2 = arith.cmpi ne, %1, %c0_i32_0 : i32
    scf.if %2 {
      %cst_9 = arith.constant 0.000000e+00 : f32
      %12 = vector.broadcast %cst_9 : f32 to vector<2x256xf32>
      %c0_10 = arith.constant 0 : index
      %c0_11 = arith.constant 0 : index
      %13 = vector.load %arg7[%c0_10, %c0_11] : memref<2x256xf32, #tpu.memory_space<vmem>>, vector<2x256xf32>
      tpu.vector_store %arg7[%c0_10, %c0_11], %12 {strides = array<i32>} : memref<2x256xf32, #tpu.memory_space<vmem>>, vector<2x256xf32>,
    } else {
    }
    %c0 = arith.constant 0 : index
    %c0_1 = arith.constant 0 : index
    %3 = vector.load %arg7[%c0, %c0_1] : memref<2x256xf32, #tpu.memory_space<vmem>>, vector<2x256xf32>
    %c0_2 = arith.constant 0 : index
    %c0_3 = arith.constant 0 : index
    %4 = vector.load %arg1[%c0_2, %c0_3] : memref<2x3200xbf16, #tpu.memory_space<vmem>>, vector<2x3200xbf16>
    %c0_4 = arith.constant 0 : index
    %c0_5 = arith.constant 0 : index
    %5 = vector.load %arg2[%c0_4, %c0_5] : memref<3200x256xbf16, #tpu.memory_space<vmem>>, vector<3200x256xbf16>
    %cst = arith.constant dense<0.000000e+00> : vector<2x256xf32>
    %6 = tpu.matmul %4, %5, %cst {dimension_numbers = #tpu.dot_dimension_numbers<[1], [0], [0], [1], [0, 0, 1, 1], [], []>} : vector<2x3200xbf16>, vector<3200x256xbf16>, vector<2x256xf32> -> vector<2x256xf32>
    %7 = arith.addf %3, %6 : vector<2x256xf32>
    %c0_6 = arith.constant 0 : index
    %c0_7 = arith.constant 0 : index
    %8 = vector.load %arg7[%c0_6, %c0_7] : memref<2x256xf32, #tpu.memory_space<vmem>>, vector<2x256xf32>
    tpu.vector_store %arg7[%c0_6, %c0_7], %7 {strides = array<i32>} : memref<2x256xf32, #tpu.memory_space<vmem>>, vector<2x256xf32>,
    %c1_i32 = arith.constant 1 : i32
    %9 = arith.cmpi eq, %arg0, %c1_i32 : i32
    %10 = arith.extui %9 : i1 to i32
    %c0_i32_8 = arith.constant 0 : i32
    %11 = arith.cmpi ne, %10, %c0_i32_8 : i32
    scf.if %11 {
      %c0_9 = arith.constant 0 : index
      %c0_10 = arith.constant 0 : index
      %12 = vector.load %arg7[%c0_9, %c0_10] : memref<2x256xf32, #tpu.memory_space<vmem>>, vector<2x256xf32>
      %c0_11 = arith.constant 0 : index
      %c0_12 = arith.constant 0 : index
      %13 = vector.load %arg3[%c0_11, %c0_12] : memref<1x256xf32, #tpu.memory_space<vmem>>, vector<1x256xf32>
      %14 = vector.broadcast %13 : vector<1x256xf32> to vector<2x256xf32>
      %15 = arith.addf %12, %14 : vector<2x256xf32>
      %cst_13 = arith.constant 0.000000e+00 : f32
      %16 = vector.broadcast %cst_13 : f32 to vector<2x256xf32>
      %17 = arith.maximumf %15, %16 : vector<2x256xf32>
      %c0_14 = arith.constant 0 : index
      %c0_15 = arith.constant 0 : index
      %18 = vector.load %arg4[%c0_14, %c0_15] : memref<256x4xf32, #tpu.memory_space<vmem>>, vector<256x4xf32>
      %cst_16 = arith.constant dense<0.000000e+00> : vector<2x4xf32>
      %19 = tpu.matmul %17, %18, %cst_16 {dimension_numbers = #tpu.dot_dimension_numbers<[1], [0], [0], [1], [0, 0, 1, 1], [], []>} : vector<2x256xf32>, vector<256x4xf32>, vector<2x4xf32> -> vector<2x4xf32>
      %c0_17 = arith.constant 0 : index
      %c0_18 = arith.constant 0 : index
      %20 = vector.load %arg5[%c0_17, %c0_18] : memref<1x4xf32, #tpu.memory_space<vmem>>, vector<1x4xf32>
      %21 = vector.broadcast %20 : vector<1x4xf32> to vector<2x4xf32>
      %22 = arith.addf %19, %21 : vector<2x4xf32>
      %c0_19 = arith.constant 0 : index
      %c0_20 = arith.constant 0 : index
      %23 = vector.load %arg6[%c0_19, %c0_20] : memref<2x4xf32, #tpu.memory_space<vmem>>, vector<2x4xf32>
      tpu.vector_store %arg6[%c0_19, %c0_20], %22 {strides = array<i32>} : memref<2x4xf32, #tpu.memory_space<vmem>>, vector<2x4xf32>,
    } else {
    }
    return
  }
  func.func @transform_0(%arg0: i32) -> (i32, i32) {
    %c0_i32 = arith.constant 0 : i32
    %c0_i32_0 = arith.constant 0 : i32
    return %c0_i32, %arg0 : i32, i32
  }
  func.func @transform_1(%arg0: i32) -> (i32, i32) {
    %c0_i32 = arith.constant 0 : i32
    %c0_i32_0 = arith.constant 0 : i32
    return %arg0, %c0_i32 : i32, i32
  }
  func.func @transform_2(%arg0: i32) -> (i32, i32) {
    %c0_i32 = arith.constant 0 : i32
    %c0_i32_0 = arith.constant 0 : i32
    %c0_i32_1 = arith.constant 0 : i32
    return %c0_i32, %c0_i32_0 : i32, i32
  }
  func.func @transform_3(%arg0: i32) -> (i32, i32) {
    %c0_i32 = arith.constant 0 : i32
    %c0_i32_0 = arith.constant 0 : i32
    %c0_i32_1 = arith.constant 0 : i32
    return %c0_i32, %c0_i32_0 : i32, i32
  }
  func.func @transform_4(%arg0: i32) -> (i32, i32) {
    %c0_i32 = arith.constant 0 : i32
    %c0_i32_0 = arith.constant 0 : i32
    %c0_i32_1 = arith.constant 0 : i32
    return %c0_i32, %c0_i32_0 : i32, i32
  }
  func.func @transform_5(%arg0: i32) -> (i32, i32) {
    %c0_i32 = arith.constant 0 : i32
    %c0_i32_0 = arith.constant 0 : i32
    %c0_i32_1 = arith.constant 0 : i32
    return %c0_i32, %c0_i32_0 : i32, i32
  }
}

</mosaic_0001>

<bundles_post_ra>
// kernel: dqn_forward.2
= control target key start
LH: loop header
LB: loop body
LE: loop exit
PB: predicated region body
PF: predicated region fallthrough
CT: control target
= control target key end

     0   :  { %9 = vsyncpa [#allocation5], 0  ;;  %s3324_s0 = inlined_call_operand.vmem [shape: f32[288,16], index: 0, kind: input, shape index: {}]   ;;  %s3325_s1 = inlined_call_operand.hbm [shape: f32[16,32], index: 1, kind: input, shape index: {}]   ;;  %s3326_s2 = inlined_call_operand.vmem [shape: bf16[288,64], index: 2, kind: input, shape index: {}]   ;;  %s3327_s3 = inlined_call_operand.hbm [shape: f32[1,64], index: 3, kind: input, shape index: {}]   ;;  %s3328_s4 = inlined_call_operand.vmem [shape: bf16[288,64], index: 4, kind: output, shape index: {}]  }
   0x1   :  { %10 = vsyncpa [#allocation7], 0  ;;  %s2463_s15 = smov 0  }
   0x2 LB: > { %s2028_s16 = sadd.s32 4294967295, %s2426_s15   ;;  %p2030_p0 = scmp.ge.s32.totalorder %s2426_s15, 1  ;;  %s2426_s15 = sphi %s2463_s15, %s16_s15  }
   0x3   : > { %p136_p1 = scmp.lt.s32.totalorder %s2426_s15, 3  ;;  %s2428_s17 = smov [#allocation4]  }
   0x4   : > { %s148_s18 = sshll.u32 %s2428_s17, 4  ;;  %p2477_p3 = scmp.eq.s32.totalorder %s2028_s16, 0  ;;  %s149_s18 = int_to_ptr.vmem [resolvable:$true] %s148_s18 }
   0x5   : > { %p2471_p2 = pnand %p2030_p0, %p136_p1  ;;  %s2429_s21 = smov [#allocation6]  }
   0x6   : > { %s3333_s20 = scalar_select %p2477_p3, 1, 0 }
   0x7   : > { %s3332_s19 = scalar_select %p2471_p2, 1, 0 }
   0x8   : > { %p2309_p4 = pneg %p2471_p2  ;;  %s165_s22 = sshll.u32 %s2429_s21, 4  ;;  %s2489_s22 = int_to_ptr.vmem [resolvable:$true] %s165_s22 }
   0x9   : > { %s2356_s26 = scalar_lea.hbm %s3325_s1, 256 }
   0xa   : > { %p2485_p5 = pnand %p2477_p3, %p2309_p4  ;;  %p2357_p6 = scmp.ne.s32.totalorder %s3325_s1, %s2356_s26 }
   0xb   : > { %p2363_p10 = scmp.lt.u32.totalorder %s2356_s26, %s3325_s1 }
   0xc   : > { %p2358_p7 = pneg %p2485_p5 }
   0xe   : > { %p2359_p8 = pnand %p2358_p7, %p2357_p6 }
  0x10   : > { %p2360_p9 = pneg %p2359_p8 }
  0x12   : > { %p2365_p11 = pnand %p2363_p10, %p2360_p9 }
  0x14   : > { %2368 = shalt.err (!%p2365_p11)
}
  0x15   : > { %s2369_s5 = scalar_lea.vmem %s149_s18, 256  ;;  %p2377_p1 = scmp.lt.s32.totalorder %s149_s18, %s149_s18 }
  0x16   : > { %p2370_p12 = scmp.ne.s32.totalorder %s149_s18, %s2369_s5  ;;  %p2378_p4 = scmp.lt.s32.totalorder %s2369_s5, %s2369_s5 }
  0x18   : > { %p2372_p13 = pnand %p2370_p12, %p2358_p7  ;;  %p2379_p3 = por %p2378_p4, %p2377_p1 }
  0x1a   : > { %p2373_p0 = pneg %p2372_p13 }
  0x1c   : > { %p2380_p2 = pnand %p2379_p3, %p2373_p0 }
  0x1e   : > { %2383 = shalt.err (!%p2380_p2)
}
  0x1f   : > { %s2430_s6 = smov 128   ;;  %s2431_s7 = smov 8  }
  0x20   : > { %2312 = dma.hbm_to_vmem [thread:$0]  (!%p2485_p5), %s3325_s1, 256, %s149_s18, [#allocation5], %s2430_s6, %s2430_s6, %s2431_s7  }
  0x21   : > { %s2384_s12 = scalar_lea.hbm %s3327_s3, 16 }
  0x22   : > { %p2385_p6 = scmp.ne.s32.totalorder %s3327_s3, %s2384_s12  ;;  %p2391_p8 = scmp.lt.u32.totalorder %s2384_s12, %s3327_s3 }
  0x24   : > { %p2387_p2 = pnand %p2385_p6, %p2358_p7 }
  0x26   : > { %p2388_p3 = pneg %p2387_p2 }
  0x28   : > { %p2393_p9 = pnand %p2391_p8, %p2388_p3 }
  0x2a   : > { %2396 = shalt.err (!%p2393_p9)
}
  0x2b   : > { %s2397_s18 = scalar_lea.vmem %s2489_s22, 16  ;;  %s2404_s24 = scalar_lea.vmem %s2489_s22, 32 }
  0x2c   : > { %p2398_p10 = scmp.ne.s32.totalorder %s2489_s22, %s2397_s18  ;;  %p2405_p13 = scmp.lt.s32.totalorder %s2489_s22, %s2489_s22 }
  0x2d   : > { %p2406_p0 = scmp.lt.s32.totalorder %s2404_s24, %s2397_s18 }
  0x2e   : > { %p2400_p11 = pnand %p2398_p10, %p2358_p7 }
  0x2f   : > { %p2407_p1 = por %p2406_p0, %p2405_p13 }
  0x30   : > { %p2401_p12 = pneg %p2400_p11 }
  0x32   : > { %p2408_p4 = pnand %p2407_p1, %p2401_p12 }
  0x34   : > { %2411 = shalt.err (!%p2408_p4)
}
  0x35   : > { %2315 = dma.hbm_to_vmem [thread:$0]  (!%p2485_p5), %s3327_s3, 16, %s2489_s22, [#allocation7]  }
  0x36   : > { %p3335_p6 = scmp.ne.s32.totalorder %s3332_s19, 0 }
  0x37   : > { %p3336_p7 = scmp.ne.s32.totalorder (!%p3335_p6), %s3333_s20, 0 }
  0x38   : > { %187 = sbr.rel (%p3335_p6) target bundleno = 761 (0x2f9), region = 36 }
  0x3f   : > { %2417 = dma.done.wait (%p3336_p7), [#allocation5], 256  }
  0x40   : > { %2419 = vsyncadd (%p3336_p7), [#allocation5], 4294967040 }
  0x41   : > { %2421 = dma.done.wait (%p3336_p7), [#allocation7], 16  }
  0x42   : > { %2423 = vsyncadd (%p3336_p7), [#allocation7], 4294967280  ;;  %s217_s23 = smul.u32 18, %s2028_s16  ;;  %vm250_vm0 = vcmask 130048   ;;  %v248_v0 = vld [vmem:[#allocation4] sm:$0xff]  ;;  %v249_v1 = vld [vmem:[#allocation4 + $0x8] sm:$0xff] }
  0x43   : > { %v2295_v2 = vpack.c.bf16 %v249_v1, %v248_v0  ;;  %vm478_vm1 = vcmask 261120   ;;  %v2432_v21 = vmov 0   ;;  %v2433_v22 = vmov 0.0   ;;  %v2338_v23 = vld [vmem:[%s3326_s2 + $0x80] sm:$0xff]   ;;  %v2339_v24 = vld [vmem:[%s3326_s2 + $0x88] sm:$0xff]   ;;  %s2435_s11 = smov 32  }
  0x44   : > { %p218_p2 = scmp.lt.s32.totalorder %s217_s23, 35  ;;  %479 = vst.msk [vmem:[#allocation2] sm:$0xff] %vm478_vm1, %v2432_v21  ;;  %480 = vst.msk [vmem:[#allocation2 + $0x50] sm:$0xff] %vm478_vm1, %v2432_v21  ;;  %vm2434_vm2 = vmmov 0   ;;  %v2340_v53 = vld [vmem:[%s3326_s2 + $0x40] sm:$0xff]   ;;  %vm637_vm3 = vcmask 1045504  }
  0x45   : > { %2296 = vmatprep.subr.bf16.mxu0 %v2295_v2  ;;  %2299 = vmatprep.subr.bf16.mxu1 %v2295_v2  ;;  %v2341_v54 = vld [vmem:[%s3326_s2] sm:$0xff]   ;;  %vm704_vm4 = vsmask.f32 5376  ;;  %vm1252_vm5 = vcmask 1041408   ;;  %vm841_vm6 = vsmask.f32 256 }
  0x46   : > { %s3338_s23 = smov (!%p218_p2, %s217_s23), 35  ;;  %2298 = vmatpush3.bf16.msra.mxu0 %v2295_v2  ;;  %2300 = vmatpush3.bf16.msra.mxu1 %v2295_v2  ;;  %vm1318_vm7 = vsmask.f32 1280  ;;  %v2343_v21 = vld [vmem:[%s3326_s2 + $0x8] sm:$0xff]   ;;  %s2436_s26 = smov 64   ;;  %vm684_vm11 = vcmask 523520  }
  0x47   : > { %s2037_s19 = sshll.u32 %s3338_s23, 3  ;;  %2255 = vmatprep.subr.bf16.mxu0 %v2433_v22  ;;  %2143 = vmatprep.subr.bf16.mxu1 %v2340_v53  ;;  %vm983_vm8 = vsmask.f32 7424  ;;  %vm1106_vm9 = vsmask.f32 2304  ;;  %vm821_vm12 = vcmask 785920  }
  0x48   : > { %s2557_s28 = scalar_lea.vmem %s3324_s0, %s2037_s19  ;;  %s2437_s19 = smov 96   ;;  %vm509_vm10 = vsmask.f32 6400  ;;  %vm945_vm13 = vcmask 1048320   ;;  %vm1931_vm14 = vcmask 519168  }
  0x49   : > { %v230_v3 = vld [vmem:[%s2557_s28] sm:$0xff]  ;;  %v231_v5 = vld [vmem:[%s2557_s28 + $0x8] sm:$0xff]  ;;  %v232_v7 = vld [vmem:[%s2557_s28 + $0x10] sm:$0xff] }
  0x4a   : > { %2228 = vmatprep.mubr.msk.f32.mxu0 %vm250_vm0, %v230_v3  ;;  %v234_v4 = vld [vmem:[%s2557_s28 + $0x20] sm:$0xff]  ;;  %v235_v6 = vld [vmem:[%s2557_s28 + $0x28] sm:$0xff]  ;;  %v236_v8 = vld [vmem:[%s2557_s28 + $0x30] sm:$0xff] }
  0x4b   : > { %2234 = vmatprep.mubr.msk.f32.mxu1 %vm250_vm0, %v234_v4  ;;  %v233_v9 = vld [vmem:[%s2557_s28 + $0x18] sm:$0xff]  ;;  %2229 = vmatmul.mubr.msk.f32.vlgmr.msra.gmra.mrb[0].mxu0 %vm250_vm0, %v231_v5  ;;  %v238_v11 = vld [vmem:[%s2557_s28 + $0x40] sm:$0xff]  ;;  %v239_v12 = vld [vmem:[%s2557_s28 + $0x48] sm:$0xff] }
  0x4c   : > { %v237_v10 = vld [vmem:[%s2557_s28 + $0x38] sm:$0xff]  ;;  %2235 = vmatmul.mubr.msk.f32.vlgmr.msra.gmra.mrb[0].mxu1 %vm250_vm0, %v235_v6  ;;  %2231 = vmatprep.mubr.msk.f32.mxu0 %vm250_vm0, %v232_v7  ;;  %v240_v13 = vld [vmem:[%s2557_s28 + $0x50] sm:$0xff]  ;;  %v242_v15 = vld [vmem:[%s2557_s28 + $0x60] sm:$0xff] }
  0x4d   : > { %2237 = vmatprep.mubr.msk.f32.mxu1 %vm250_vm0, %v236_v8  ;;  %v241_v14 = vld [vmem:[%s2557_s28 + $0x58] sm:$0xff]  ;;  %v243_v16 = vld [vmem:[%s2557_s28 + $0x68] sm:$0xff]  ;;  %v244_v17 = vld [vmem:[%s2557_s28 + $0x70] sm:$0xff]  ;;  %2256 = vmatpush3.bf16.msra.mxu0 %v2338_v23 }
  0x4e   : > { %v245_v18 = vld [vmem:[%s2557_s28 + $0x78] sm:$0xff]  ;;  %v246_v19 = vld [vmem:[%s2557_s28 + $0x80] sm:$0xff]  ;;  %v247_v20 = vld [vmem:[%s2557_s28 + $0x88] sm:$0xff]  ;;  %2257 = vmatprep.subr.bf16.mxu0 %v2433_v22  ;;  %2144 = vmatpush3.bf16.msra.mxu1 %v2341_v54 }
  0x4f   : > { %2232 = vmatmul.mubr.msk.f32.gmra.mrb[2].mxu0 %vm250_vm0, %v233_v9  ;;  %v694_v41 = vld [vmem:[#allocation2] sm:$0xfc] }
  0x50   : > { %2238 = vmatmul.mubr.msk.f32.gmra.mrb[2].mxu1 %vm250_vm0, %v237_v10  ;;  %2259 = vmatprep.mubr.msk.bf16.mxu0 %vm2434_vm2, %v2433_v22  ;;  %v617_v47 = vld [vmem:[#allocation2] sm:$0xfc]  ;;  %v706_v48 = vshrl.u32 %v694_v41, 16  ;;  %v709_v49 = vshll.u32 %v694_v41, 16  ;;  %v2342_v10 = vld [vmem:[%s3326_s2 + $0x48] sm:$0xff]  }
  0x51   : > { %2240 = vmatprep.mubr.msk.f32.mxu1 %vm250_vm0, %v238_v11  ;;  %2258 = vmatpush3.bf16.msra.mxu0 %v2339_v24  ;;  %v831_v52 = vld [vmem:[#allocation2] sm:$0x80]  ;;  %v638_v56 = vrot.slane %v617_v47, 2  ;;  %v2344_v24 = vld [vmem:[%s3326_s2 + $0x50] sm:$0xff]  }
  0x52   : > { %v708_v58 = vrot.slane %v706_v48, 2  ;;  %v711_v59 = vrot.slane %v709_v49, 3  ;;  %v843_v60 = vshrl.u32 %v831_v52, 16  ;;  %2145 = vmatprep.subr.bf16.mxu1 %v2342_v10 }
  0x53   : > { %2146 = vmatpush3.bf16.msra.mxu1 %v2343_v21 }
  0x54   : > { %2241 = vmatmul.mubr.msk.f32.gmra.mrb[4].mxu1 %vm250_vm0, %v239_v12  ;;  %v712_v7 = vor.u32 %v711_v59, %v708_v58  ;;  %2147 = vmatprep.subr.bf16.mxu1 %v2344_v24 }
  0x55   : > { %2243 = vmatprep.mubr.msk.f32.mxu1 %vm250_vm0, %v240_v13 }
  0x58   : > { %2244 = vmatmul.mubr.msk.f32.gmra.mrb[6].mxu1 %vm250_vm0, %v241_v14 }
  0x59   : > { %2246 = vmatprep.mubr.msk.f32.mxu1 %vm250_vm0, %v242_v15 }
  0x5c   : > { %2247 = vmatmul.mubr.msk.f32.gmra.mrb[8].mxu1 %vm250_vm0, %v243_v16 }
  0x5d   : > { %2249 = vmatprep.mubr.msk.f32.mxu1 %vm250_vm0, %v244_v17 }
  0x60   : > { %2250 = vmatmul.mubr.msk.f32.gmra.mrb[10].mxu1 %vm250_vm0, %v245_v18 }
  0x61   : > { %2252 = vmatprep.mubr.msk.f32.mxu1 %vm250_vm0, %v246_v19 }
  0x64   : > { %2253 = vmatmul.mubr.msk.f32.gmra.mrb[12].mxu1 %vm250_vm0, %v247_v20 }
 0x11e   : > { %v2230_v25 = vpop.f32.mrb[0].mxu0 }
 0x11f   : > { %v2236_v26 = vpop.f32.mrb[0].mxu1  ;;  %v461_v27 = vmax.f32 %v2230_v25, 0.0  ;;  %v371_v28 = vpop.f32.mrb[1].mxu0 }
 0x120   : > { %v465_v29 = vmax.f32 %v2236_v26, 0.0  ;;  %v391_v30 = vpop.f32.mrb[1].mxu1  ;;  %v460_v31 = vmax.f32 %v371_v28, 0.0 }
 0x121   : > { %v464_v32 = vmax.f32 %v391_v30, 0.0 }
 0x122   : > { %v481_v33 = vpack.c.bf16 %v461_v27, %v460_v31  ;;  %v2233_v34 = vpop.f32.mrb[2].mxu0 }
 0x123   : > { %v483_v35 = vpack.c.bf16 %v465_v29, %v464_v32  ;;  %v2239_v36 = vpop.f32.mrb[2].mxu1  ;;  %v463_v37 = vmax.f32 %v2233_v34, 0.0  ;;  %v381_v38 = vpop.f32.mrb[3].mxu0 }
 0x124   : > { %v467_v39 = vmax.f32 %v2239_v36, 0.0  ;;  %v401_v40 = vpop.f32.mrb[3].mxu1  ;;  %490 = vst.msk [vmem:[#allocation2 + $0x8] sm:$0xff] %vm478_vm1, %v481_v33  ;;  %v462_v42 = vmax.f32 %v381_v38, 0.0  ;;  %v845_v33 = vrot.slane %v843_v60, 7  ;;  %v2345_v36 = vld [vmem:[%s3326_s2 + $0x10] sm:$0xff]  }
 0x125   : > { %492 = vst.msk [vmem:[#allocation2 + $0x18] sm:$0xff] %vm478_vm1, %v483_v35  ;;  %v466_v43 = vmax.f32 %v401_v40, 0.0  ;;  %2148 = vmatpush3.bf16.msra.mxu1 %v2345_v36 }
 0x126   : > { %v482_v44 = vpack.c.bf16 %v463_v37, %v462_v42 }
 0x127   : > { %v484_v45 = vpack.c.bf16 %v467_v39, %v466_v43  ;;  %v2242_v46 = vpop.f32.mrb[4].mxu1  ;;  %v2346_v43 = vld [vmem:[%s3326_s2 + $0x58] sm:$0xff]  }
 0x128   : > { %v469_v50 = vmax.f32 %v2242_v46, 0.0  ;;  %v411_v51 = vpop.f32.mrb[5].mxu1  ;;  %491 = vst.msk [vmem:[#allocation2 + $0x10] sm:$0xff] %vm478_vm1, %v482_v44  ;;  %2149 = vmatprep.subr.bf16.mxu1 %v2346_v43  ;;  %v2351_v43 = vld [vmem:[%s3326_s2 + $0x28] sm:$0xff]  }
 0x129   : > { %493 = vst.msk [vmem:[#allocation2 + $0x20] sm:$0xff] %vm478_vm1, %v484_v45  ;;  %v468_v55 = vmax.f32 %v411_v51, 0.0 }
 0x12b   : > { %v485_v57 = vpack.c.bf16 %v469_v50, %v468_v55  ;;  %v2617_v61 = vpop.f32.mrb[6].mxu1  ;;  %v1308_v62 = vld [vmem:[#allocation2 + $0x8] sm:$0xc0]  ;;  %v2347_v55 = vld [vmem:[%s3326_s2 + $0x18] sm:$0xff]  }
 0x12c   : > { %v2619_v63 = vld [vmem:[#allocation2 + $0x8] sm:$0xff]  ;;  %v2621_v0 = vpop.f32.mrb[7].mxu1  ;;  %v1320_v1 = vshrl.u32 %v1308_v62, 16  ;;  %v1323_v2 = vshll.u32 %v1308_v62, 16  ;;  %v2638_v12 = vld [vmem:[#allocation2 + $0x18] sm:$0xff]  ;;  %v471_v50 = vmax.f32 %v2617_v61, 0.0  ;;  %2150 = vmatpush3.bf16.msra.mxu1 %v2347_v55 }
 0x12d   : > { %494 = vst.msk [vmem:[#allocation2 + $0x28] sm:$0xff] %vm478_vm1, %v485_v57  ;;  %v639_v3 = vrot.slane %v2619_v63, 2  ;;  %v2626_v4 = vshrl.u32 %v2619_v63, 16  ;;  %v2629_v5 = vshll.u32 %v2619_v63, 16  ;;  %v1232_v8 = vld [vmem:[#allocation2 + $0x8] sm:$0xc0] }
 0x12e   : > { %v1322_v6 = vrot.slane %v1320_v1, 6  ;;  %v1325_v18 = vrot.slane %v1323_v2, 7  ;;  %v2664_v25 = vshll.u32 %v2638_v12, 16  ;;  %v1253_v27 = vrot.slane %v1232_v8, 6  ;;  %v955_v29 = vld [vmem:[#allocation2 + $0x8] sm:$0xff]  ;;  %v2669_v30 = vld [vmem:[#allocation2 + $0x18] sm:$0xff] }
 0x12f   : > { %v2631_v9 = vpop.f32.mrb[8].mxu1  ;;  %v2636_v11 = vld [vmem:[#allocation2 + $0x10] sm:$0xff]  ;;  %v640_v13 = vsel %vm637_vm3, %v638_v56, %v639_v3  ;;  %v716_v14 = vrot.slane %v2626_v4, 2  ;;  %v719_v15 = vrot.slane %v2629_v5, 3  ;;  %v849_v16 = vrot.slane %v2626_v4, 7  ;;  %964 = vst.msk [vmem:[#allocation3 + $0x8] sm:$0xff] %vm478_vm1, %v955_v29 }
 0x130   : > { %v2646_v17 = vpop.f32.mrb[9].mxu1  ;;  %v2649_v19 = vshrl.u32 %v2636_v11, 16  ;;  %v2652_v20 = vshll.u32 %v2636_v11, 16  ;;  %657 = vrot.lane.b32.xlu0 %v640_v13, %s2435_s11  ;;  %v2658_v23 = vld [vmem:[#allocation2 + $0x10] sm:$0xff]  ;;  %v1254_v28 = vrot.slane %v2636_v11, 6  ;;  %966 = vst.msk [vmem:[#allocation3 + $0x38] sm:$0xff] %vm478_vm1, %v2669_v30  ;;  %v1326_v44 = vor.u32 %v1325_v18, %v1322_v6 }
 0x131   : > { %v2666_v26 = vor.u32 %v719_v15, %v716_v14  ;;  %965 = vst.msk [vmem:[#allocation3 + $0x20] sm:$0xff] %vm478_vm1, %v2658_v23  ;;  %v852_v34 = vor.u32 %v849_v16, %v2629_v5  ;;  %v2686_v37 = vld [vmem:[#allocation2 + $0x20] sm:$0xff]  ;;  %v2689_v38 = vshrl.u32 %v2638_v12, 16  ;;  %v1256_v41 = vrot.slane %v2638_v12, 6 }
 0x132   : > { %v1330_v31 = vrot.slane %v2649_v19, 6  ;;  %v1333_v32 = vrot.slane %v2652_v20, 7  ;;  %v1255_v40 = vsel %vm1252_vm5, %v1253_v27, %v1254_v28  ;;  %967 = vst.msk [vmem:[#allocation3 + $0x50] sm:$0xff] %vm478_vm1, %v2686_v37  ;;  %v1342_v48 = vrot.slane %v2664_v25, 7  ;;  %v2708_v49 = vld [vmem:[#allocation2 + $0x20] sm:$0xff]  ;;  %v2350_v27 = vld [vmem:[%s3326_s2 + $0x68] sm:$0xff]  }
 0x133   : > { %v2678_v35 = vpop.f32.mrb[10].mxu1  ;;  %v721_v39 = vsel %vm704_vm4, %v712_v7, %v2666_v26  ;;  %v1339_v47 = vrot.slane %v2689_v38, 6  ;;  %v2714_v51 = vshll.u32 %v2708_v49, 16  ;;  %v853_v52 = vsel %vm841_vm6, %v845_v33, %v852_v34  ;;  %v2348_v62 = vld [vmem:[%s3326_s2 + $0x60] sm:$0xff]  }
 0x134   : > { %v2695_v42 = vpop.f32.mrb[11].mxu1  ;;  %v1334_v45 = vor.u32 %v1333_v32, %v1330_v31  ;;  %794 = vrot.lane.b32.xlu1 %v721_v39, %s2436_s26  ;;  %1272 = vrot.lane.b32.xlu0 %v1255_v40, %s2437_s19  ;;  %v2704_v46 = vld [vmem:[#allocation2 + $0x28] sm:$0xff]  ;;  %v1257_v57 = vsel %vm1252_vm5, %v1254_v28, %v1256_v41  ;;  %v1258_v58 = vrot.slane %v2708_v49, 6  ;;  %v641_v59 = vrot.slane %v2636_v11, 2  ;;  %v2349_v14 = vld [vmem:[%s3326_s2 + $0x20] sm:$0xff]  }
 0x135   : > { %968 = vst.msk [vmem:[#allocation3 + $0x68] sm:$0xff] %vm478_vm1, %v2704_v46  ;;  %v2723_v56 = vld [vmem:[#allocation2 + $0x28] sm:$0xff]  ;;  %v470_v60 = vmax.f32 %v2621_v0, 0.0  ;;  %v2736_v1 = vshrl.u32 %v2708_v49, 16  ;;  %v989_v6 = vrot.slane %v2629_v5, 1  ;;  %v1343_v7 = vor.u32 %v1342_v48, %v1339_v47  ;;  %2151 = vmatprep.subr.bf16.mxu1 %v2348_v62 }
 0x136   : > { %v1335_v53 = vsel %vm1318_vm7, %v1326_v44, %v1334_v45  ;;  %v2739_v2 = vshll.u32 %v2723_v56, 16  ;;  %v1351_v10 = vrot.slane %v2714_v51, 7  ;;  %v2747_v11 = vshrl.u32 %v2723_v56, 16  ;;  %v1096_v32 = vld [vmem:[#allocation2 + $0x8] sm:$0xe0]  ;;  %2152 = vmatpush3.bf16.msra.mxu1 %v2349_v14 }
 0x137   : > { %v2718_v54 = vpop.f32.mrb[12].mxu1  ;;  %1417 = vst.msk [vmem:[#allocation3 + $0x10] sm:$0xff] %vm478_vm1, %v1335_v53  ;;  %v486_v0 = vpack.c.bf16 %v471_v50, %v470_v60  ;;  %v1348_v8 = vrot.slane %v2736_v1, 6  ;;  %v994_v13 = vrot.slane %v2652_v20, 1  ;;  %v1259_v15 = vsel %vm1252_vm5, %v1256_v41, %v1258_v58  ;;  %2153 = vmatprep.subr.bf16.mxu1 %v2350_v27  ;;  %v2352_v53 = vld [vmem:[%s3326_s2 + $0x70] sm:$0xff]   ;;  %v2354_v27 = vld [vmem:[%s3326_s2 + $0x78] sm:$0xff]  }
 0x138   : > { %v2730_v61 = vpop.f32.mrb[13].mxu1  ;;  %918 = vrot.lane.b32.xlu1 %v853_v52, %s2437_s19  ;;  %1274 = vrot.lane.b32.xlu0 %v1257_v57, %s2437_s19  ;;  %v642_v18 = vsel %vm637_vm3, %v639_v3, %v641_v59  ;;  %v643_v21 = vrot.slane %v2638_v12, 2  ;;  %v1344_v24 = vsel %vm1318_vm7, %v1334_v45, %v1343_v7  ;;  %v1357_v28 = vrot.slane %v2747_v11, 6 }
 0x139   : > { %495 = vst.msk [vmem:[#allocation2 + $0x30] sm:$0xff] %vm478_vm1, %v486_v0  ;;  %v1360_v29 = vrot.slane %v2739_v2, 7  ;;  %v1002_v63 = vrot.slane %v2664_v25, 1  ;;  %1418 = vst.msk [vmem:[#allocation3 + $0x28] sm:$0xff] %vm478_vm1, %v1344_v24  ;;  %v990_v3 = vor.u32 %v989_v6, %v2626_v4  ;;  %v1010_v12 = vrot.slane %v2714_v51, 1  ;;  %v2353_v0 = vld [vmem:[%s3326_s2 + $0x30] sm:$0xff]  }
 0x13a   : > { %v645_v31 = vrot.slane %v2708_v49, 2  ;;  %v473_v33 = vmax.f32 %v2631_v9, 0.0  ;;  %v865_v39 = vrot.slane %v2689_v38, 7  ;;  %v472_v40 = vmax.f32 %v2646_v17, 0.0  ;;  %2154 = vmatpush3.bf16.msra.mxu1 %v2351_v43  ;;  %v2355_v43 = vld [vmem:[%s3326_s2 + $0x38] sm:$0xff]  }
 0x13b   : > { %v1006_v36 = vor.u32 %v2689_v38, %v1002_v63  ;;  %v1352_v41 = vor.u32 %v1351_v10, %v1348_v8  ;;  %v995_v44 = vsel %vm983_vm8, %v990_v3, %v994_v13  ;;  %v644_v45 = vsel %vm637_vm3, %v641_v59, %v643_v21  ;;  %2155 = vmatprep.subr.bf16.mxu1 %v2352_v53 }
 0x13c   : > { %1276 = vrot.lane.b32.xlu0 %v1259_v15, %s2437_s19  ;;  %659 = vrot.lane.b32.xlu1 %v642_v18, %s2435_s11  ;;  %v998_v9 = vor.u32 %v2649_v19, %v994_v13  ;;  %v1118_v47 = vrot.slane %v2649_v19, 5  ;;  %v1121_v17 = vrot.slane %v2652_v20, 6  ;;  %v1108_v48 = vshrl.u32 %v1096_v32, 16 }
 0x13d   : > { %v487_v50 = vpack.c.bf16 %v473_v33, %v472_v40  ;;  %v1353_v52 = vsel %vm1318_vm7, %v1343_v7, %v1352_v41  ;;  %v1111_v55 = vshll.u32 %v1096_v32, 16  ;;  %v1011_v59 = vsel %vm983_vm8, %v1006_v36, %v1010_v12 }
 0x13e   : > { %v1428_v34 = vld [vmem:[#allocation3 + $0x10] sm:$0xff]  ;;  %1419 = vst.msk [vmem:[#allocation3 + $0x40] sm:$0xff] %vm478_vm1, %v1353_v52  ;;  %v646_v60 = vsel %vm637_vm3, %v643_v21, %v645_v31  ;;  %v868_v62 = vor.u32 %v2664_v25, %v865_v39  ;;  %v1361_v6 = vor.u32 %v1360_v29, %v1357_v28  ;;  %v1127_v13 = vrot.slane %v2689_v38, 5  ;;  %2156 = vmatpush3.bf16.msra.mxu1 %v2353_v0 }
 0x13f   : > { %2260 = vmatmul.mubr.msk.bf16.vlgmr.msra.gmra.mrb[4].mxu0 %vm478_vm1, %v1428_v34  ;;  %496 = vst.msk [vmem:[#allocation2 + $0x38] sm:$0xff] %vm478_vm1, %v487_v50  ;;  %v1130_v14 = vrot.slane %v2664_v25, 6  ;;  %v1003_v15 = vsel %vm983_vm8, %v998_v9, %v1002_v63  ;;  %v857_v18 = vrot.slane %v2649_v19, 7  ;;  %v1122_v21 = vor.u32 %v1121_v17, %v1118_v47  ;;  %2157 = vmatprep.subr.bf16.mxu1 %v2354_v27 }
 0x140   : > { %1060 = vrot.lane.b32.xlu0 %v995_v44, %s2435_s11  ;;  %661 = vrot.lane.b32.xlu1 %v644_v45, %s2435_s11  ;;  %v2796_v57 = vld [vmem:[#allocation2 + $0x30] sm:$0xff]  ;;  %v1110_v24 = vrot.slane %v1108_v48, 5  ;;  %v1113_v3 = vrot.slane %v1111_v55, 6  ;;  %v1362_v32 = vsel %vm1318_vm7, %v1352_v41, %v1361_v6  ;;  %v1431_v33 = vld [vmem:[#allocation3 + $0x28] sm:$0xff]  ;;  %v1136_v34 = vrot.slane %v2736_v1, 5 }
 0x141   : > { %2263 = vmatprep.mubr.msk.bf16.mxu0 %vm2434_vm2, %v2433_v22  ;;  %v2811_v7 = vld [vmem:[#allocation2 + $0x30] sm:$0xff]  ;;  %v2814_v8 = vshrl.u32 %v2796_v57, 16  ;;  %v2817_v10 = vshll.u32 %v2796_v57, 16  ;;  %v1139_v63 = vrot.slane %v2714_v51, 6  ;;  %1420 = vst.msk [vmem:[#allocation3 + $0x58] sm:$0xff] %vm478_vm1, %v1362_v32  ;;  %v475_v36 = vmax.f32 %v2678_v35, 0.0 }
 0x142   : > { %969 = vst.msk [vmem:[#allocation3 + $0x80] sm:$0xff] %vm478_vm1, %v2811_v7  ;;  %v474_v40 = vmax.f32 %v2695_v42, 0.0  ;;  %v869_v41 = vsel %vm841_vm6, %v857_v18, %v868_v62  ;;  %v1131_v44 = vor.u32 %v1130_v14, %v1127_v13  ;;  %v725_v45 = vrot.slane %v2649_v19, 2  ;;  %2158 = vmatpush3.bf16.msra.mxu1 %v2355_v43  ;;  %v1317_v32 = vld [vmem:[#allocation2 + $0x50] sm:$0x7f] }
 0x143   : > { %v1366_v28 = vrot.slane %v2814_v8, 6  ;;  %v1369_v29 = vrot.slane %v2817_v10, 7  ;;  %v728_v9 = vrot.slane %v2652_v20, 3  ;;  %v1114_v47 = vor.u32 %v1113_v3, %v1110_v24 }
 0x144   : > { %1064 = vrot.lane.b32.xlu0 %v1011_v59, %s2435_s11  ;;  %663 = vrot.lane.b32.xlu1 %v646_v60, %s2435_s11  ;;  %v488_v35 = vpack.c.bf16 %v475_v36, %v474_v40  ;;  %v2859_v52 = vor.u32 %v1139_v63, %v1136_v34  ;;  %v1132_v55 = vsel %vm1106_vm9, %v1122_v21, %v1131_v44  ;;  %v476_v13 = vmax.f32 %v2730_v61, 0.0 }
 0x145   : > { %v1370_v42 = vor.u32 %v1369_v29, %v1366_v28  ;;  %v1123_v59 = vsel %vm1106_vm9, %v1114_v47, %v1122_v21  ;;  %v729_v60 = vor.u32 %v728_v9, %v725_v45  ;;  %v1434_v14 = vld [vmem:[#allocation3 + $0x40] sm:$0xff]  ;;  %v1260_v21 = vrot.slane %v2723_v56, 6  ;;  %v499_v47 = vld [vmem:[#allocation2] sm:$0xfe] }
 0x146   : > { %v2847_v17 = vld [vmem:[#allocation2 + $0x38] sm:$0xff]  ;;  %497 = vst.msk [vmem:[#allocation2 + $0x40] sm:$0xff] %vm478_vm1, %v488_v35  ;;  %v860_v24 = vor.u32 %v2652_v20, %v857_v18  ;;  %v734_v27 = vrot.slane %v2689_v38, 2  ;;  %v737_v29 = vrot.slane %v2664_v25, 3  ;;  %v1014_v20 = vor.u32 %v2736_v1, %v1010_v12 }
 0x147   : > { %2264 = vmatmul.mubr.msk.bf16.gmra.mrb[8].mxu0 %vm478_vm1, %v1431_v33  ;;  %v2851_v48 = vld [vmem:[#allocation2 + $0x38] sm:$0xff]  ;;  %v2854_v19 = vshrl.u32 %v2847_v17, 16  ;;  %v2857_v50 = vshll.u32 %v2847_v17, 16  ;;  %v1371_v53 = vsel %vm1318_vm7, %v1361_v6, %v1370_v42  ;;  %v477_v6 = vmax.f32 %v2718_v54, 0.0 }
 0x148   : > { %1062 = vrot.lane.b32.xlu0 %v1003_v15, %s2435_s11  ;;  %922 = vrot.lane.b32.xlu1 %v869_v41, %s2437_s19  ;;  %970 = vst.msk [vmem:[#allocation3 + $0x98] sm:$0xff] %vm478_vm1, %v2851_v48  ;;  %1421 = vst.msk [vmem:[#allocation3 + $0x70] sm:$0xff] %vm478_vm1, %v1371_v53  ;;  %v1141_v15 = vsel %vm1106_vm9, %v1131_v44, %v2859_v52  ;;  %v730_v28 = vsel %vm704_vm4, %v2666_v26, %v729_v60  ;;  %v1145_v18 = vrot.slane %v2747_v11, 5 }
 0x149   : > { %2267 = vmatprep.mubr.msk.bf16.mxu0 %vm2434_vm2, %v2433_v22  ;;  %v1375_v62 = vrot.slane %v2854_v19, 6  ;;  %v1378_v0 = vrot.slane %v2857_v50, 7  ;;  %v489_v54 = vpack.c.bf16 %v477_v6, %v476_v13  ;;  %v1148_v26 = vrot.slane %v2739_v2, 6 }
 0x14a   : > { %v743_v12 = vrot.slane %v2736_v1, 2  ;;  %v746_v36 = vrot.slane %v2714_v51, 3  ;;  %v1261_v40 = vsel %vm1252_vm5, %v1258_v58, %v1260_v21  ;;  %v861_v43 = vsel %vm841_vm6, %v849_v16, %v860_v24  ;;  %v1437_v58 = vld [vmem:[#allocation3 + $0x58] sm:$0xff] }
 0x14b   : > { %v1379_v3 = vor.u32 %v1378_v0, %v1375_v62  ;;  %498 = vst.msk [vmem:[#allocation2 + $0x48] sm:$0xff] %vm478_vm1, %v489_v54  ;;  %v1018_v41 = vrot.slane %v2739_v2, 1  ;;  %v738_v44 = vor.u32 %v737_v29, %v734_v27  ;;  %v1400_v35 = vshrl.u32 %v1317_v32, 16 }
 0x14c   : > { %1198 = vrot.lane.b32.xlu0 %v1132_v55, %s2436_s26  ;;  %1196 = vrot.lane.b32.xlu1 %v1123_v59, %s2436_s26  ;;  %v2922_v53 = vor.u32 %v1148_v26, %v1145_v18  ;;  %v2924_v55 = vor.u32 %v746_v36, %v743_v12  ;;  %v873_v16 = vrot.slane %v2736_v1, 7  ;;  %v511_v6 = vshrl.u32 %v499_v47, 16 }
 0x14d   : > { %v2890_v61 = vld [vmem:[#allocation2 + $0x40] sm:$0xff]  ;;  %v1380_v25 = vsel %vm1318_vm7, %v1370_v42, %v1379_v3  ;;  %v1403_v42 = vshll.u32 %v1317_v32, 16  ;;  %v1019_v62 = vsel %vm983_vm8, %v1014_v20, %v1018_v41  ;;  %v739_v0 = vsel %vm704_vm4, %v729_v60, %v738_v44 }
 0x14e   : > { %v2896_v33 = vld [vmem:[#allocation2 + $0x40] sm:$0xff]  ;;  %v2899_v34 = vshrl.u32 %v2890_v61, 16  ;;  %v2902_v63 = vshll.u32 %v2890_v61, 16  ;;  %1422 = vst.msk [vmem:[#allocation3 + $0x88] sm:$0xff] %vm478_vm1, %v1380_v25  ;;  %v514_v27 = vshll.u32 %v499_v47, 16  ;;  %v1262_v60 = vrot.slane %v2796_v57, 6 }
 0x14f   : > { %2268 = vmatmul.mubr.msk.bf16.gmra.mrb[12].mxu0 %vm478_vm1, %v1434_v14  ;;  %971 = vst.msk [vmem:[#allocation3 + $0xb0] sm:$0xff] %vm478_vm1, %v2896_v33  ;;  %v1405_v24 = vrot.slane %v1403_v42, 7  ;;  %v1154_v20 = vrot.slane %v2814_v8, 5  ;;  %v1157_v18 = vrot.slane %v2817_v10, 6  ;;  %v752_v32 = vrot.slane %v2747_v11, 2  ;;  %v1440_v36 = vld [vmem:[#allocation3 + $0x70] sm:$0xff] }
 0x150   : > { %1200 = vrot.lane.b32.xlu0 %v1141_v15, %s2436_s26  ;;  %796 = vrot.lane.b32.xlu1 %v730_v28, %s2436_s26  ;;  %v1384_v45 = vrot.slane %v2899_v34, 6  ;;  %v1387_v9 = vrot.slane %v2902_v63, 7  ;;  %v1402_v15 = vrot.slane %v1400_v35, 6  ;;  %v1150_v28 = vsel %vm1106_vm9, %v2859_v52, %v2922_v53 }
 0x151   : > { %2271 = vmatprep.mubr.msk.bf16.mxu0 %vm2434_vm2, %v2433_v22  ;;  %v876_v52 = vor.u32 %v2714_v51, %v873_v16  ;;  %v755_v12 = vrot.slane %v2739_v2, 3  ;;  %v647_v35 = vrot.slane %v2723_v56, 2 }
 0x152   : > { %v1388_v59 = vor.u32 %v1387_v9, %v1384_v45  ;;  %v2932_v13 = vld [vmem:[#allocation2 + $0x48] sm:$0xff]  ;;  %v1406_v51 = vor.u32 %v1405_v24, %v1402_v15  ;;  %v1263_v45 = vsel %vm1252_vm5, %v1260_v21, %v1262_v60  ;;  %v1026_v9 = vrot.slane %v2817_v10, 1 }
 0x153   : > { %v2942_v29 = vshrl.u32 %v2932_v13, 16  ;;  %v2945_v54 = vshll.u32 %v2932_v13, 16  ;;  %972 = vst.msk [vmem:[#allocation3 + $0xc8] sm:$0xff] %vm478_vm1, %v2932_v13  ;;  %v877_v47 = vsel %vm841_vm6, %v865_v39, %v876_v52  ;;  %v649_v39 = vrot.slane %v2796_v57, 2 }
 0x154   : > { %1278 = vrot.lane.b32.xlu0 %v1261_v40, %s2437_s19  ;;  %920 = vrot.lane.b32.xlu1 %v861_v43, %s2437_s19  ;;  %v1389_v14 = vsel %vm1318_vm7, %v1379_v3, %v1388_v59  ;;  %v748_v3 = vsel %vm704_vm4, %v738_v44, %v2924_v55  ;;  %v1022_v40 = vor.u32 %v2747_v11, %v1018_v41  ;;  %v513_v43 = vrot.slane %v511_v6, 1 }
 0x155   : > { %1423 = vst.msk [vmem:[#allocation3 + $0xa0] sm:$0xff] %vm478_vm1, %v1389_v14  ;;  %v1393_v26 = vrot.slane %v2942_v29, 6  ;;  %v1396_v25 = vrot.slane %v2945_v54, 7  ;;  %v516_v44 = vrot.slane %v514_v27, 2  ;;  %v1264_v41 = vrot.slane %v2847_v17, 6 }
 0x156   : > { %v1030_v21 = vor.u32 %v2814_v8, %v1026_v9  ;;  %v1034_v6 = vrot.slane %v2857_v50, 1  ;;  %v1027_v15 = vsel %vm983_vm8, %v1022_v40, %v1026_v9  ;;  %v764_v52 = vrot.slane %v2817_v10, 3 }
 0x157   : > { %2272 = vmatmul.mubr.msk.bf16.gmra.mrb[16].mxu0 %vm478_vm1, %v1437_v58  ;;  %v1397_v42 = vor.u32 %v1396_v25, %v1393_v26  ;;  %v2972_v58 = vor.u32 %v1157_v18, %v1154_v20  ;;  %v517_v14 = vor.u32 %v516_v44, %v513_v43  ;;  %v521_v20 = vrot.slane %v2626_v4, 1 }
 0x158   : > { %1066 = vrot.lane.b32.xlu0 %v1019_v62, %s2435_s11  ;;  %798 = vrot.lane.b32.xlu1 %v739_v0, %s2436_s26  ;;  %v881_v62 = vrot.slane %v2747_v11, 7  ;;  %v2977_v0 = vor.u32 %v755_v12, %v752_v32  ;;  %v3009_v49 = vsel %vm983_vm8, %v1030_v21, %v1034_v6  ;;  %v524_v18 = vrot.slane %v2629_v5, 2 }
 0x159   : > { %2275 = vmatprep.mubr.msk.bf16.mxu0 %vm2434_vm2, %v2433_v22  ;;  %v1398_v56 = vsel %vm1318_vm7, %v1388_v59, %v1397_v42  ;;  %v1407_v38 = vsel %vm1318_vm7, %v1397_v42, %v1406_v51  ;;  %v648_v59 = vsel %vm637_vm3, %v645_v31, %v647_v35  ;;  %v1159_v27 = vsel %vm1106_vm9, %v2922_v53, %v2972_v58 }
 0x15a   : > { %1424 = vst.msk [vmem:[#allocation3 + $0xb8] sm:$0xff] %vm478_vm1, %v1398_v56  ;;  %1425 = vst.msk [vmem:[#allocation3 + $0xd0] sm:$0xff] %vm478_vm1, %v1407_v38  ;;  %v884_v24 = vor.u32 %v2739_v2, %v881_v62  ;;  %v1443_v2 = vld [vmem:[#allocation3 + $0x88] sm:$0xff]  ;;  %v1163_v31 = vrot.slane %v2854_v19, 5  ;;  %v1166_v53 = vrot.slane %v2857_v50, 6  ;;  %v528_v26 = vshrl.u32 %v2658_v23, 16 }
 0x15b   : > { %v889_v32 = vrot.slane %v2814_v8, 7  ;;  %v531_v12 = vshll.u32 %v2658_v23, 16  ;;  %v525_v40 = vor.u32 %v524_v18, %v521_v20  ;;  %v540_v4 = vshll.u32 %v2669_v30, 16 }
 0x15c   : > { %1202 = vrot.lane.b32.xlu0 %v1150_v28, %s2436_s26  ;;  %800 = vrot.lane.b32.xlu1 %v748_v3, %s2436_s26  ;;  %v757_v28 = vsel %vm704_vm4, %v2924_v55, %v2977_v0  ;;  %v1265_v3 = vsel %vm1252_vm5, %v1262_v60, %v1264_v41  ;;  %v761_v55 = vrot.slane %v2814_v8, 2  ;;  %v650_v60 = vsel %vm637_vm3, %v647_v35, %v649_v39 }
 0x15d   : > { %v885_v25 = vsel %vm841_vm6, %v873_v16, %v884_v24  ;;  %v530_v51 = vrot.slane %v528_v26, 1  ;;  %v546_v5 = vshrl.u32 %v2686_v37, 16  ;;  %v3034_v1 = vor.u32 %v1166_v53, %v1163_v31 }
 0x15e   : > { %v3036_v16 = vor.u32 %v764_v52, %v761_v55  ;;  %v533_v43 = vrot.slane %v531_v12, 2  ;;  %v526_v44 = vsel %vm509_vm10, %v517_v14, %v525_v40  ;;  %v555_v42 = vshrl.u32 %v2704_v46, 16 }
 0x15f   : > { %2276 = vmatmul.mubr.msk.bf16.gmra.mrb[20].mxu0 %vm478_vm1, %v1440_v36  ;;  %v537_v36 = vshrl.u32 %v2669_v30, 16  ;;  %v548_v9 = vrot.slane %v546_v5, 1  ;;  %v549_v30 = vshll.u32 %v2686_v37, 16  ;;  %608 = vst.msk [vmem:[#allocation3] sm:$0xff] %vm478_vm1, %v526_v44  ;;  %v564_v21 = vshrl.u32 %v2811_v7, 16  ;;  %v1446_v37 = vld [vmem:[#allocation3 + $0xa0] sm:$0xff] }
 0x160   : > { %1280 = vrot.lane.b32.xlu0 %v1263_v45, %s2437_s19  ;;  %924 = vrot.lane.b32.xlu1 %v877_v47, %s2437_s19  ;;  %v542_v45 = vrot.slane %v540_v4, 2  ;;  %v534_v35 = vor.u32 %v533_v43, %v530_v51  ;;  %v558_v47 = vshll.u32 %v2704_v46, 16  ;;  %v557_v24 = vrot.slane %v555_v42, 1 }
 0x161   : > { %2279 = vmatprep.mubr.msk.bf16.mxu0 %vm2434_vm2, %v2433_v22  ;;  %v539_v23 = vrot.slane %v537_v36, 1  ;;  %v551_v38 = vrot.slane %v549_v30, 2  ;;  %v582_v52 = vshrl.u32 %v2896_v33, 16  ;;  %v585_v20 = vshll.u32 %v2896_v33, 16  ;;  %v1449_v30 = vld [vmem:[#allocation3 + $0xb8] sm:$0xff] }
 0x162   : > { %v535_v14 = vsel %vm509_vm10, %v525_v40, %v534_v35  ;;  %v766_v44 = vsel %vm704_vm4, %v2977_v0, %v3036_v16 }
 0x163   : > { %v543_v56 = vor.u32 %v542_v45, %v539_v23  ;;  %609 = vst.msk [vmem:[#allocation3 + $0x18] sm:$0xff] %vm478_vm1, %v535_v14  ;;  %v552_v31 = vor.u32 %v551_v38, %v548_v9  ;;  %v584_v40 = vrot.slane %v582_v52, 1  ;;  %v587_v51 = vrot.slane %v585_v20, 2  ;;  %v1452_v14 = vld [vmem:[#allocation3 + $0xd0] sm:$0xff] }
 0x164   : > { %1068 = vrot.lane.b32.xlu0 %v1027_v15, %s2435_s11  ;;  %665 = vrot.lane.b32.xlu1 %v648_v59, %s2435_s11  ;;  %v567_v15 = vshll.u32 %v2811_v7, 16  ;;  %v573_v59 = vshrl.u32 %v2851_v48, 16  ;;  %v1168_v23 = vsel %vm1106_vm9, %v2972_v58, %v3034_v1  ;;  %v892_v45 = vor.u32 %v2817_v10, %v889_v32 }
 0x165   : > { %v544_v46 = vsel %vm509_vm10, %v534_v35, %v543_v56  ;;  %v553_v18 = vsel %vm509_vm10, %v543_v56, %v552_v31  ;;  %v588_v43 = vor.u32 %v587_v51, %v584_v40  ;;  %v1038_v58 = vor.u32 %v2854_v19, %v1034_v6 }
 0x166   : > { %v569_v53 = vrot.slane %v567_v15, 2  ;;  %v575_v7 = vrot.slane %v573_v59, 1  ;;  %610 = vst.msk [vmem:[#allocation3 + $0x30] sm:$0xff] %vm478_vm1, %v544_v46  ;;  %611 = vst.msk [vmem:[#allocation3 + $0x48] sm:$0xff] %vm478_vm1, %v553_v18  ;;  %v1172_v56 = vrot.slane %v2899_v34, 5  ;;  %v893_v6 = vsel %vm841_vm6, %v881_v62, %v892_v45 }
 0x167   : > { %2280 = vmatmul.mubr.msk.bf16.gmra.mrb[24].mxu0 %vm478_vm1, %v1443_v2  ;;  %v508_v2 = vld [vmem:[#allocation2 + $0x48] sm:$0x3]  ;;  %v1175_v38 = vrot.slane %v2902_v63, 6  ;;  %v770_v15 = vrot.slane %v2854_v19, 2  ;;  %v773_v59 = vrot.slane %v2857_v50, 3  ;;  %v779_v46 = vrot.slane %v2899_v34, 2 }
 0x168   : > { %1204 = vrot.lane.b32.xlu0 %v1159_v27, %s2436_s26  ;;  %802 = vrot.lane.b32.xlu1 %v757_v28, %s2436_s26  ;;  %v560_v27 = vrot.slane %v558_v47, 2  ;;  %v566_v28 = vrot.slane %v564_v21, 1  ;;  %v594_v12 = vshll.u32 %v508_v2, 16  ;;  %v1042_v47 = vrot.slane %v2902_v63, 1  ;;  %v703_v18 = vld [vmem:[#allocation2 + $0x48] sm:$0x7] }
 0x169   : > { %2283 = vmatprep.mubr.msk.bf16.mxu0 %vm2434_vm2, %v2433_v22  ;;  %v651_v21 = vrot.slane %v2847_v17, 2  ;;  %v774_v62 = vor.u32 %v773_v59, %v770_v15  ;;  %v905_v20 = vrot.slane %v2899_v34, 7 }
 0x16a   : > { %v561_v55 = vor.u32 %v560_v27, %v557_v24  ;;  %v570_v26 = vor.u32 %v569_v53, %v566_v28  ;;  %v596_v5 = vrot.slane %v594_v12, 2  ;;  %v1043_v17 = vsel %vm983_vm8, %v1038_v58, %v1042_v47  ;;  %v1105_v53 = vld [vmem:[#allocation2 + $0x50] sm:$0x3f] }
 0x16b   : > { %v652_v11 = vsel %vm637_vm3, %v649_v39, %v651_v21  ;;  %v1268_v24 = vrot.slane %v2932_v13, 6  ;;  %v775_v27 = vsel %vm704_vm4, %v3036_v16, %v774_v62  ;;  %v1050_v13 = vrot.slane %v2945_v54, 1 }
 0x16c   : > { %1282 = vrot.lane.b32.xlu0 %v1265_v3, %s2437_s19  ;;  %926 = vrot.lane.b32.xlu1 %v885_v25, %s2437_s19  ;;  %v576_v3 = vshll.u32 %v2851_v48, 16  ;;  %v591_v25 = vshrl.u32 %v508_v2, 16  ;;  %v562_v48 = vsel %vm509_vm10, %v552_v31, %v561_v55  ;;  %v571_v33 = vsel %vm509_vm10, %v561_v55, %v570_v26  ;;  %v982_v2 = vld [vmem:[#allocation2 + $0x50] sm:$0x1] }
 0x16d   : > { %612 = vst.msk [vmem:[#allocation3 + $0x60] sm:$0xff] %vm478_vm1, %v562_v48  ;;  %613 = vst.msk [vmem:[#allocation3 + $0x78] sm:$0xff] %vm478_vm1, %v571_v33  ;;  %v653_v28 = vrot.slane %v2890_v61, 2  ;;  %v1184_v16 = vrot.slane %v2945_v54, 6  ;;  %v782_v31 = vrot.slane %v2902_v63, 3  ;;  %v1188_v55 = vshrl.u32 %v1105_v53, 16 }
 0x16e   : > { %v578_v36 = vrot.slane %v576_v3, 2  ;;  %v593_v4 = vrot.slane %v591_v25, 1  ;;  %v1191_v3 = vshll.u32 %v1105_v53, 16  ;;  %v1054_v25 = vor.u32 %v2942_v29, %v1050_v13 }
 0x16f   : > { %2284 = vmatmul.mubr.msk.bf16.gmra.mrb[28].mxu0 %vm478_vm1, %v1446_v37  ;;  %v897_v37 = vrot.slane %v2854_v19, 7  ;;  %v1046_v19 = vor.u32 %v2899_v34, %v1042_v47  ;;  %v654_v8 = vsel %vm637_vm3, %v651_v21, %v653_v28  ;;  %v1190_v12 = vrot.slane %v1188_v55, 5 }
 0x170   : > { %1070 = vrot.lane.b32.xlu0 %v3009_v49, %s2435_s11  ;;  %667 = vrot.lane.b32.xlu1 %v650_v60, %s2435_s11  ;;  %v1266_v49 = vrot.slane %v2890_v61, 6  ;;  %v579_v60 = vor.u32 %v578_v36, %v575_v7  ;;  %v597_v9 = vor.u32 %v596_v5, %v593_v4  ;;  %v1056_v7 = vshll.u32 %v982_v2, 16  ;;  %v626_v4 = vld [vmem:[#allocation2 + $0x48] sm:$0x3] }
 0x171   : > { %2287 = vmatprep.mubr.msk.bf16.mxu0 %vm2434_vm2, %v2433_v22  ;;  %v900_v57 = vor.u32 %v2857_v50, %v897_v37  ;;  %v1051_v61 = vsel %vm983_vm8, %v1046_v19, %v1050_v13  ;;  %v1193_v48 = vrot.slane %v1191_v3, 6  ;;  %v786_v36 = vshrl.u32 %v703_v18, 16 }
 0x172   : > { %v580_v35 = vsel %vm509_vm10, %v570_v26, %v579_v60  ;;  %v589_v42 = vsel %vm509_vm10, %v579_v60, %v588_v43  ;;  %v598_v10 = vsel %vm509_vm10, %v588_v43, %v597_v9  ;;  %v1267_v0 = vsel %vm1252_vm5, %v1264_v41, %v1266_v49 }
 0x173   : > { %614 = vst.msk [vmem:[#allocation3 + $0x90] sm:$0xff] %vm478_vm1, %v580_v35  ;;  %615 = vst.msk [vmem:[#allocation3 + $0xa8] sm:$0xff] %vm478_vm1, %v589_v42  ;;  %v1176_v41 = vor.u32 %v1175_v38, %v1172_v56  ;;  %v1269_v39 = vsel %vm1252_vm5, %v1266_v49, %v1268_v24  ;;  %v901_v50 = vsel %vm841_vm6, %v889_v32, %v900_v57  ;;  %v1058_v26 = vrot.slane %v1056_v7, 1 }
 0x174   : > { %1206 = vrot.lane.b32.xlu0 %v1168_v23, %s2436_s26  ;;  %804 = vrot.lane.b32.xlu1 %v766_v44, %s2436_s26  ;;  %616 = vst.msk [vmem:[#allocation3 + $0xc0] sm:$0xff] %vm478_vm1, %v598_v10  ;;  %v783_v32 = vor.u32 %v782_v31, %v779_v46  ;;  %v908_v33 = vor.u32 %v2902_v63, %v905_v20  ;;  %v789_v5 = vshll.u32 %v703_v18, 16  ;;  %v655_v49 = vrot.slane %v626_v4, 2  ;;  %v1241_v23 = vld [vmem:[#allocation2 + $0x50] sm:$0x3f] }
 0x175   : > { %v1194_v34 = vor.u32 %v1193_v48, %v1190_v12  ;;  %v1059_v60 = vsel %vm983_vm8, %v1054_v25, %v1058_v26  ;;  %v788_v44 = vrot.slane %v786_v36, 2  ;;  %v1270_v63 = vrot.slane %v1241_v23, 6 }
 0x176   : > { %v784_v51 = vsel %vm704_vm4, %v774_v62, %v783_v32  ;;  %v909_v43 = vsel %vm841_vm6, %v897_v37, %v908_v33  ;;  %v791_v45 = vrot.slane %v789_v5, 3  ;;  %v913_v42 = vrot.slane %v2942_v29, 7 }
 0x177   : > { %2288 = vmatmul.mubr.msk.bf16.gmra.mrb[32].mxu0 %vm478_vm1, %v1449_v30  ;;  %v656_v30 = vsel %vm637_vm3, %v653_v28, %v655_v49  ;;  %v1271_v58 = vsel %vm1252_vm5, %v1268_v24, %v1270_v63 }
 0x178   : > { %1284 = vrot.lane.b32.xlu0 %v1267_v0, %s2437_s19  ;;  %928 = vrot.lane.b32.xlu1 %v893_v6, %s2437_s19  ;;  %v792_v35 = vor.u32 %v791_v45, %v788_v44  ;;  %v916_v0 = vor.u32 %v2945_v54, %v913_v42 }
 0x179   : > { %2291 = vmatprep.mubr.msk.bf16.mxu0 %vm2434_vm2, %v2433_v22  ;;  %v1177_v22 = vsel %vm1106_vm9, %v3034_v1, %v1176_v41  ;;  %v1181_v1 = vrot.slane %v2942_v29, 5 }
 0x17a   : > { %v793_v10 = vsel %vm704_vm4, %v783_v32, %v792_v35  ;;  %v917_v47 = vsel %vm841_vm6, %v905_v20, %v916_v0 }
 0x17b   : > { %v1185_v52 = vor.u32 %v1184_v16, %v1181_v1 }
 0x17c   : > { %1072 = vrot.lane.b32.xlu0 %v1043_v17, %s2435_s11  ;;  %669 = vrot.lane.b32.xlu1 %v652_v11, %s2435_s11 }
 0x17d   : > { %v1186_v40 = vsel %vm1106_vm9, %v1176_v41, %v1185_v52  ;;  %v1195_v9 = vsel %vm1106_vm9, %v1185_v52, %v1194_v34 }
 0x17f   : > { %2292 = vmatmul.mubr.msk.bf16.gmra.mrb[36].mxu0 %vm478_vm1, %v1452_v14 }
 0x180   : > { %1208 = vrot.lane.b32.xlu0 %v1177_v22, %s2436_s26  ;;  %806 = vrot.lane.b32.xlu1 %v775_v27, %s2436_s26 }
 0x184   : > { %1286 = vrot.lane.b32.xlu0 %v1269_v39, %s2437_s19  ;;  %930 = vrot.lane.b32.xlu1 %v901_v50, %s2437_s19 }
 0x188   : > { %1074 = vrot.lane.b32.xlu0 %v1051_v61, %s2435_s11  ;;  %671 = vrot.lane.b32.xlu1 %v654_v8, %s2435_s11 }
 0x18c   : > { %1210 = vrot.lane.b32.xlu0 %v1186_v40, %s2436_s26  ;;  %808 = vrot.lane.b32.xlu1 %v784_v51, %s2436_s26 }
 0x190   : > { %1076 = vrot.lane.b32.xlu0 %v1059_v60, %s2435_s11  ;;  %932 = vrot.lane.b32.xlu1 %v909_v43, %s2437_s19 }
 0x194   : > { %1212 = vrot.lane.b32.xlu0 %v1195_v9, %s2436_s26  ;;  %673 = vrot.lane.b32.xlu1 %v656_v30, %s2435_s11  ;;  %s2038_s11 = sshll.u32 %s3338_s23, 2 }
 0x195   : > { %s3253_s25 = scalar_lea.vmem %s3328_s4, %s2038_s11 }
 0x198   : > { %1288 = vrot.lane.b32.xlu0 %v1271_v58, %s2437_s19  ;;  %810 = vrot.lane.b32.xlu1 %v793_v10, %s2436_s26 }
 0x19c   : > { %934 = vrot.lane.b32.xlu1 %v917_v47, %s2437_s19 }
 0x1a2   : > { %v658_v29 = vpop.permute.xlu0 %657 }
 0x1a3   : > { %685 = vst.msk [vmem:[#allocation3] sm:$0xff] %vm684_vm11, %v658_v29 }
 0x1a6   : > { %v795_v21 = vpop.permute.xlu1 %794  ;;  %v1273_v56 = vpop.permute.xlu0 %1272 }
 0x1a7   : > { %822 = vst.msk [vmem:[#allocation3] sm:$0xff] %vm821_vm12, %v795_v21 }
 0x1aa   : > { %v919_v6 = vpop.permute.xlu1 %918  ;;  %v1275_v54 = vpop.permute.xlu0 %1274 }
 0x1ab   : > { %946 = vst.msk [vmem:[#allocation3] sm:$0xff] %vm945_vm13, %v919_v6 }
 0x1ae   : > { %v1277_v38 = vpop.permute.xlu0 %1276  ;;  %v660_v15 = vpop.permute.xlu1 %659 }
 0x1af   : > { %686 = vst.msk [vmem:[#allocation3 + $0x18] sm:$0xff] %vm684_vm11, %v660_v15 }
 0x1b2   : > { %v1061_v59 = vpop.permute.xlu0 %1060  ;;  %v662_v17 = vpop.permute.xlu1 %661  ;;  %v1426_v13 = vld [vmem:[#allocation3] sm:$0xff] }
 0x1b3   : > { %1087 = vst.msk [vmem:[#allocation3 + $0x8] sm:$0xff] %vm684_vm11, %v1061_v59  ;;  %687 = vst.msk [vmem:[#allocation3 + $0x30] sm:$0xff] %vm684_vm11, %v662_v17 }
 0x1b6   : > { %v1065_v11 = vpop.permute.xlu0 %1064  ;;  %v664_v41 = vpop.permute.xlu1 %663 }
 0x1b7   : > { %1089 = vst.msk [vmem:[#allocation3 + $0x38] sm:$0xff] %vm684_vm11, %v1065_v11  ;;  %688 = vst.msk [vmem:[#allocation3 + $0x48] sm:$0xff] %vm684_vm11, %v664_v41 }
 0x1ba   : > { %v1063_v62 = vpop.permute.xlu0 %1062  ;;  %v923_v37 = vpop.permute.xlu1 %922 }
 0x1bb   : > { %1088 = vst.msk [vmem:[#allocation3 + $0x20] sm:$0xff] %vm684_vm11, %v1063_v62 }
 0x1be   : > { %v1199_v14 = vpop.permute.xlu0 %1198  ;;  %v1197_v24 = vpop.permute.xlu1 %1196 }
 0x1bf   : > { %1224 = vst.msk [vmem:[#allocation3 + $0x20] sm:$0xff] %vm821_vm12, %v1199_v14  ;;  %1223 = vst.msk [vmem:[#allocation3 + $0x8] sm:$0xff] %vm821_vm12, %v1197_v24 }
 0x1c0   : > { %1300 = vst.msk [vmem:[#allocation3 + $0x20] sm:$0xff] %vm945_vm13, %v1275_v54  ;;  %1299 = vst.msk [vmem:[#allocation3 + $0x8] sm:$0xff] %vm945_vm13, %v1273_v56 }
 0x1c2   : > { %v1201_v22 = vpop.permute.xlu0 %1200  ;;  %v797_v27 = vpop.permute.xlu1 %796 }
 0x1c3   : > { %1225 = vst.msk [vmem:[#allocation3 + $0x38] sm:$0xff] %vm821_vm12, %v1201_v22  ;;  %823 = vst.msk [vmem:[#allocation3 + $0x18] sm:$0xff] %vm821_vm12, %v797_v27 }
 0x1c4   : > { %1301 = vst.msk [vmem:[#allocation3 + $0x38] sm:$0xff] %vm945_vm13, %v1277_v38 }
 0x1c6   : > { %v1279_v57 = vpop.permute.xlu0 %1278  ;;  %v921_v19 = vpop.permute.xlu1 %920 }
 0x1c7   : > { %947 = vst.msk [vmem:[#allocation3 + $0x18] sm:$0xff] %vm945_vm13, %v921_v19  ;;  %v1427_v39 = vld [vmem:[#allocation3 + $0x8] sm:$0xff]  ;;  %v1430_v28 = vld [vmem:[#allocation3 + $0x20] sm:$0xff] }
 0x1c8   : > { %1663 = vmatprep.mubr.bf16.mxu1 %v1427_v39 }
 0x1c9   : > { %1664 = vmatmul.mubr.bf16.vlgmr.msra.gmra.mrb[16].mxu1 %v1426_v13 }
 0x1ca   : > { %v1067_v1 = vpop.permute.xlu0 %1066  ;;  %1671 = vmatprep.mubr.bf16.mxu1 %v1430_v28  ;;  %v799_v2 = vpop.permute.xlu1 %798 }
 0x1cb   : > { %1090 = vst.msk [vmem:[#allocation3 + $0x50] sm:$0xff] %vm684_vm11, %v1067_v1  ;;  %v1433_v31 = vld [vmem:[#allocation3 + $0x38] sm:$0xff] }
 0x1cc   : > { %824 = vst.msk [vmem:[#allocation3 + $0x30] sm:$0xff] %vm821_vm12, %v799_v2 }
 0x1cd   : > { %948 = vst.msk [vmem:[#allocation3 + $0x30] sm:$0xff] %vm945_vm13, %v923_v37 }
 0x1ce   : > { %v1203_v50 = vpop.permute.xlu0 %1202  ;;  %v801_v16 = vpop.permute.xlu1 %800  ;;  %v1429_v46 = vld [vmem:[#allocation3 + $0x18] sm:$0xff] }
 0x1cf   : > { %1226 = vst.msk [vmem:[#allocation3 + $0x50] sm:$0xff] %vm821_vm12, %v1203_v50  ;;  %825 = vst.msk [vmem:[#allocation3 + $0x48] sm:$0xff] %vm821_vm12, %v801_v16 }
 0x1d0   : > { %1302 = vst.msk [vmem:[#allocation3 + $0x50] sm:$0xff] %vm945_vm13, %v1279_v57 }
 0x1d1   : > { %1672 = vmatmul.mubr.bf16.gmra.mrb[20].mxu1 %v1429_v46 }
 0x1d2   : > { %v1281_v53 = vpop.permute.xlu0 %1280  ;;  %v925_v7 = vpop.permute.xlu1 %924  ;;  %1679 = vmatprep.mubr.bf16.mxu1 %v1433_v31 }
 0x1d3   : > { %949 = vst.msk [vmem:[#allocation3 + $0x48] sm:$0xff] %vm945_vm13, %v925_v7 }
 0x1d4   : > { %v1432_v3 = vld [vmem:[#allocation3 + $0x30] sm:$0xff] }
 0x1d6   : > { %v1069_v61 = vpop.permute.xlu0 %1068  ;;  %v666_v55 = vpop.permute.xlu1 %665 }
 0x1d7   : > { %1091 = vst.msk [vmem:[#allocation3 + $0x68] sm:$0xff] %vm684_vm11, %v1069_v61  ;;  %689 = vst.msk [vmem:[#allocation3 + $0x60] sm:$0xff] %vm684_vm11, %v666_v55  ;;  %v1436_v8 = vld [vmem:[#allocation3 + $0x50] sm:$0xff] }
 0x1d9   : > { %1680 = vmatmul.mubr.bf16.gmra.mrb[24].mxu1 %v1432_v3 }
 0x1da   : > { %v1205_v52 = vpop.permute.xlu0 %1204  ;;  %v803_v32 = vpop.permute.xlu1 %802  ;;  %1687 = vmatprep.mubr.bf16.mxu1 %v1436_v8  ;;  %v1435_v26 = vld [vmem:[#allocation3 + $0x48] sm:$0xff] }
 0x1db   : > { %1227 = vst.msk [vmem:[#allocation3 + $0x68] sm:$0xff] %vm821_vm12, %v1205_v52  ;;  %826 = vst.msk [vmem:[#allocation3 + $0x60] sm:$0xff] %vm821_vm12, %v803_v32 }
 0x1dc   : > { %1303 = vst.msk [vmem:[#allocation3 + $0x68] sm:$0xff] %vm945_vm13, %v1281_v53 }
 0x1de   : > { %v1283_v20 = vpop.permute.xlu0 %1282  ;;  %v927_v18 = vpop.permute.xlu1 %926 }
 0x1df   : > { %950 = vst.msk [vmem:[#allocation3 + $0x60] sm:$0xff] %vm945_vm13, %v927_v18 }
 0x1e1   : > { %1688 = vmatmul.mubr.bf16.gmra.mrb[28].mxu1 %v1435_v26 }
 0x1e2   : > { %v1071_v25 = vpop.permute.xlu0 %1070  ;;  %v668_v12 = vpop.permute.xlu1 %667 }
 0x1e3   : > { %1092 = vst.msk [vmem:[#allocation3 + $0x80] sm:$0xff] %vm684_vm11, %v1071_v25  ;;  %690 = vst.msk [vmem:[#allocation3 + $0x78] sm:$0xff] %vm684_vm11, %v668_v12  ;;  %v1439_v48 = vld [vmem:[#allocation3 + $0x68] sm:$0xff] }
 0x1e4   : > { %1695 = vmatprep.mubr.bf16.mxu1 %v1439_v48 }
 0x1e6   : > { %v1207_v36 = vpop.permute.xlu0 %1206  ;;  %v805_v40 = vpop.permute.xlu1 %804  ;;  %v1438_v51 = vld [vmem:[#allocation3 + $0x60] sm:$0xff] }
 0x1e7   : > { %1228 = vst.msk [vmem:[#allocation3 + $0x80] sm:$0xff] %vm821_vm12, %v1207_v36  ;;  %827 = vst.msk [vmem:[#allocation3 + $0x78] sm:$0xff] %vm821_vm12, %v805_v40 }
 0x1e8   : > { %1304 = vst.msk [vmem:[#allocation3 + $0x80] sm:$0xff] %vm945_vm13, %v1283_v20 }
 0x1e9   : > { %1696 = vmatmul.mubr.bf16.gmra.mrb[32].mxu1 %v1438_v51 }
 0x1ea   : > { %v1285_v33 = vpop.permute.xlu0 %1284  ;;  %v929_v4 = vpop.permute.xlu1 %928 }
 0x1eb   : > { %951 = vst.msk [vmem:[#allocation3 + $0x78] sm:$0xff] %vm945_vm13, %v929_v4 }
 0x1ee   : > { %v1073_v5 = vpop.permute.xlu0 %1072  ;;  %v670_v34 = vpop.permute.xlu1 %669 }
 0x1ef   : > { %1093 = vst.msk [vmem:[#allocation3 + $0x98] sm:$0xff] %vm684_vm11, %v1073_v5  ;;  %691 = vst.msk [vmem:[#allocation3 + $0x90] sm:$0xff] %vm684_vm11, %v670_v34  ;;  %v1442_v49 = vld [vmem:[#allocation3 + $0x80] sm:$0xff] }
 0x1f0   : > { %1703 = vmatprep.mubr.bf16.mxu1 %v1442_v49 }
 0x1f2   : > { %v1209_v60 = vpop.permute.xlu0 %1208  ;;  %v807_v43 = vpop.permute.xlu1 %806  ;;  %v1441_v23 = vld [vmem:[#allocation3 + $0x78] sm:$0xff] }
 0x1f3   : > { %1229 = vst.msk [vmem:[#allocation3 + $0x98] sm:$0xff] %vm821_vm12, %v1209_v60  ;;  %828 = vst.msk [vmem:[#allocation3 + $0x90] sm:$0xff] %vm821_vm12, %v807_v43  ;;  %1704 = vmatmul.mubr.bf16.gmra.mrb[36].mxu1 %v1441_v23 }
 0x1f4   : > { %1305 = vst.msk [vmem:[#allocation3 + $0x98] sm:$0xff] %vm945_vm13, %v1285_v33  ;;  %v3245_v33 = vld [vmem:[#allocation6] ss:$0 sm:$0xff] }
 0x1f6   : > { %v1287_v44 = vpop.permute.xlu0 %1286  ;;  %v931_v45 = vpop.permute.xlu1 %930 }
 0x1f7   : > { %952 = vst.msk [vmem:[#allocation3 + $0x90] sm:$0xff] %vm945_vm13, %v931_v45 }
 0x1fa   : > { %v1075_v63 = vpop.permute.xlu0 %1074  ;;  %v672_v9 = vpop.permute.xlu1 %671 }
 0x1fb   : > { %1094 = vst.msk [vmem:[#allocation3 + $0xb0] sm:$0xff] %vm684_vm11, %v1075_v63  ;;  %692 = vst.msk [vmem:[#allocation3 + $0xa8] sm:$0xff] %vm684_vm11, %v672_v9  ;;  %v1445_v30 = vld [vmem:[#allocation3 + $0x98] sm:$0xff] }
 0x1fc   : > { %1711 = vmatprep.mubr.bf16.mxu1 %v1445_v30 }
 0x1fe   : > { %v1211_v35 = vpop.permute.xlu0 %1210  ;;  %v809_v42 = vpop.permute.xlu1 %808  ;;  %v1444_v58 = vld [vmem:[#allocation3 + $0x90] sm:$0xff] }
 0x1ff   : > { %1230 = vst.msk [vmem:[#allocation3 + $0xb0] sm:$0xff] %vm821_vm12, %v1211_v35  ;;  %829 = vst.msk [vmem:[#allocation3 + $0xa8] sm:$0xff] %vm821_vm12, %v809_v42  ;;  %1712 = vmatmul.mubr.bf16.gmra.mrb[40].mxu1 %v1444_v58 }
 0x200   : > { %1306 = vst.msk [vmem:[#allocation3 + $0xb0] sm:$0xff] %vm945_vm13, %v1287_v44 }
 0x202   : > { %v1077_v10 = vpop.permute.xlu0 %1076  ;;  %v933_v0 = vpop.permute.xlu1 %932 }
 0x203   : > { %1095 = vst.msk [vmem:[#allocation3 + $0xc8] sm:$0xff] %vm684_vm11, %v1077_v10 }
 0x204   : > { %953 = vst.msk [vmem:[#allocation3 + $0xa8] sm:$0xff] %vm945_vm13, %v933_v0 }
 0x206   : > { %v1213_v47 = vpop.permute.xlu0 %1212  ;;  %v674_v29 = vpop.permute.xlu1 %673 }
 0x207   : > { %1231 = vst.msk [vmem:[#allocation3 + $0xc8] sm:$0xff] %vm821_vm12, %v1213_v47  ;;  %v1448_v21 = vld [vmem:[#allocation3 + $0xb0] sm:$0xff] }
 0x208   : > { %693 = vst.msk [vmem:[#allocation3 + $0xc0] sm:$0xff] %vm684_vm11, %v674_v29  ;;  %1719 = vmatprep.mubr.bf16.mxu1 %v1448_v21 }
 0x20a   : > { %v1289_v56 = vpop.permute.xlu0 %1288  ;;  %v811_v6 = vpop.permute.xlu1 %810 }
 0x20b   : > { %v1447_v54 = vld [vmem:[#allocation3 + $0xa8] sm:$0xff]  ;;  %1307 = vst.msk [vmem:[#allocation3 + $0xc8] sm:$0xff] %vm945_vm13, %v1289_v56 }
 0x20c   : > { %830 = vst.msk [vmem:[#allocation3 + $0xc0] sm:$0xff] %vm821_vm12, %v811_v6  ;;  %1720 = vmatmul.mubr.bf16.gmra.mrb[44].mxu1 %v1447_v54 }
 0x20e   : > { %v935_v38 = vpop.permute.xlu1 %934 }
 0x20f   : > { %954 = vst.msk [vmem:[#allocation3 + $0xc0] sm:$0xff] %vm945_vm13, %v935_v38 }
 0x212   : > { %v1451_v15 = vld [vmem:[#allocation3 + $0xc8] sm:$0xff]  ;;  %v1770_v59 = vpop.f32.mrb[4].mxu0 }
 0x213   : > { %1727 = vmatprep.mubr.bf16.mxu1 %v1451_v15  ;;  %v2261_v17 = vpop.f32.mrb[5].mxu0 }
 0x214   : > { %v1773_v11 = vpop.f32.mrb[6].mxu0 }
 0x215   : > { %v2262_v41 = vpop.f32.mrb[7].mxu0 }
 0x216   : > { %v1450_v62 = vld [vmem:[#allocation3 + $0xc0] sm:$0xff] }
 0x217   : > { %1728 = vmatmul.mubr.bf16.gmra.mrb[48].mxu1 %v1450_v62 }
 0x21a   : > { %v1778_v37 = vpop.f32.mrb[8].mxu0 }
 0x21b   : > { %v2265_v14 = vpop.f32.mrb[9].mxu0 }
 0x21c   : > { %v1781_v24 = vpop.f32.mrb[10].mxu0 }
 0x21d   : > { %v2266_v22 = vpop.f32.mrb[11].mxu0 }
 0x222   : > { %v3217_v27 = vpop.f32.mrb[12].mxu0 }
 0x223   : > { %v2269_v57 = vpop.f32.mrb[13].mxu0 }
 0x224   : > { %v3219_v19 = vpop.f32.mrb[14].mxu0 }
 0x225   : > { %v2270_v39 = vpop.f32.mrb[15].mxu0 }
 0x22a   : > { %v3221_v13 = vpop.f32.mrb[16].mxu0 }
 0x22b   : > { %v2273_v28 = vpop.f32.mrb[17].mxu0 }
 0x22c   : > { %v3223_v1 = vpop.f32.mrb[18].mxu0 }
 0x22d   : > { %v2274_v2 = vpop.f32.mrb[19].mxu0 }
 0x232   : > { %v3225_v50 = vpop.f32.mrb[20].mxu0 }
 0x233   : > { %v2277_v16 = vpop.f32.mrb[21].mxu0 }
 0x234   : > { %v3227_v46 = vpop.f32.mrb[22].mxu0 }
 0x235   : > { %v2278_v31 = vpop.f32.mrb[23].mxu0 }
 0x23a   : > { %v3229_v53 = vpop.f32.mrb[24].mxu0 }
 0x23b   : > { %v2281_v7 = vpop.f32.mrb[25].mxu0 }
 0x23c   : > { %v3231_v61 = vpop.f32.mrb[26].mxu0 }
 0x23d   : > { %v2282_v55 = vpop.f32.mrb[27].mxu0 }
 0x242   : > { %v3233_v3 = vpop.f32.mrb[28].mxu0 }
 0x243   : > { %v2285_v8 = vpop.f32.mrb[29].mxu0 }
 0x244   : > { %v3235_v52 = vpop.f32.mrb[30].mxu0 }
 0x245   : > { %v2286_v32 = vpop.f32.mrb[31].mxu0 }
 0x24a   : > { %v3237_v20 = vpop.f32.mrb[32].mxu0 }
 0x24b   : > { %v2289_v18 = vpop.f32.mrb[33].mxu0 }
 0x24c   : > { %v3239_v26 = vpop.f32.mrb[34].mxu0 }
 0x24d   : > { %v2290_v25 = vpop.f32.mrb[35].mxu0 }
 0x252   : > { %v3241_v12 = vpop.f32.mrb[36].mxu0 }
 0x253   : > { %v2293_v48 = vpop.f32.mrb[37].mxu0 }
 0x254   : > { %v3243_v36 = vpop.f32.mrb[38].mxu0 }
 0x255   : > { %v2294_v40 = vpop.f32.mrb[39].mxu0 }
 0x29c   : > { %v2159_v51 = vpop.f32.mrb[16].mxu1 }
 0x29d   : > { %v2160_v4 = vpop.f32.mrb[17].mxu1 }
 0x29e   : > { %v2161_v5 = vadd.f32 %v2160_v4, %v2159_v51  ;;  %v2162_v34 = vpop.f32.mrb[18].mxu1 }
 0x29f   : > { %v2163_v49 = vpop.f32.mrb[19].mxu1 }
 0x2a0   : > { %v1666_v60 = vadd.f32 %v2161_v5, %v3245_v33  ;;  %v2164_v43 = vadd.f32 %v2163_v49, %v2162_v34 }
 0x2a2   : > { %v1771_v23 = vadd.f32 %v1770_v59, %v1666_v60  ;;  %v1669_v44 = vadd.f32 %v2164_v43, %v3245_v33 }
 0x2a4   : > { %v1841_v45 = vmax.f32 %v1771_v23, 0.0  ;;  %v1774_v63 = vadd.f32 %v1773_v11, %v1669_v44  ;;  %v2165_v9 = vpop.f32.mrb[20].mxu1 }
 0x2a5   : > { %v2166_v30 = vpop.f32.mrb[21].mxu1 }
 0x2a6   : > { %v2105_v35 = vpack.c.bf16 %v1841_v45, %v1841_v45  ;;  %v1842_v42 = vmax.f32 %v1774_v63, 0.0  ;;  %v2167_v58 = vadd.f32 %v2166_v30, %v2165_v9  ;;  %v2168_v10 = vpop.f32.mrb[22].mxu1 }
 0x2a7   : > { %v2169_v0 = vpop.f32.mrb[23].mxu1 }
 0x2a8   : > { %1932 = vst.msk [vmem:[%s3253_s25] sm:$0xf] %vm1931_vm14, %v2105_v35  ;;  %v2106_v47 = vpack.c.bf16 %v1842_v42, %v1842_v42  ;;  %v1674_v29 = vadd.f32 %v2167_v58, %v3245_v33  ;;  %v2170_v21 = vadd.f32 %v2169_v0, %v2168_v10 }
 0x2aa   : > { %1933 = vst.msk [vmem:[%s3253_s25 + $0x4] sm:$0xf] %vm1931_vm14, %v2106_v47  ;;  %v1779_v56 = vadd.f32 %v1778_v37, %v1674_v29  ;;  %v1677_v6 = vadd.f32 %v2170_v21, %v3245_v33 }
 0x2ac   : > { %v1843_v54 = vmax.f32 %v1779_v56, 0.0  ;;  %v1782_v38 = vadd.f32 %v1781_v24, %v1677_v6  ;;  %v2171_v15 = vpop.f32.mrb[24].mxu1 }
 0x2ad   : > { %v2172_v59 = vpop.f32.mrb[25].mxu1 }
 0x2ae   : > { %v2107_v17 = vpack.c.bf16 %v1843_v54, %v1843_v54  ;;  %v1844_v11 = vmax.f32 %v1782_v38, 0.0  ;;  %v2173_v41 = vadd.f32 %v2172_v59, %v2171_v15  ;;  %v2174_v62 = vpop.f32.mrb[26].mxu1 }
 0x2af   : > { %v2175_v14 = vpop.f32.mrb[27].mxu1 }
 0x2b0   : > { %1934 = vst.msk [vmem:[%s3253_s25 + $0x8] sm:$0xf] %vm1931_vm14, %v2107_v17  ;;  %v2108_v22 = vpack.c.bf16 %v1844_v11, %v1844_v11  ;;  %v1682_v57 = vadd.f32 %v2173_v41, %v3245_v33  ;;  %v2176_v39 = vadd.f32 %v2175_v14, %v2174_v62 }
 0x2b2   : > { %1935 = vst.msk [vmem:[%s3253_s25 + $0xc] sm:$0xf] %vm1931_vm14, %v2108_v22  ;;  %v1787_v37 = vadd.f32 %v3217_v27, %v1682_v57  ;;  %v1685_v24 = vadd.f32 %v2176_v39, %v3245_v33 }
 0x2b4   : > { %v1845_v28 = vmax.f32 %v1787_v37, 0.0  ;;  %v1790_v2 = vadd.f32 %v3219_v19, %v1685_v24  ;;  %v2177_v16 = vpop.f32.mrb[28].mxu1 }
 0x2b5   : > { %v2178_v31 = vpop.f32.mrb[29].mxu1 }
 0x2b6   : > { %v2109_v7 = vpack.c.bf16 %v1845_v28, %v1845_v28  ;;  %v1846_v55 = vmax.f32 %v1790_v2, 0.0  ;;  %v2179_v8 = vadd.f32 %v2178_v31, %v2177_v16  ;;  %v2180_v32 = vpop.f32.mrb[30].mxu1 }
 0x2b7   : > { %v2181_v18 = vpop.f32.mrb[31].mxu1 }
 0x2b8   : > { %1936 = vst.msk [vmem:[%s3253_s25 + $0x10] sm:$0xf] %vm1931_vm14, %v2109_v7  ;;  %v2110_v25 = vpack.c.bf16 %v1846_v55, %v1846_v55  ;;  %v1690_v48 = vadd.f32 %v2179_v8, %v3245_v33  ;;  %v2182_v40 = vadd.f32 %v2181_v18, %v2180_v32 }
 0x2ba   : > { %1937 = vst.msk [vmem:[%s3253_s25 + $0x14] sm:$0xf] %vm1931_vm14, %v2110_v25  ;;  %v1795_v27 = vadd.f32 %v3221_v13, %v1690_v48  ;;  %v1693_v19 = vadd.f32 %v2182_v40, %v3245_v33 }
 0x2bc   : > { %v1847_v51 = vmax.f32 %v1795_v27, 0.0  ;;  %v1798_v4 = vadd.f32 %v3223_v1, %v1693_v19  ;;  %v2183_v5 = vpop.f32.mrb[32].mxu1 }
 0x2bd   : > { %v2184_v34 = vpop.f32.mrb[33].mxu1 }
 0x2be   : > { %v2111_v49 = vpack.c.bf16 %v1847_v51, %v1847_v51  ;;  %v1848_v60 = vmax.f32 %v1798_v4, 0.0  ;;  %v2185_v43 = vadd.f32 %v2184_v34, %v2183_v5  ;;  %v2186_v23 = vpop.f32.mrb[34].mxu1 }
 0x2bf   : > { %v2187_v44 = vpop.f32.mrb[35].mxu1 }
 0x2c0   : > { %1938 = vst.msk [vmem:[%s3253_s25 + $0x18] sm:$0xf] %vm1931_vm14, %v2111_v49  ;;  %v2112_v45 = vpack.c.bf16 %v1848_v60, %v1848_v60  ;;  %v1698_v63 = vadd.f32 %v2185_v43, %v3245_v33  ;;  %v2188_v13 = vadd.f32 %v2187_v44, %v2186_v23 }
 0x2c2   : > { %1939 = vst.msk [vmem:[%s3253_s25 + $0x1c] sm:$0xf] %vm1931_vm14, %v2112_v45  ;;  %v1803_v9 = vadd.f32 %v3225_v50, %v1698_v63  ;;  %v1701_v1 = vadd.f32 %v2188_v13, %v3245_v33 }
 0x2c4   : > { %v1849_v30 = vmax.f32 %v1803_v9, 0.0  ;;  %v1806_v35 = vadd.f32 %v3227_v46, %v1701_v1 }
 0x2c6   : > { %v2113_v42 = vpack.c.bf16 %v1849_v30, %v1849_v30  ;;  %v1850_v58 = vmax.f32 %v1806_v35, 0.0  ;;  %v2189_v10 = vpop.f32.mrb[36].mxu1 }
 0x2c7   : > { %v2190_v0 = vpop.f32.mrb[37].mxu1 }
 0x2c8   : > { %1940 = vst.msk [vmem:[%s3253_s25 + $0x20] sm:$0xf] %vm1931_vm14, %v2113_v42  ;;  %v2114_v47 = vpack.c.bf16 %v1850_v58, %v1850_v58  ;;  %v2191_v29 = vadd.f32 %v2190_v0, %v2189_v10  ;;  %v2192_v21 = vpop.f32.mrb[38].mxu1 }
 0x2c9   : > { %v2193_v56 = vpop.f32.mrb[39].mxu1 }
 0x2ca   : > { %1941 = vst.msk [vmem:[%s3253_s25 + $0x24] sm:$0xf] %vm1931_vm14, %v2114_v47  ;;  %v1706_v50 = vadd.f32 %v2191_v29, %v3245_v33  ;;  %v2194_v6 = vadd.f32 %v2193_v56, %v2192_v21 }
 0x2cc   : > { %v1811_v54 = vadd.f32 %v3229_v53, %v1706_v50  ;;  %v1709_v46 = vadd.f32 %v2194_v6, %v3245_v33 }
 0x2ce   : > { %v1851_v38 = vmax.f32 %v1811_v54, 0.0  ;;  %v1814_v15 = vadd.f32 %v3231_v61, %v1709_v46 }
 0x2d0   : > { %v2115_v59 = vpack.c.bf16 %v1851_v38, %v1851_v38  ;;  %v1852_v17 = vmax.f32 %v1814_v15, 0.0 }
 0x2d2   : > { %1942 = vst.msk [vmem:[%s3253_s25 + $0x28] sm:$0xf] %vm1931_vm14, %v2115_v59  ;;  %v2116_v11 = vpack.c.bf16 %v1852_v17, %v1852_v17  ;;  %v2195_v41 = vpop.f32.mrb[40].mxu1 }
 0x2d3   : > { %v2196_v62 = vpop.f32.mrb[41].mxu1 }
 0x2d4   : > { %1943 = vst.msk [vmem:[%s3253_s25 + $0x2c] sm:$0xf] %vm1931_vm14, %v2116_v11  ;;  %v2197_v14 = vadd.f32 %v2196_v62, %v2195_v41  ;;  %v2198_v22 = vpop.f32.mrb[42].mxu1 }
 0x2d5   : > { %v2199_v57 = vpop.f32.mrb[43].mxu1 }
 0x2d6   : > { %v1714_v53 = vadd.f32 %v2197_v14, %v3245_v33  ;;  %v2200_v39 = vadd.f32 %v2199_v57, %v2198_v22 }
 0x2d8   : > { %v1819_v37 = vadd.f32 %v3233_v3, %v1714_v53  ;;  %v1717_v61 = vadd.f32 %v2200_v39, %v3245_v33 }
 0x2da   : > { %v1853_v24 = vmax.f32 %v1819_v37, 0.0  ;;  %v1822_v28 = vadd.f32 %v3235_v52, %v1717_v61 }
 0x2dc   : > { %v2117_v2 = vpack.c.bf16 %v1853_v24, %v1853_v24  ;;  %v1854_v16 = vmax.f32 %v1822_v28, 0.0 }
 0x2de   : > { %1944 = vst.msk [vmem:[%s3253_s25 + $0x30] sm:$0xf] %vm1931_vm14, %v2117_v2  ;;  %v2118_v31 = vpack.c.bf16 %v1854_v16, %v1854_v16 }
 0x2df   : > { %v2201_v7 = vpop.f32.mrb[44].mxu1 }
 0x2e0   : > { %v2202_v55 = vpop.f32.mrb[45].mxu1  ;;  %1945 = vst.msk [vmem:[%s3253_s25 + $0x34] sm:$0xf] %vm1931_vm14, %v2118_v31 }
 0x2e1   : > { %v2203_v8 = vadd.f32 %v2202_v55, %v2201_v7  ;;  %v2204_v32 = vpop.f32.mrb[46].mxu1 }
 0x2e2   : > { %v2205_v18 = vpop.f32.mrb[47].mxu1 }
 0x2e3   : > { %v1722_v3 = vadd.f32 %v2203_v8, %v3245_v33  ;;  %v2206_v25 = vadd.f32 %v2205_v18, %v2204_v32 }
 0x2e5   : > { %v1827_v48 = vadd.f32 %v3237_v20, %v1722_v3  ;;  %v1725_v52 = vadd.f32 %v2206_v25, %v3245_v33 }
 0x2e7   : > { %v1855_v40 = vmax.f32 %v1827_v48, 0.0  ;;  %v1830_v27 = vadd.f32 %v3239_v26, %v1725_v52 }
 0x2e9   : > { %v2119_v19 = vpack.c.bf16 %v1855_v40, %v1855_v40  ;;  %v1856_v51 = vmax.f32 %v1830_v27, 0.0 }
 0x2ea   : > { %v2207_v5 = vpop.f32.mrb[48].mxu1 }
 0x2eb   : > { %1946 = vst.msk [vmem:[%s3253_s25 + $0x38] sm:$0xf] %vm1931_vm14, %v2119_v19  ;;  %v2120_v4 = vpack.c.bf16 %v1856_v51, %v1856_v51  ;;  %v2208_v34 = vpop.f32.mrb[49].mxu1 }
 0x2ec   : > { %v2209_v49 = vadd.f32 %v2208_v34, %v2207_v5  ;;  %v2210_v60 = vpop.f32.mrb[50].mxu1 }
 0x2ed   : > { %1947 = vst.msk [vmem:[%s3253_s25 + $0x3c] sm:$0xf] %vm1931_vm14, %v2120_v4  ;;  %v2211_v43 = vpop.f32.mrb[51].mxu1 }
 0x2ee   : > { %v1730_v20 = vadd.f32 %v2209_v49, %v3245_v33  ;;  %v2212_v23 = vadd.f32 %v2211_v43, %v2210_v60 }
 0x2f0   : > { %v1835_v44 = vadd.f32 %v3241_v12, %v1730_v20  ;;  %v1733_v26 = vadd.f32 %v2212_v23, %v3245_v33 }
 0x2f2   : > { %v1857_v45 = vmax.f32 %v1835_v44, 0.0  ;;  %v1838_v63 = vadd.f32 %v3243_v36, %v1733_v26 }
 0x2f4   : > { %v2121_v13 = vpack.c.bf16 %v1857_v45, %v1857_v45  ;;  %v1858_v9 = vmax.f32 %v1838_v63, 0.0 }
 0x2f6   : > { %1948 = vst.msk [vmem:[%s3253_s25 + $0x40] sm:$0xf] %vm1931_vm14, %v2121_v13  ;;  %v2122_v1 = vpack.c.bf16 %v1858_v9, %v1858_v9 }
 0x2f8   : > { %1949 = vst.msk [vmem:[%s3253_s25 + $0x44] sm:$0xf] %vm1931_vm14, %v2122_v1 }
 0x2f9 PF: > { %s16_s15 = sadd.s32 1, %s2426_s15  }
 0x2fa   : > { %p13_p5 = scmp.ge.s32.totalorder %s16_s15, 4  }
 0x2fc   :  { %15 = sbr.rel (!%p13_p5) target bundleno = 2 (0x2), region = 75 }
 0x303   :  { %1972 = vsyncpa [#allocation5], 1 }
 0x304   :  { %1974 = vsyncpa [#allocation5 + $0x1], 1 }
 0x305   :  { %1975 = vsyncpa [#allocation7], 1 }

// kernel: dqn_forward.3
= control target key start
LH: loop header
LB: loop body
LE: loop exit
PB: predicated region body
PF: predicated region fallthrough
CT: control target
= control target key end

     0   :  { %10 = vsyncpa [#allocation4], 0  ;;  %s5895_s0 = inlined_call_operand.vmem [shape: bf16[2,6400], index: 0, kind: input, shape index: {}]   ;;  %s5896_s1 = inlined_call_operand.hbm [shape: bf16[6400,256], index: 1, kind: input, shape index: {}]   ;;  %s5897_s2 = inlined_call_operand.hbm [shape: f32[1,256], index: 2, kind: input, shape index: {}]   ;;  %s5898_s3 = inlined_call_operand.vmem [shape: f32[256,4], index: 3, kind: input, shape index: {}]   ;;  %s5899_s4 = inlined_call_operand.hbm [shape: f32[1,4], index: 4, kind: input, shape index: {}]   ;;  %s5900_s5 = inlined_call_operand.hbm [shape: f32[2,4], index: 5, kind: output, shape index: {}]  }
   0x1   :  { %12 = vsyncpa [#allocation4 + $0x1], 0 }
   0x2   :  { %13 = vsyncpa [#allocation7], 0 }
   0x3   :  { %14 = vsyncpa [#allocation5], 0  ;;  %s5067_s18 = smov 0   ;;  %s5069_s19 = smov 0  }
   0x4   :  { %s5071_s20 = smov 0   ;;  %s5073_s21 = smov 0  }
   0x5 LB: > { %s5086_s22 = sadd.s32 4294967295, %s5025_s21   ;;  %s5089_s23 = sadd.s32 1, %s5025_s21   ;;  %s5025_s21 = sphi %s5073_s21, %s5919_s21   ;;  %s5021_s20 = sphi %s5071_s20, %s5918_s20   ;;  %s5017_s19 = sphi %s5069_s19, %s5917_s19   ;;  %s5013_s18 = sphi %s5067_s18, %s5916_s18  }
   0x6   : > { %s50_s24 = ssub.s32 %s5025_s21, %s5089_s23  ;;  %s53_s25 = sadd.s32 1, %s5021_s20 }
   0x7   : > { %p51_p0 = scmp.eq.s32.totalorder %s50_s24, 0  ;;  %p60_p1 = scmp.ne.s32.totalorder %s5021_s20, %s5017_s19 }
   0x8   : > { %p61_p2 = scmp.eq.s32.totalorder %s5025_s21, 0  ;;  %p66_p3 = scmp.ne.s32.totalorder %s5017_s19, %s5013_s18 }
   0x9   : > { %s5099_s26 = scalar_select %p51_p0, %s5021_s20, %s53_s25  }
   0xa   : > { %p5101_p4 = por %p61_p2, %p60_p1  ;;  %p5901_p5 = scmp.eq.s32.totalorder %s5086_s22, 0 }
   0xb   : > { %p3658_p6 = scmp.ge.s32.totalorder %s5025_s21, 1  ;;  %p161_p7 = scmp.lt.s32.totalorder %s5025_s21, 3 }
   0xc   : > { %p5110_p8 = por %p5901_p5, %p66_p3  ;;  %s5027_s30 = smov [#allocation6]  }
   0xd   : > { %p5115_p10 = pnand %p3658_p6, %p161_p7  ;;  %s174_s6 = sshll.u32 %s5027_s30, 4  ;;  %s175_s6 = int_to_ptr.vmem [resolvable:$true] %s174_s6 }
   0xe   : > { %s5906_s28 = scalar_select %p5110_p8, 1, 0 }
   0xf   : > { %s5907_s29 = scalar_select %p5115_p10, 1, 0 }
  0x10   : > { %p4207_p11 = pneg %p5115_p10  ;;  %p4220_p12 = scmp.lt.s32.totalorder %s5025_s21, 2 }
  0x11   : > { %s5028_s8 = smov [#allocation8]   ;;  %s207_s11 = sand.u32 1, %s5021_s20  }
  0x12   : > { %p5124_p13 = pnand %p4207_p11, %p5901_p5  ;;  %s188_s9 = sshll.u32 %s5028_s8, 4  ;;  %s5134_s9 = int_to_ptr.vmem [resolvable:$true] %s188_s9 }
  0x13   : > { %p5130_p0 = pnand %p4220_p12, %p5101_p4  ;;  %s4871_s14 = scalar_lea.hbm %s5897_s2, 32 }
  0x14   : > { %p4872_p1 = scmp.ne.s32.totalorder %s5897_s2, %s4871_s14  ;;  %p4873_p2 = pneg %p5124_p13 }
  0x15   : > { %s5909_s10 = scalar_select %p5130_p0, 1, 0 }
  0x16   : > { %p4874_p3 = pnand %p4873_p2, %p4872_p1  ;;  %p4878_p6 = scmp.lt.u32.totalorder %s4871_s14, %s5897_s2 }
  0x18   : > { %p4875_p4 = pneg %p4874_p3 }
  0x1a   : > { %p4880_p7 = pnand %p4878_p6, %p4875_p4 }
  0x1c   : > { %4883 = shalt.err (!%p4880_p7)
}
  0x1d   : > { %s4884_s24 = scalar_lea.vmem %s175_s6, 32  ;;  %p4892_p5 = scmp.lt.s32.totalorder %s175_s6, %s175_s6 }
  0x1e   : > { %p4885_p11 = scmp.ne.s32.totalorder %s175_s6, %s4884_s24  ;;  %p4893_p8 = scmp.lt.s32.totalorder %s4884_s24, %s4884_s24 }
  0x20   : > { %p4887_p12 = pnand %p4885_p11, %p4873_p2  ;;  %p4894_p10 = por %p4893_p8, %p4892_p5 }
  0x22   : > { %p4888_p9 = pneg %p4887_p12 }
  0x24   : > { %p4895_p0 = pnand %p4894_p10, %p4888_p9 }
  0x26   : > { %4898 = shalt.err (!%p4895_p0)
}
  0x27   : > { %4210 = dma.hbm_to_vmem [thread:$0]  (!%p5124_p13), %s5897_s2, 32, %s175_s6, [#allocation7]  }
  0x28   : > { %s4899_s12 = scalar_lea.hbm %s5899_s4, 16 }
  0x29   : > { %p4900_p1 = scmp.ne.s32.totalorder %s5899_s4, %s4899_s12  ;;  %p4906_p9 = scmp.lt.u32.totalorder %s4899_s12, %s5899_s4 }
  0x2b   : > { %p4902_p5 = pnand %p4900_p1, %p4873_p2 }
  0x2d   : > { %p4903_p8 = pneg %p4902_p5 }
  0x2f   : > { %p4908_p10 = pnand %p4906_p9, %p4903_p8 }
  0x31   : > { %4911 = shalt.err (!%p4908_p10)
}
  0x32   : > { %s4912_s6 = scalar_lea.vmem %s5134_s9, 16  ;;  %s4919_s17 = scalar_lea.vmem %s5134_s9, 32 }
  0x33   : > { %p4913_p0 = scmp.ne.s32.totalorder %s5134_s9, %s4912_s6  ;;  %p4920_p6 = scmp.lt.s32.totalorder %s5134_s9, %s5134_s9 }
  0x34   : > { %p4921_p7 = scmp.lt.s32.totalorder %s4919_s17, %s4912_s6 }
  0x35   : > { %p4915_p3 = pnand %p4913_p0, %p4873_p2 }
  0x36   : > { %p4922_p11 = por %p4921_p7, %p4920_p6 }
  0x37   : > { %p4916_p4 = pneg %p4915_p3 }
  0x39   : > { %p4923_p12 = pnand %p4922_p11, %p4916_p4 }
  0x3b   : > { %4926 = shalt.err (!%p4923_p12)
}
  0x3c   : > { %4213 = dma.hbm_to_vmem [thread:$0]  (!%p5124_p13), %s5899_s4, 16, %s5134_s9, [#allocation7]  }
  0x3d   : > { %s4191_s25 = smul.u32 3200, %s207_s11  ;;  %s5197_s14 = scalar_lea.sflag [#allocation4], %s207_s11 }
  0x3e   : > { %s4077_s27 = smul.u32 51200, %s5025_s21  ;;  %p5910_p2 = scmp.ne.s32.totalorder %s5909_s10, 0 }
  0x3f   : > { %s211_s7 = scalar_lea.vmem [#allocation3], %s4191_s25  ;;  %s4932_s16 = scalar_lea.hbm %s5896_s1, 102400 }
  0x40   : > { %s5191_s12 = scalar_lea.hbm %s5896_s1, %s4077_s27  ;;  %s219_s13 = sshll.u32 %s211_s7, 4  ;;  %s5193_s13 = int_to_ptr.vmem [resolvable:$true] %s219_s13 }
  0x41   : > { %s4927_s9 = scalar_lea.hbm %s5191_s12, 51200  ;;  %p4929_p1 = pneg %p5910_p2 }
  0x42   : > { %p4928_p13 = scmp.ne.s32.totalorder %s5191_s12, %s4927_s9  ;;  %p4933_p9 = scmp.lt.u32.totalorder %s5191_s12, %s5896_s1 }
  0x43   : > { %p4934_p10 = scmp.lt.u32.totalorder %s4932_s16, %s4927_s9  ;;  %p4936_p3 = scmp.lt.u32.totalorder %s4927_s9, %s5191_s12 }
  0x44   : > { %p4930_p5 = pnand %p4929_p1, %p4928_p13 }
  0x45   : > { %p4935_p0 = por %p4934_p10, %p4933_p9 }
  0x46   : > { %p4931_p8 = pneg %p4930_p5 }
  0x47   : > { %p4937_p4 = por %p4936_p3, %p4935_p0 }
  0x49   : > { %p4938_p6 = pnand %p4937_p4, %p4931_p8 }
  0x4b   : > { %4941 = shalt.err (!%p4938_p6)
}
  0x4c   : > { %s4942_s11 = scalar_lea.vmem %s5193_s13, 51200  ;;  %s5029_s18 = smov [#allocation3]  }
  0x4d   : > { %p4943_p7 = scmp.ne.s32.totalorder %s5193_s13, %s4942_s11  ;;  %s4947_s24 = sshll.u32 %s5029_s18, 4  ;;  %s4948_s24 = int_to_ptr.vmem [resolvable:$false] %s4947_s24 }
  0x4e   : > { %s4949_s25 = scalar_lea.vmem %s4948_s24, 102400  ;;  %p4950_p13 = scmp.lt.s32.totalorder %s5193_s13, %s4948_s24 }
  0x4f   : > { %p4945_p11 = pnand %p4943_p7, %p4929_p1  ;;  %p4951_p5 = scmp.lt.s32.totalorder %s4949_s25, %s4942_s11 }
  0x51   : > { %p4946_p12 = pneg %p4945_p11  ;;  %p4952_p9 = por %p4951_p5, %p4950_p13 }
  0x53   : > { %p4953_p10 = pnand %p4952_p9, %p4946_p12 }
  0x55   : > { %4956 = shalt.err (!%p4953_p10)
}
  0x56   : > { %s5030_s27 = smov 128   ;;  %s5031_s30 = smov 8  }
  0x57   : > { %4217 = dma.hbm_to_vmem [thread:$0]  (!%p5910_p2), %s5191_s12, 51200, %s5193_s13, %s5197_s14, %s5030_s27, %s5030_s27, %s5031_s30  }
  0x58   : > { %p5911_p1 = scmp.ne.s32.totalorder %s5907_s29, 0 }
  0x59   : > { %s233_s8 = sand.u32 (!%p5911_p1), 1, %s5017_s19   ;;  %p5912_p8 = scmp.ne.s32.totalorder (!%p5911_p1), %s5906_s28, 0 }
  0x5a   : > { %231 = sbr.rel (%p5911_p1) target bundleno = 1009 (0x3f1), region = 40  ;;  %s234_s9 = scalar_lea.sflag (!%p5911_p1), [#allocation4], %s233_s8 }
  0x5b   : > { %s4192_s7 = smul.u32 (!%p5911_p1), 3200, %s233_s8 }
  0x5d   : > { %s5228_s21 = scalar_lea.vmem (!%p5911_p1), [#allocation3], %s4192_s7 }
  0x61   : > { %5000 = dma.done.wait (%p5912_p8), %s234_s9, 51200  }
  0x62   : > { %5002 = vsyncadd (%p5912_p8), %s234_s9, 4294916096  ;;  %p5913_p0 = scmp.eq.s32.totalorder %s5086_s22, 0 }
  0x64   : > { %5004 = dma.done.wait (%p5913_p0), [#allocation7], 48   ;;  %p5914_p2 = pmov %p5913_p0 }
  0x65   : > { %s271_s29 = smul.u32 25, %s5086_s22  ;;  %p5915_p4 = scmp.ne.s32.totalorder %s5086_s22, 0 }
  0x66   : > { %5006 = vsyncadd (%p5914_p2), [#allocation7], 4294967248  ;;  %v5032_v0 = vmov (!%p5915_p4), 0.0  }
  0x67   : > { %p272_p3 = scmp.lt.s32.totalorder %s271_s29, 49  ;;  %281 = sbr.rel (%p5915_p4) target bundleno = 110 (0x6e), region = 56  ;;  %282 = vst [vmem:[#allocation2] sm:$0xf] (!%p5915_p4), %v5032_v0 }
  0x69   : > { %s5921_s29 = smov (!%p272_p3, %s271_s29), 49 }
  0x6a   : > { %s5242_s13 = scalar_lea.vmem %s5895_s0, %s5921_s29 }
  0x6e PF: > { %v4266_v1 = vld [vmem:[%s5228_s21 + $0x4] ss:$8 sps:$4 sm:$0xff]   ;;  %v4270_v3 = vld [vmem:[%s5228_s21] ss:$8 sps:$4 sm:$0xff]   ;;  %v4272_v5 = vld [vmem:[%s5228_s21 + $0x14] ss:$8 sps:$4 sm:$0xff]   ;;  %v696_v39 = vlaneseq }
  0x6f   : > { %v4268_v2 = vld [vmem:[%s5228_s21 + $0x604] ss:$8 sps:$4 sm:$0xff]   ;;  %2878 = vmatprep.subr.bf16.mxu1 %v4266_v1  ;;  %v4271_v4 = vld [vmem:[%s5228_s21 + $0x600] ss:$8 sps:$4 sm:$0xff]   ;;  %v4274_v6 = vld [vmem:[%s5228_s21 + $0x614] ss:$8 sps:$4 sm:$0xff]  }
  0x70   : > { %3124 = vmatprep.subr.bf16.mxu0 %v4268_v2  ;;  %2879 = vmatpush1.bf16.msra.mxu1 %v4270_v3  ;;  %v4276_v7 = vld [vmem:[%s5228_s21 + $0x10] ss:$8 sps:$4 sm:$0xff]   ;;  %v4278_v9 = vld [vmem:[%s5228_s21 + $0x24] ss:$8 sps:$4 sm:$0xff]   ;;  %v4282_v11 = vld [vmem:[%s5228_s21 + $0x20] ss:$8 sps:$4 sm:$0xff]  }
  0x71   : > { %3125 = vmatpush1.bf16.msra.mxu0 %v4271_v4  ;;  %2880 = vmatprep.subr.bf16.mxu1 %v4272_v5  ;;  %v4277_v8 = vld [vmem:[%s5228_s21 + $0x610] ss:$8 sps:$4 sm:$0xff]   ;;  %v4280_v10 = vld [vmem:[%s5228_s21 + $0x624] ss:$8 sps:$4 sm:$0xff]   ;;  %v4283_v12 = vld [vmem:[%s5228_s21 + $0x620] ss:$8 sps:$4 sm:$0xff]  }
  0x72   : > { %3126 = vmatprep.subr.bf16.mxu0 %v4274_v6  ;;  %v4284_v13 = vld [vmem:[%s5228_s21 + $0x34] ss:$8 sps:$4 sm:$0xff]   ;;  %v4288_v15 = vld [vmem:[%s5228_s21 + $0x30] ss:$8 sps:$4 sm:$0xff]   ;;  %v4290_v17 = vld [vmem:[%s5228_s21 + $0x44] ss:$8 sps:$4 sm:$0xff]  }
  0x73   : > { %v4286_v14 = vld [vmem:[%s5228_s21 + $0x634] ss:$8 sps:$4 sm:$0xff]   ;;  %v4289_v16 = vld [vmem:[%s5228_s21 + $0x630] ss:$8 sps:$4 sm:$0xff]   ;;  %v4292_v18 = vld [vmem:[%s5228_s21 + $0x644] ss:$8 sps:$4 sm:$0xff]  }
  0x74   : > { %2881 = vmatpush1.bf16.msra.mxu1 %v4276_v7  ;;  %v4294_v19 = vld [vmem:[%s5228_s21 + $0x40] ss:$8 sps:$4 sm:$0xff]   ;;  %v4296_v21 = vld [vmem:[%s5228_s21 + $0x54] ss:$8 sps:$4 sm:$0xff]   ;;  %v4300_v23 = vld [vmem:[%s5228_s21 + $0x50] ss:$8 sps:$4 sm:$0xff]  }
  0x75   : > { %3127 = vmatpush1.bf16.msra.mxu0 %v4277_v8  ;;  %2882 = vmatprep.subr.bf16.mxu1 %v4278_v9  ;;  %v4295_v20 = vld [vmem:[%s5228_s21 + $0x640] ss:$8 sps:$4 sm:$0xff]   ;;  %v4298_v22 = vld [vmem:[%s5228_s21 + $0x654] ss:$8 sps:$4 sm:$0xff]   ;;  %v4301_v24 = vld [vmem:[%s5228_s21 + $0x650] ss:$8 sps:$4 sm:$0xff]  }
  0x76   : > { %3128 = vmatprep.subr.bf16.mxu0 %v4280_v10  ;;  %v4302_v25 = vld [vmem:[%s5228_s21 + $0x64] ss:$8 sps:$4 sm:$0xff]   ;;  %v4306_v27 = vld [vmem:[%s5228_s21 + $0x60] ss:$8 sps:$4 sm:$0xff]   ;;  %v4308_v29 = vld [vmem:[%s5228_s21 + $0x74] ss:$8 sps:$4 sm:$0xff]  }
  0x77   : > { %v4304_v26 = vld [vmem:[%s5228_s21 + $0x664] ss:$8 sps:$4 sm:$0xff]   ;;  %v4307_v28 = vld [vmem:[%s5228_s21 + $0x660] ss:$8 sps:$4 sm:$0xff]   ;;  %v4310_v30 = vld [vmem:[%s5228_s21 + $0x674] ss:$8 sps:$4 sm:$0xff]  }
  0x78   : > { %2883 = vmatpush1.bf16.msra.mxu1 %v4282_v11  ;;  %v4312_v31 = vld [vmem:[%s5228_s21 + $0x70] ss:$8 sps:$4 sm:$0xff]   ;;  %v4314_v33 = vld [vmem:[%s5228_s21 + $0x84] ss:$8 sps:$4 sm:$0xff]   ;;  %v4318_v35 = vld [vmem:[%s5228_s21 + $0x80] ss:$8 sps:$4 sm:$0xff]  }
  0x79   : > { %3129 = vmatpush1.bf16.msra.mxu0 %v4283_v12  ;;  %2884 = vmatprep.subr.bf16.mxu1 %v4284_v13  ;;  %v4313_v32 = vld [vmem:[%s5228_s21 + $0x670] ss:$8 sps:$4 sm:$0xff]   ;;  %v4316_v34 = vld [vmem:[%s5228_s21 + $0x684] ss:$8 sps:$4 sm:$0xff]   ;;  %v4319_v36 = vld [vmem:[%s5228_s21 + $0x680] ss:$8 sps:$4 sm:$0xff]  }
  0x7a   : > { %3130 = vmatprep.subr.bf16.mxu0 %v4286_v14  ;;  %v5033_v37 = vmov 1966171168   ;;  %v4320_v40 = vld [vmem:[%s5228_s21 + $0x94] ss:$8 sps:$4 sm:$0xff]   ;;  %v4324_v42 = vld [vmem:[%s5228_s21 + $0x90] ss:$8 sps:$4 sm:$0xff]  }
  0x7b   : > { %v694_v38 = vunpack.c.l.s4 %v5033_v37  ;;  %v4322_v41 = vld [vmem:[%s5228_s21 + $0x694] ss:$8 sps:$4 sm:$0xff]   ;;  %v5285_v44 = vshrl.u32 %v696_v39, 7  ;;  %v4325_v45 = vld [vmem:[%s5228_s21 + $0x690] ss:$8 sps:$4 sm:$0xff]   ;;  %v285_v57 = vld [vmem:[%s5242_s13 + $0x8] sm:$0xff] }
  0x7c   : > { %2885 = vmatpush1.bf16.msra.mxu1 %v4288_v15  ;;  %v4326_v46 = vld [vmem:[%s5228_s21 + $0xa4] ss:$8 sps:$4 sm:$0xff]   ;;  %v4330_v48 = vld [vmem:[%s5228_s21 + $0xa0] ss:$8 sps:$4 sm:$0xff]   ;;  %v4332_v51 = vld [vmem:[%s5228_s21 + $0xb4] ss:$8 sps:$4 sm:$0xff]   ;;  %v741_v61 = vcombine.high %v285_v57, %v285_v57 }
  0x7d   : > { %3131 = vmatpush1.bf16.msra.mxu0 %v4289_v16  ;;  %2886 = vmatprep.subr.bf16.mxu1 %v4290_v17  ;;  %v695_v43 = vunpack.c.0.s8 %v694_v38  ;;  %v4328_v47 = vld [vmem:[%s5228_s21 + $0x6a4] ss:$8 sps:$4 sm:$0xff]   ;;  %v4331_v49 = vld [vmem:[%s5228_s21 + $0x6a0] ss:$8 sps:$4 sm:$0xff]   ;;  %v4334_v52 = vld [vmem:[%s5228_s21 + $0x6b4] ss:$8 sps:$4 sm:$0xff]  }
  0x7e   : > { %3132 = vmatprep.subr.bf16.mxu0 %v4292_v18  ;;  %v5298_v53 = vld [vmem:[%s5242_s13] sm:$0xff]  ;;  %v4336_v54 = vld [vmem:[%s5228_s21 + $0xb0] ss:$8 sps:$4 sm:$0xff]   ;;  %v4338_v58 = vld [vmem:[%s5228_s21 + $0xc4] ss:$8 sps:$4 sm:$0xff]   ;;  %p4069_p6 = scmp.ne.s32.totalorder %s5086_s22, 1 }
  0x7f   : > { %v5293_v50 = vsub.s32 %v695_v43, %v5285_v44  ;;  %v4337_v56 = vld [vmem:[%s5228_s21 + $0x6b0] ss:$8 sps:$4 sm:$0xff]   ;;  %v4340_v59 = vld [vmem:[%s5228_s21 + $0x6c4] ss:$8 sps:$4 sm:$0xff]   ;;  %v4342_v0 = vld [vmem:[%s5228_s21 + $0xc0] ss:$8 sps:$4 sm:$0xff]  }
  0x80   : > { %2887 = vmatpush1.bf16.msra.mxu1 %v4294_v19  ;;  %v4343_v1 = vld [vmem:[%s5228_s21 + $0x6c0] ss:$8 sps:$4 sm:$0xff]   ;;  %v4344_v2 = vld [vmem:[%s5228_s21 + $0xd4] ss:$8 sps:$4 sm:$0xff]   ;;  %v4348_v6 = vld [vmem:[%s5228_s21 + $0xd0] ss:$8 sps:$4 sm:$0xff]  }
  0x81   : > { %3133 = vmatpush1.bf16.msra.mxu0 %v4295_v20  ;;  %2888 = vmatprep.subr.bf16.mxu1 %v4296_v21  ;;  %v699_v55 = vrot.slane %v5298_v53, %v5293_v50  ;;  %v755_v63 = vrot.slane %v741_v61, %v5293_v50  ;;  %v4346_v3 = vld [vmem:[%s5228_s21 + $0x6d4] ss:$8 sps:$4 sm:$0xff]   ;;  %v4349_v7 = vld [vmem:[%s5228_s21 + $0x6d0] ss:$8 sps:$4 sm:$0xff]   ;;  %v4350_v8 = vld [vmem:[%s5228_s21 + $0xe4] ss:$8 sps:$4 sm:$0xff]  }
  0x82   : > { %3134 = vmatprep.subr.bf16.mxu0 %v4298_v22  ;;  %v4352_v9 = vld [vmem:[%s5228_s21 + $0x6e4] ss:$8 sps:$4 sm:$0xff]   ;;  %v4354_v10 = vld [vmem:[%s5228_s21 + $0xe0] ss:$8 sps:$4 sm:$0xff]   ;;  %v4356_v12 = vld [vmem:[%s5228_s21 + $0xf4] ss:$8 sps:$4 sm:$0xff]  }
  0x83   : > { %v707_v60 = vcombine.high %v699_v55, %v699_v55  ;;  %v757_v4 = vcombine.high %v755_v63, %v755_v63  ;;  %v4355_v11 = vld [vmem:[%s5228_s21 + $0x6e0] ss:$8 sps:$4 sm:$0xff]   ;;  %v4358_v13 = vld [vmem:[%s5228_s21 + $0x6f4] ss:$8 sps:$4 sm:$0xff]   ;;  %v4360_v14 = vld [vmem:[%s5228_s21 + $0xf0] ss:$8 sps:$4 sm:$0xff]   ;;  %v5327_v18 = vrot.slane %v699_v55, %v5293_v50  ;;  %v5330_v19 = vrot.slane %v755_v63, %v5293_v50 }
  0x84   : > { %2889 = vmatpush1.bf16.msra.mxu1 %v4300_v23  ;;  %v4361_v15 = vld [vmem:[%s5228_s21 + $0x6f0] ss:$8 sps:$4 sm:$0xff]   ;;  %v4365_v16 = vld [vmem:[%s5228_s21 + $0x104] ss:$8 sps:$4 sm:$0xff]   ;;  %v4363_v20 = vld [vmem:[%s5228_s21 + $0x100] ss:$8 sps:$4 sm:$0xff]  }
  0x85   : > { %3135 = vmatpush1.bf16.msra.mxu0 %v4301_v24  ;;  %2890 = vmatprep.subr.bf16.mxu1 %v4302_v25  ;;  %v729_v62 = vrot.slane %v707_v60, %v5293_v50  ;;  %v785_v5 = vrot.slane %v757_v4, %v5293_v50  ;;  %v4369_v17 = vld [vmem:[%s5228_s21 + $0x704] ss:$8 sps:$4 sm:$0xff]   ;;  %v4367_v21 = vld [vmem:[%s5228_s21 + $0x700] ss:$8 sps:$4 sm:$0xff]   ;;  %v4372_v22 = vld [vmem:[%s5228_s21 + $0x114] ss:$8 sps:$4 sm:$0xff]  }
  0x86   : > { %3136 = vmatprep.subr.bf16.mxu0 %v4304_v26  ;;  %v4375_v23 = vld [vmem:[%s5228_s21 + $0x714] ss:$8 sps:$4 sm:$0xff]   ;;  %v4370_v26 = vld [vmem:[%s5228_s21 + $0x110] ss:$8 sps:$4 sm:$0xff]   ;;  %v4393_v37 = vld [vmem:[%s5228_s21 + $0x744] ss:$8 sps:$4 sm:$0xff]  }
  0x87   : > { %2910 = vmatprep.mubr.bf16.mxu1 %v729_v62  ;;  %3156 = vmatprep.mubr.bf16.mxu0 %v785_v5  ;;  %v739_v24 = vcombine.high %v729_v62, %v729_v62  ;;  %v789_v25 = vcombine.high %v785_v5, %v785_v5  ;;  %v4388_v38 = vld [vmem:[%s5228_s21 + $0x140] ss:$8 sps:$4 sm:$0xff]   ;;  %v4397_v43 = vld [vmem:[%s5228_s21 + $0x750] ss:$8 sps:$4 sm:$0xff]   ;;  %v4414_v55 = vld [vmem:[%s5228_s21 + $0x184] ss:$8 sps:$4 sm:$0xff]  }
  0x88   : > { %2891 = vmatpush1.bf16.msra.mxu1 %v4306_v27  ;;  %v4373_v27 = vld [vmem:[%s5228_s21 + $0x710] ss:$8 sps:$4 sm:$0xff]   ;;  %v4391_v39 = vld [vmem:[%s5228_s21 + $0x740] ss:$8 sps:$4 sm:$0xff]   ;;  %v4423_v60 = vld [vmem:[%s5228_s21 + $0x794] ss:$8 sps:$4 sm:$0xff]  }
  0x89   : > { %3137 = vmatpush1.bf16.msra.mxu0 %v4307_v28  ;;  %2892 = vmatprep.subr.bf16.mxu1 %v4308_v29  ;;  %v4378_v28 = vld [vmem:[%s5228_s21 + $0x124] ss:$8 sps:$4 sm:$0xff]   ;;  %v4412_v57 = vld [vmem:[%s5228_s21 + $0x180] ss:$8 sps:$4 sm:$0xff]   ;;  %v4418_v61 = vld [vmem:[%s5228_s21 + $0x190] ss:$8 sps:$4 sm:$0xff]  }
  0x8a   : > { %3138 = vmatprep.subr.bf16.mxu0 %v4310_v30  ;;  %v4381_v29 = vld [vmem:[%s5228_s21 + $0x724] ss:$8 sps:$4 sm:$0xff]   ;;  %v4376_v30 = vld [vmem:[%s5228_s21 + $0x120] ss:$8 sps:$4 sm:$0xff]   ;;  %v4421_v62 = vld [vmem:[%s5228_s21 + $0x790] ss:$8 sps:$4 sm:$0xff]  }
  0x8b   : > { %v4426_v63 = vld [vmem:[%s5228_s21 + $0x1a4] ss:$8 sps:$4 sm:$0xff]   ;;  %v4435_v4 = vld [vmem:[%s5228_s21 + $0x7b4] ss:$8 sps:$4 sm:$0xff]   ;;  %v4430_v5 = vld [vmem:[%s5228_s21 + $0x1b0] ss:$8 sps:$4 sm:$0xff]  }
  0x8c   : > { %2893 = vmatpush1.bf16.msra.mxu1 %v4312_v31  ;;  %v4379_v31 = vld [vmem:[%s5228_s21 + $0x720] ss:$8 sps:$4 sm:$0xff]   ;;  %vm3570_vm0 = vcmask (!%p4069_p6), 25600  }
  0x8d   : > { %3139 = vmatpush1.bf16.msra.mxu0 %v4313_v32  ;;  %2894 = vmatprep.subr.bf16.mxu1 %v4314_v33  ;;  %v4384_v32 = vld [vmem:[%s5228_s21 + $0x134] ss:$8 sps:$4 sm:$0xff]  }
  0x8e   : > { %3140 = vmatprep.subr.bf16.mxu0 %v4316_v34  ;;  %v4387_v33 = vld [vmem:[%s5228_s21 + $0x734] ss:$8 sps:$4 sm:$0xff]   ;;  %v4382_v34 = vld [vmem:[%s5228_s21 + $0x130] ss:$8 sps:$4 sm:$0xff]  }
  0x90   : > { %2895 = vmatpush1.bf16.msra.mxu1 %v4318_v35  ;;  %v4385_v35 = vld [vmem:[%s5228_s21 + $0x730] ss:$8 sps:$4 sm:$0xff]  }
  0x91   : > { %3141 = vmatpush1.bf16.msra.mxu0 %v4319_v36  ;;  %2896 = vmatprep.subr.bf16.mxu1 %v4320_v40  ;;  %v4390_v36 = vld [vmem:[%s5228_s21 + $0x144] ss:$8 sps:$4 sm:$0xff]   ;;  %v4396_v40 = vld [vmem:[%s5228_s21 + $0x154] ss:$8 sps:$4 sm:$0xff]  }
  0x92   : > { %3142 = vmatprep.subr.bf16.mxu0 %v4322_v41  ;;  %v4399_v41 = vld [vmem:[%s5228_s21 + $0x754] ss:$8 sps:$4 sm:$0xff]  }
  0x94   : > { %2897 = vmatpush1.bf16.msra.mxu1 %v4324_v42  ;;  %v4394_v42 = vld [vmem:[%s5228_s21 + $0x150] ss:$8 sps:$4 sm:$0xff]  }
  0x95   : > { %3143 = vmatpush1.bf16.msra.mxu0 %v4325_v45  ;;  %2898 = vmatprep.subr.bf16.mxu1 %v4326_v46  ;;  %v4402_v45 = vld [vmem:[%s5228_s21 + $0x164] ss:$8 sps:$4 sm:$0xff]  }
  0x96   : > { %3144 = vmatprep.subr.bf16.mxu0 %v4328_v47  ;;  %v4405_v46 = vld [vmem:[%s5228_s21 + $0x764] ss:$8 sps:$4 sm:$0xff]   ;;  %v4400_v47 = vld [vmem:[%s5228_s21 + $0x160] ss:$8 sps:$4 sm:$0xff]  }
  0x98   : > { %2899 = vmatpush1.bf16.msra.mxu1 %v4330_v48  ;;  %v4403_v48 = vld [vmem:[%s5228_s21 + $0x760] ss:$8 sps:$4 sm:$0xff]  }
  0x99   : > { %3145 = vmatpush1.bf16.msra.mxu0 %v4331_v49  ;;  %2900 = vmatprep.subr.bf16.mxu1 %v4332_v51  ;;  %v4408_v49 = vld [vmem:[%s5228_s21 + $0x174] ss:$8 sps:$4 sm:$0xff]  }
  0x9a   : > { %3146 = vmatprep.subr.bf16.mxu0 %v4334_v52  ;;  %v4411_v51 = vld [vmem:[%s5228_s21 + $0x774] ss:$8 sps:$4 sm:$0xff]   ;;  %v4406_v52 = vld [vmem:[%s5228_s21 + $0x170] ss:$8 sps:$4 sm:$0xff]  }
  0x9c   : > { %2901 = vmatpush1.bf16.msra.mxu1 %v4336_v54  ;;  %v4409_v54 = vld [vmem:[%s5228_s21 + $0x770] ss:$8 sps:$4 sm:$0xff]  }
  0x9d   : > { %3147 = vmatpush1.bf16.msra.mxu0 %v4337_v56  ;;  %2902 = vmatprep.subr.bf16.mxu1 %v4338_v58  ;;  %v4417_v56 = vld [vmem:[%s5228_s21 + $0x784] ss:$8 sps:$4 sm:$0xff]   ;;  %v4415_v58 = vld [vmem:[%s5228_s21 + $0x780] ss:$8 sps:$4 sm:$0xff]  }
  0x9e   : > { %3148 = vmatprep.subr.bf16.mxu0 %v4340_v59  ;;  %v4420_v59 = vld [vmem:[%s5228_s21 + $0x194] ss:$8 sps:$4 sm:$0xff]  }
  0xa0   : > { %2903 = vmatpush1.bf16.msra.mxu1 %v4342_v0  ;;  %v4429_v0 = vld [vmem:[%s5228_s21 + $0x7a4] ss:$8 sps:$4 sm:$0xff]  }
  0xa1   : > { %3149 = vmatpush1.bf16.msra.mxu0 %v4343_v1  ;;  %2904 = vmatprep.subr.bf16.mxu1 %v4344_v2  ;;  %v4424_v1 = vld [vmem:[%s5228_s21 + $0x1a0] ss:$8 sps:$4 sm:$0xff]  }
  0xa2   : > { %3150 = vmatprep.subr.bf16.mxu0 %v4346_v3  ;;  %v4427_v2 = vld [vmem:[%s5228_s21 + $0x7a0] ss:$8 sps:$4 sm:$0xff]   ;;  %v4432_v3 = vld [vmem:[%s5228_s21 + $0x1b4] ss:$8 sps:$4 sm:$0xff]  }
  0xa4   : > { %2905 = vmatpush1.bf16.msra.mxu1 %v4348_v6  ;;  %v4433_v6 = vld [vmem:[%s5228_s21 + $0x7b0] ss:$8 sps:$4 sm:$0xff]  }
  0xa5   : > { %3151 = vmatpush1.bf16.msra.mxu0 %v4349_v7  ;;  %2906 = vmatprep.subr.bf16.mxu1 %v4350_v8  ;;  %v4438_v7 = vld [vmem:[%s5228_s21 + $0x1c4] ss:$8 sps:$4 sm:$0xff]  }
  0xa6   : > { %3152 = vmatprep.subr.bf16.mxu0 %v4352_v9  ;;  %v4441_v8 = vld [vmem:[%s5228_s21 + $0x7c4] ss:$8 sps:$4 sm:$0xff]   ;;  %v4436_v9 = vld [vmem:[%s5228_s21 + $0x1c0] ss:$8 sps:$4 sm:$0xff]  }
  0xa8   : > { %2907 = vmatpush1.bf16.msra.mxu1 %v4354_v10  ;;  %v4439_v10 = vld [vmem:[%s5228_s21 + $0x7c0] ss:$8 sps:$4 sm:$0xff]  }
  0xa9   : > { %3153 = vmatpush1.bf16.msra.mxu0 %v4355_v11  ;;  %2908 = vmatprep.subr.bf16.mxu1 %v4356_v12  ;;  %v4444_v11 = vld [vmem:[%s5228_s21 + $0x1d4] ss:$8 sps:$4 sm:$0xff]  }
  0xaa   : > { %3154 = vmatprep.subr.bf16.mxu0 %v4358_v13  ;;  %v4447_v12 = vld [vmem:[%s5228_s21 + $0x7d4] ss:$8 sps:$4 sm:$0xff]   ;;  %v4442_v13 = vld [vmem:[%s5228_s21 + $0x1d0] ss:$8 sps:$4 sm:$0xff]  }
  0xac   : > { %2909 = vmatpush1.bf16.msra.mxu1 %v4360_v14  ;;  %v4445_v14 = vld [vmem:[%s5228_s21 + $0x7d0] ss:$8 sps:$4 sm:$0xff]  }
  0xad   : > { %3155 = vmatpush1.bf16.msra.mxu0 %v4361_v15  ;;  %2919 = vmatprep.subr.bf16.mxu1 %v4365_v16  ;;  %v4450_v15 = vld [vmem:[%s5228_s21 + $0x1e4] ss:$8 sps:$4 sm:$0xff]  }
  0xae   : > { %3165 = vmatprep.subr.bf16.mxu0 %v4369_v17  ;;  %v4453_v16 = vld [vmem:[%s5228_s21 + $0x7e4] ss:$8 sps:$4 sm:$0xff]   ;;  %v692_v17 = vcombine.high %v5298_v53, %v5298_v53  ;;  %v4457_v53 = vld [vmem:[%s5228_s21 + $0x7f0] ss:$8 sps:$4 sm:$0xff]  }
  0xaf   : > { %2911 = vmatmul.mubr.bf16.vlgmr.msra.gmra.mrb[0].mxu1 %v5327_v18 }
  0xb0   : > { %3157 = vmatmul.mubr.bf16.vlgmr.msra.gmra.mrb[0].mxu0 %v5330_v19  ;;  %2920 = vmatpush1.bf16.msra.mxu1 %v4363_v20  ;;  %v4448_v20 = vld [vmem:[%s5228_s21 + $0x1e0] ss:$8 sps:$4 sm:$0xff]  }
  0xb1   : > { %3166 = vmatpush1.bf16.msra.mxu0 %v4367_v21  ;;  %2921 = vmatprep.subr.bf16.mxu1 %v4372_v22  ;;  %v4451_v21 = vld [vmem:[%s5228_s21 + $0x7e0] ss:$8 sps:$4 sm:$0xff]   ;;  %v4456_v22 = vld [vmem:[%s5228_s21 + $0x1f4] ss:$8 sps:$4 sm:$0xff]  }
  0xb2   : > { %3167 = vmatprep.subr.bf16.mxu0 %v4375_v23  ;;  %2951 = vmatprep.mubr.bf16.mxu1 %v739_v24  ;;  %v4459_v23 = vld [vmem:[%s5228_s21 + $0x7f4] ss:$8 sps:$4 sm:$0xff]   ;;  %v5397_v24 = vrot.slane %v692_v17, %v5293_v50  ;;  %v4526_v17 = vld [vmem:[%s5228_s21 + $0x2b0] ss:$8 sps:$4 sm:$0xff]  }
  0xb3   : > { %3197 = vmatprep.mubr.bf16.mxu0 %v789_v25  ;;  %v4454_v25 = vld [vmem:[%s5228_s21 + $0x1f0] ss:$8 sps:$4 sm:$0xff]  }
  0xb4   : > { %2922 = vmatpush1.bf16.msra.mxu1 %v4370_v26  ;;  %v4462_v26 = vld [vmem:[%s5228_s21 + $0x204] ss:$8 sps:$4 sm:$0xff]  }
  0xb5   : > { %3168 = vmatpush1.bf16.msra.mxu0 %v4373_v27  ;;  %2923 = vmatprep.subr.bf16.mxu1 %v4378_v28  ;;  %v4465_v27 = vld [vmem:[%s5228_s21 + $0x804] ss:$8 sps:$4 sm:$0xff]   ;;  %v708_v28 = vcombine.high %v5397_v24, %v5397_v24 }
  0xb6   : > { %3169 = vmatprep.subr.bf16.mxu0 %v4381_v29  ;;  %v737_v29 = vcombine.high %v5327_v18, %v5327_v18  ;;  %v4466_v18 = vld [vmem:[%s5228_s21 + $0x210] ss:$8 sps:$4 sm:$0xff]  }
  0xb8   : > { %2924 = vmatpush1.bf16.msra.mxu1 %v4376_v30  ;;  %v787_v30 = vcombine.high %v5330_v19, %v5330_v19 }
  0xb9   : > { %3170 = vmatpush1.bf16.msra.mxu0 %v4379_v31  ;;  %2925 = vmatprep.subr.bf16.mxu1 %v4384_v32  ;;  %v4460_v31 = vld [vmem:[%s5228_s21 + $0x200] ss:$8 sps:$4 sm:$0xff]  }
  0xba   : > { %3171 = vmatprep.subr.bf16.mxu0 %v4387_v33  ;;  %v4463_v32 = vld [vmem:[%s5228_s21 + $0x800] ss:$8 sps:$4 sm:$0xff]   ;;  %v4468_v33 = vld [vmem:[%s5228_s21 + $0x214] ss:$8 sps:$4 sm:$0xff]  }
  0xbc   : > { %2926 = vmatpush1.bf16.msra.mxu1 %v4382_v34  ;;  %v4471_v34 = vld [vmem:[%s5228_s21 + $0x814] ss:$8 sps:$4 sm:$0xff]  }
  0xbd   : > { %3172 = vmatpush1.bf16.msra.mxu0 %v4385_v35  ;;  %2927 = vmatprep.subr.bf16.mxu1 %v4390_v36  ;;  %v5414_v35 = vrot.slane %v708_v28, %v5293_v50  ;;  %v5417_v36 = vld [vmem:[%s5242_s13 + $0x10] sm:$0xff] }
  0xbe   : > { %3173 = vmatprep.subr.bf16.mxu0 %v4393_v37  ;;  %v5422_v19 = vrot.slane %v5417_v36, %v5293_v50  ;;  %v4469_v37 = vld [vmem:[%s5228_s21 + $0x810] ss:$8 sps:$4 sm:$0xff]  }
  0xbf   : > { %v4541_v28 = vld [vmem:[%s5228_s21 + $0x8d0] ss:$8 sps:$4 sm:$0xff]  }
  0xc0   : > { %2928 = vmatpush1.bf16.msra.mxu1 %v4388_v38  ;;  %v4474_v38 = vld [vmem:[%s5228_s21 + $0x224] ss:$8 sps:$4 sm:$0xff]  }
  0xc1   : > { %3174 = vmatpush1.bf16.msra.mxu0 %v4391_v39  ;;  %2929 = vmatprep.subr.bf16.mxu1 %v4396_v40  ;;  %v4477_v39 = vld [vmem:[%s5228_s21 + $0x824] ss:$8 sps:$4 sm:$0xff]   ;;  %v805_v40 = vcombine.high %v5422_v19, %v5422_v19 }
  0xc2   : > { %3175 = vmatprep.subr.bf16.mxu0 %v4399_v41  ;;  %v4472_v41 = vld [vmem:[%s5228_s21 + $0x220] ss:$8 sps:$4 sm:$0xff]  }
  0xc4   : > { %2930 = vmatpush1.bf16.msra.mxu1 %v4394_v42  ;;  %v5432_v42 = vrot.slane %v805_v40, %v5293_v50  ;;  %v4556_v40 = vld [vmem:[%s5228_s21 + $0x300] ss:$8 sps:$4 sm:$0xff]  }
  0xc5   : > { %3176 = vmatpush1.bf16.msra.mxu0 %v4397_v43  ;;  %2931 = vmatprep.subr.bf16.mxu1 %v4402_v45  ;;  %v4475_v43 = vld [vmem:[%s5228_s21 + $0x820] ss:$8 sps:$4 sm:$0xff]   ;;  %v4480_v45 = vld [vmem:[%s5228_s21 + $0x234] ss:$8 sps:$4 sm:$0xff]  }
  0xc6   : > { %3177 = vmatprep.subr.bf16.mxu0 %v4405_v46  ;;  %v4483_v46 = vld [vmem:[%s5228_s21 + $0x834] ss:$8 sps:$4 sm:$0xff]  }
  0xc8   : > { %2932 = vmatpush1.bf16.msra.mxu1 %v4400_v47  ;;  %v4478_v47 = vld [vmem:[%s5228_s21 + $0x230] ss:$8 sps:$4 sm:$0xff]  }
  0xc9   : > { %3178 = vmatpush1.bf16.msra.mxu0 %v4403_v48  ;;  %2933 = vmatprep.subr.bf16.mxu1 %v4408_v49  ;;  %v4481_v48 = vld [vmem:[%s5228_s21 + $0x830] ss:$8 sps:$4 sm:$0xff]   ;;  %v4486_v49 = vld [vmem:[%s5228_s21 + $0x244] ss:$8 sps:$4 sm:$0xff]  }
  0xca   : > { %3179 = vmatprep.subr.bf16.mxu0 %v4411_v51  ;;  %v4489_v51 = vld [vmem:[%s5228_s21 + $0x844] ss:$8 sps:$4 sm:$0xff]  }
  0xcc   : > { %2934 = vmatpush1.bf16.msra.mxu1 %v4406_v52  ;;  %v4484_v52 = vld [vmem:[%s5228_s21 + $0x240] ss:$8 sps:$4 sm:$0xff]  }
  0xcd   : > { %3180 = vmatpush1.bf16.msra.mxu0 %v4409_v54  ;;  %2935 = vmatprep.subr.bf16.mxu1 %v4414_v55  ;;  %v4487_v54 = vld [vmem:[%s5228_s21 + $0x840] ss:$8 sps:$4 sm:$0xff]   ;;  %v4492_v55 = vld [vmem:[%s5228_s21 + $0x254] ss:$8 sps:$4 sm:$0xff]  }
  0xce   : > { %3181 = vmatprep.subr.bf16.mxu0 %v4417_v56  ;;  %v4495_v56 = vld [vmem:[%s5228_s21 + $0x854] ss:$8 sps:$4 sm:$0xff]  }
  0xd0   : > { %2936 = vmatpush1.bf16.msra.mxu1 %v4412_v57  ;;  %v4490_v57 = vld [vmem:[%s5228_s21 + $0x250] ss:$8 sps:$4 sm:$0xff]  }
  0xd1   : > { %3182 = vmatpush1.bf16.msra.mxu0 %v4415_v58  ;;  %2937 = vmatprep.subr.bf16.mxu1 %v4420_v59  ;;  %v4493_v58 = vld [vmem:[%s5228_s21 + $0x850] ss:$8 sps:$4 sm:$0xff]   ;;  %v4498_v59 = vld [vmem:[%s5228_s21 + $0x264] ss:$8 sps:$4 sm:$0xff]  }
  0xd2   : > { %3183 = vmatprep.subr.bf16.mxu0 %v4423_v60  ;;  %v4501_v60 = vld [vmem:[%s5228_s21 + $0x864] ss:$8 sps:$4 sm:$0xff]  }
  0xd4   : > { %2938 = vmatpush1.bf16.msra.mxu1 %v4418_v61  ;;  %v4496_v61 = vld [vmem:[%s5228_s21 + $0x260] ss:$8 sps:$4 sm:$0xff]  }
  0xd5   : > { %3184 = vmatpush1.bf16.msra.mxu0 %v4421_v62  ;;  %2939 = vmatprep.subr.bf16.mxu1 %v4426_v63  ;;  %v4499_v62 = vld [vmem:[%s5228_s21 + $0x860] ss:$8 sps:$4 sm:$0xff]   ;;  %v4504_v63 = vld [vmem:[%s5228_s21 + $0x274] ss:$8 sps:$4 sm:$0xff]  }
  0xd6   : > { %3185 = vmatprep.subr.bf16.mxu0 %v4429_v0  ;;  %v4507_v0 = vld [vmem:[%s5228_s21 + $0x874] ss:$8 sps:$4 sm:$0xff]  }
  0xd8   : > { %2940 = vmatpush1.bf16.msra.mxu1 %v4424_v1  ;;  %v4502_v1 = vld [vmem:[%s5228_s21 + $0x270] ss:$8 sps:$4 sm:$0xff]  }
  0xd9   : > { %3186 = vmatpush1.bf16.msra.mxu0 %v4427_v2  ;;  %2941 = vmatprep.subr.bf16.mxu1 %v4432_v3  ;;  %v4505_v2 = vld [vmem:[%s5228_s21 + $0x870] ss:$8 sps:$4 sm:$0xff]   ;;  %v4510_v3 = vld [vmem:[%s5228_s21 + $0x284] ss:$8 sps:$4 sm:$0xff]  }
  0xda   : > { %3187 = vmatprep.subr.bf16.mxu0 %v4435_v4  ;;  %v4513_v4 = vld [vmem:[%s5228_s21 + $0x884] ss:$8 sps:$4 sm:$0xff]  }
  0xdc   : > { %2942 = vmatpush1.bf16.msra.mxu1 %v4430_v5  ;;  %v4508_v5 = vld [vmem:[%s5228_s21 + $0x280] ss:$8 sps:$4 sm:$0xff]  }
  0xdd   : > { %3188 = vmatpush1.bf16.msra.mxu0 %v4433_v6  ;;  %2943 = vmatprep.subr.bf16.mxu1 %v4438_v7  ;;  %v4511_v6 = vld [vmem:[%s5228_s21 + $0x880] ss:$8 sps:$4 sm:$0xff]   ;;  %v4516_v7 = vld [vmem:[%s5228_s21 + $0x294] ss:$8 sps:$4 sm:$0xff]  }
  0xde   : > { %3189 = vmatprep.subr.bf16.mxu0 %v4441_v8  ;;  %v4519_v8 = vld [vmem:[%s5228_s21 + $0x894] ss:$8 sps:$4 sm:$0xff]  }
  0xe0   : > { %2944 = vmatpush1.bf16.msra.mxu1 %v4436_v9  ;;  %v4514_v9 = vld [vmem:[%s5228_s21 + $0x290] ss:$8 sps:$4 sm:$0xff]  }
  0xe1   : > { %3190 = vmatpush1.bf16.msra.mxu0 %v4439_v10  ;;  %2945 = vmatprep.subr.bf16.mxu1 %v4444_v11  ;;  %v4517_v10 = vld [vmem:[%s5228_s21 + $0x890] ss:$8 sps:$4 sm:$0xff]   ;;  %v4522_v11 = vld [vmem:[%s5228_s21 + $0x2a4] ss:$8 sps:$4 sm:$0xff]  }
  0xe2   : > { %3191 = vmatprep.subr.bf16.mxu0 %v4447_v12  ;;  %v4525_v12 = vld [vmem:[%s5228_s21 + $0x8a4] ss:$8 sps:$4 sm:$0xff]  }
  0xe4   : > { %2946 = vmatpush1.bf16.msra.mxu1 %v4442_v13  ;;  %v4520_v13 = vld [vmem:[%s5228_s21 + $0x2a0] ss:$8 sps:$4 sm:$0xff]  }
  0xe5   : > { %3192 = vmatpush1.bf16.msra.mxu0 %v4445_v14  ;;  %2947 = vmatprep.subr.bf16.mxu1 %v4450_v15  ;;  %v4523_v14 = vld [vmem:[%s5228_s21 + $0x8a0] ss:$8 sps:$4 sm:$0xff]   ;;  %v4528_v15 = vld [vmem:[%s5228_s21 + $0x2b4] ss:$8 sps:$4 sm:$0xff]  }
  0xe6   : > { %3193 = vmatprep.subr.bf16.mxu0 %v4453_v16  ;;  %v4531_v16 = vld [vmem:[%s5228_s21 + $0x8b4] ss:$8 sps:$4 sm:$0xff]  }
  0xe8   : > { %2948 = vmatpush1.bf16.msra.mxu1 %v4448_v20  ;;  %v4529_v20 = vld [vmem:[%s5228_s21 + $0x8b0] ss:$8 sps:$4 sm:$0xff]  }
  0xe9   : > { %3194 = vmatpush1.bf16.msra.mxu0 %v4451_v21  ;;  %2949 = vmatprep.subr.bf16.mxu1 %v4456_v22  ;;  %v4534_v21 = vld [vmem:[%s5228_s21 + $0x2c4] ss:$8 sps:$4 sm:$0xff]  }
  0xea   : > { %3195 = vmatprep.subr.bf16.mxu0 %v4459_v23  ;;  %v4537_v22 = vld [vmem:[%s5228_s21 + $0x8c4] ss:$8 sps:$4 sm:$0xff]   ;;  %v4532_v23 = vld [vmem:[%s5228_s21 + $0x2c0] ss:$8 sps:$4 sm:$0xff]  }
  0xec   : > { %2950 = vmatpush1.bf16.msra.mxu1 %v4454_v25  ;;  %v4535_v25 = vld [vmem:[%s5228_s21 + $0x8c0] ss:$8 sps:$4 sm:$0xff]  }
  0xed   : > { %3196 = vmatpush1.bf16.msra.mxu0 %v4457_v53  ;;  %2960 = vmatprep.subr.bf16.mxu1 %v4462_v26  ;;  %v4540_v53 = vld [vmem:[%s5228_s21 + $0x2d4] ss:$8 sps:$4 sm:$0xff]  }
  0xee   : > { %3206 = vmatprep.subr.bf16.mxu0 %v4465_v27  ;;  %v4543_v26 = vld [vmem:[%s5228_s21 + $0x8d4] ss:$8 sps:$4 sm:$0xff]   ;;  %v4538_v27 = vld [vmem:[%s5228_s21 + $0x2d0] ss:$8 sps:$4 sm:$0xff]  }
  0xef   : > { %2952 = vmatmul.mubr.bf16.vlgmr.msra.gmra.mrb[0].mxu1 %v737_v29  ;;  %v4546_v29 = vld [vmem:[%s5228_s21 + $0x2e4] ss:$8 sps:$4 sm:$0xff]  }
  0xf0   : > { %3198 = vmatmul.mubr.bf16.vlgmr.msra.gmra.mrb[0].mxu0 %v787_v30  ;;  %2961 = vmatpush1.bf16.msra.mxu1 %v4460_v31  ;;  %v4549_v30 = vld [vmem:[%s5228_s21 + $0x8e4] ss:$8 sps:$4 sm:$0xff]   ;;  %v4544_v31 = vld [vmem:[%s5228_s21 + $0x2e0] ss:$8 sps:$4 sm:$0xff]  }
  0xf1   : > { %3207 = vmatpush1.bf16.msra.mxu0 %v4463_v32  ;;  %2962 = vmatprep.subr.bf16.mxu1 %v4468_v33  ;;  %v4547_v32 = vld [vmem:[%s5228_s21 + $0x8e0] ss:$8 sps:$4 sm:$0xff]   ;;  %v4552_v33 = vld [vmem:[%s5228_s21 + $0x2f4] ss:$8 sps:$4 sm:$0xff]  }
  0xf2   : > { %3208 = vmatprep.subr.bf16.mxu0 %v4471_v34  ;;  %2992 = vmatprep.mubr.bf16.mxu1 %v5414_v35  ;;  %v4555_v34 = vld [vmem:[%s5228_s21 + $0x8f4] ss:$8 sps:$4 sm:$0xff]  }
  0xf3   : > { %3238 = vmatprep.mubr.bf16.mxu0 %v5432_v42 }
  0xf4   : > { %2963 = vmatpush1.bf16.msra.mxu1 %v4466_v18  ;;  %v4550_v18 = vld [vmem:[%s5228_s21 + $0x2f0] ss:$8 sps:$4 sm:$0xff]  }
  0xf5   : > { %3209 = vmatpush1.bf16.msra.mxu0 %v4469_v37  ;;  %2964 = vmatprep.subr.bf16.mxu1 %v4474_v38  ;;  %v4553_v37 = vld [vmem:[%s5228_s21 + $0x8f0] ss:$8 sps:$4 sm:$0xff]   ;;  %v4558_v38 = vld [vmem:[%s5228_s21 + $0x304] ss:$8 sps:$4 sm:$0xff]  }
  0xf6   : > { %3210 = vmatprep.subr.bf16.mxu0 %v4477_v39  ;;  %v4561_v39 = vld [vmem:[%s5228_s21 + $0x904] ss:$8 sps:$4 sm:$0xff]  }
  0xf8   : > { %2965 = vmatpush1.bf16.msra.mxu1 %v4472_v41  ;;  %v5493_v41 = vrot.slane %v5397_v24, %v5293_v50  ;;  %v837_v24 = vcombine.high %v5432_v42, %v5432_v42  ;;  %v4568_v42 = vld [vmem:[%s5228_s21 + $0x320] ss:$8 sps:$4 sm:$0xff]  }
  0xf9   : > { %3211 = vmatpush1.bf16.msra.mxu0 %v4475_v43  ;;  %2966 = vmatprep.subr.bf16.mxu1 %v4480_v45  ;;  %v5497_v43 = vrot.slane %v5422_v19, %v5293_v50  ;;  %v4559_v45 = vld [vmem:[%s5228_s21 + $0x900] ss:$8 sps:$4 sm:$0xff]   ;;  %v4562_v19 = vld [vmem:[%s5228_s21 + $0x310] ss:$8 sps:$4 sm:$0xff]  }
  0xfa   : > { %3212 = vmatprep.subr.bf16.mxu0 %v4483_v46  ;;  %v4564_v46 = vld [vmem:[%s5228_s21 + $0x314] ss:$8 sps:$4 sm:$0xff]  }
  0xfc   : > { %2967 = vmatpush1.bf16.msra.mxu1 %v4478_v47  ;;  %v4567_v47 = vld [vmem:[%s5228_s21 + $0x914] ss:$8 sps:$4 sm:$0xff]  }
  0xfd   : > { %3213 = vmatpush1.bf16.msra.mxu0 %v4481_v48  ;;  %2968 = vmatprep.subr.bf16.mxu1 %v4486_v49  ;;  %v740_v48 = vcombine.high %v5414_v35, %v5414_v35  ;;  %v4565_v49 = vld [vmem:[%s5228_s21 + $0x910] ss:$8 sps:$4 sm:$0xff]   ;;  %v4573_v35 = vld [vmem:[%s5228_s21 + $0x924] ss:$8 sps:$4 sm:$0xff]  }
  0xfe   : > { %3214 = vmatprep.subr.bf16.mxu0 %v4489_v51  ;;  %v4570_v51 = vld [vmem:[%s5228_s21 + $0x324] ss:$8 sps:$4 sm:$0xff]  }
 0x100   : > { %2969 = vmatpush1.bf16.msra.mxu1 %v4484_v52  ;;  %v4571_v52 = vld [vmem:[%s5228_s21 + $0x920] ss:$8 sps:$4 sm:$0xff]  }
 0x101   : > { %3215 = vmatpush1.bf16.msra.mxu0 %v4487_v54  ;;  %2970 = vmatprep.subr.bf16.mxu1 %v4492_v55  ;;  %v4576_v54 = vld [vmem:[%s5228_s21 + $0x334] ss:$8 sps:$4 sm:$0xff]  }
 0x102   : > { %3216 = vmatprep.subr.bf16.mxu0 %v4495_v56  ;;  %v4579_v55 = vld [vmem:[%s5228_s21 + $0x934] ss:$8 sps:$4 sm:$0xff]   ;;  %v4574_v56 = vld [vmem:[%s5228_s21 + $0x330] ss:$8 sps:$4 sm:$0xff]  }
 0x104   : > { %2971 = vmatpush1.bf16.msra.mxu1 %v4490_v57  ;;  %v4577_v57 = vld [vmem:[%s5228_s21 + $0x930] ss:$8 sps:$4 sm:$0xff]  }
 0x105   : > { %3217 = vmatpush1.bf16.msra.mxu0 %v4493_v58  ;;  %2972 = vmatprep.subr.bf16.mxu1 %v4498_v59  ;;  %v4582_v58 = vld [vmem:[%s5228_s21 + $0x344] ss:$8 sps:$4 sm:$0xff]  }
 0x106   : > { %3218 = vmatprep.subr.bf16.mxu0 %v4501_v60  ;;  %v4585_v59 = vld [vmem:[%s5228_s21 + $0x944] ss:$8 sps:$4 sm:$0xff]   ;;  %v4580_v60 = vld [vmem:[%s5228_s21 + $0x340] ss:$8 sps:$4 sm:$0xff]  }
 0x108   : > { %2973 = vmatpush1.bf16.msra.mxu1 %v4496_v61  ;;  %v4583_v61 = vld [vmem:[%s5228_s21 + $0x940] ss:$8 sps:$4 sm:$0xff]  }
 0x109   : > { %3219 = vmatpush1.bf16.msra.mxu0 %v4499_v62  ;;  %2974 = vmatprep.subr.bf16.mxu1 %v4504_v63  ;;  %v4588_v62 = vld [vmem:[%s5228_s21 + $0x354] ss:$8 sps:$4 sm:$0xff]  }
 0x10a   : > { %3220 = vmatprep.subr.bf16.mxu0 %v4507_v0  ;;  %v4591_v63 = vld [vmem:[%s5228_s21 + $0x954] ss:$8 sps:$4 sm:$0xff]   ;;  %v4586_v0 = vld [vmem:[%s5228_s21 + $0x350] ss:$8 sps:$4 sm:$0xff]  }
 0x10c   : > { %2975 = vmatpush1.bf16.msra.mxu1 %v4502_v1  ;;  %v4589_v1 = vld [vmem:[%s5228_s21 + $0x950] ss:$8 sps:$4 sm:$0xff]  }
 0x10d   : > { %3221 = vmatpush1.bf16.msra.mxu0 %v4505_v2  ;;  %2976 = vmatprep.subr.bf16.mxu1 %v4510_v3  ;;  %v4594_v2 = vld [vmem:[%s5228_s21 + $0x364] ss:$8 sps:$4 sm:$0xff]  }
 0x10e   : > { %3222 = vmatprep.subr.bf16.mxu0 %v4513_v4  ;;  %v4597_v3 = vld [vmem:[%s5228_s21 + $0x964] ss:$8 sps:$4 sm:$0xff]   ;;  %v4592_v4 = vld [vmem:[%s5228_s21 + $0x360] ss:$8 sps:$4 sm:$0xff]  }
 0x110   : > { %2977 = vmatpush1.bf16.msra.mxu1 %v4508_v5  ;;  %v4595_v5 = vld [vmem:[%s5228_s21 + $0x960] ss:$8 sps:$4 sm:$0xff]  }
 0x111   : > { %3223 = vmatpush1.bf16.msra.mxu0 %v4511_v6  ;;  %2978 = vmatprep.subr.bf16.mxu1 %v4516_v7  ;;  %v4600_v6 = vld [vmem:[%s5228_s21 + $0x374] ss:$8 sps:$4 sm:$0xff]  }
 0x112   : > { %3224 = vmatprep.subr.bf16.mxu0 %v4519_v8  ;;  %v4603_v7 = vld [vmem:[%s5228_s21 + $0x974] ss:$8 sps:$4 sm:$0xff]   ;;  %v4598_v8 = vld [vmem:[%s5228_s21 + $0x370] ss:$8 sps:$4 sm:$0xff]  }
 0x114   : > { %2979 = vmatpush1.bf16.msra.mxu1 %v4514_v9  ;;  %v4601_v9 = vld [vmem:[%s5228_s21 + $0x970] ss:$8 sps:$4 sm:$0xff]  }
 0x115   : > { %3225 = vmatpush1.bf16.msra.mxu0 %v4517_v10  ;;  %2980 = vmatprep.subr.bf16.mxu1 %v4522_v11  ;;  %v4606_v10 = vld [vmem:[%s5228_s21 + $0x384] ss:$8 sps:$4 sm:$0xff]  }
 0x116   : > { %3226 = vmatprep.subr.bf16.mxu0 %v4525_v12  ;;  %v4609_v11 = vld [vmem:[%s5228_s21 + $0x984] ss:$8 sps:$4 sm:$0xff]   ;;  %v4604_v12 = vld [vmem:[%s5228_s21 + $0x380] ss:$8 sps:$4 sm:$0xff]  }
 0x118   : > { %2981 = vmatpush1.bf16.msra.mxu1 %v4520_v13  ;;  %v4607_v13 = vld [vmem:[%s5228_s21 + $0x980] ss:$8 sps:$4 sm:$0xff]  }
 0x119   : > { %3227 = vmatpush1.bf16.msra.mxu0 %v4523_v14  ;;  %2982 = vmatprep.subr.bf16.mxu1 %v4528_v15  ;;  %v4612_v14 = vld [vmem:[%s5228_s21 + $0x394] ss:$8 sps:$4 sm:$0xff]  }
 0x11a   : > { %3228 = vmatprep.subr.bf16.mxu0 %v4531_v16  ;;  %v4615_v15 = vld [vmem:[%s5228_s21 + $0x994] ss:$8 sps:$4 sm:$0xff]   ;;  %v4610_v16 = vld [vmem:[%s5228_s21 + $0x390] ss:$8 sps:$4 sm:$0xff]  }
 0x11c   : > { %2983 = vmatpush1.bf16.msra.mxu1 %v4526_v17  ;;  %v4613_v17 = vld [vmem:[%s5228_s21 + $0x990] ss:$8 sps:$4 sm:$0xff]  }
 0x11d   : > { %3229 = vmatpush1.bf16.msra.mxu0 %v4529_v20  ;;  %2984 = vmatprep.subr.bf16.mxu1 %v4534_v21  ;;  %v4618_v20 = vld [vmem:[%s5228_s21 + $0x3a4] ss:$8 sps:$4 sm:$0xff]  }
 0x11e   : > { %3230 = vmatprep.subr.bf16.mxu0 %v4537_v22  ;;  %v4621_v21 = vld [vmem:[%s5228_s21 + $0x9a4] ss:$8 sps:$4 sm:$0xff]   ;;  %v4616_v22 = vld [vmem:[%s5228_s21 + $0x3a0] ss:$8 sps:$4 sm:$0xff]  }
 0x120   : > { %2985 = vmatpush1.bf16.msra.mxu1 %v4532_v23  ;;  %v4619_v23 = vld [vmem:[%s5228_s21 + $0x9a0] ss:$8 sps:$4 sm:$0xff]  }
 0x121   : > { %3231 = vmatpush1.bf16.msra.mxu0 %v4535_v25  ;;  %2986 = vmatprep.subr.bf16.mxu1 %v4540_v53  ;;  %v4624_v25 = vld [vmem:[%s5228_s21 + $0x3b4] ss:$8 sps:$4 sm:$0xff]  }
 0x122   : > { %3232 = vmatprep.subr.bf16.mxu0 %v4543_v26  ;;  %v4627_v53 = vld [vmem:[%s5228_s21 + $0x9b4] ss:$8 sps:$4 sm:$0xff]   ;;  %v4622_v26 = vld [vmem:[%s5228_s21 + $0x3b0] ss:$8 sps:$4 sm:$0xff]  }
 0x124   : > { %2987 = vmatpush1.bf16.msra.mxu1 %v4538_v27  ;;  %v4625_v27 = vld [vmem:[%s5228_s21 + $0x9b0] ss:$8 sps:$4 sm:$0xff]  }
 0x125   : > { %3233 = vmatpush1.bf16.msra.mxu0 %v4541_v28  ;;  %2988 = vmatprep.subr.bf16.mxu1 %v4546_v29  ;;  %v4630_v28 = vld [vmem:[%s5228_s21 + $0x3c4] ss:$8 sps:$4 sm:$0xff]  }
 0x126   : > { %3234 = vmatprep.subr.bf16.mxu0 %v4549_v30  ;;  %v4633_v29 = vld [vmem:[%s5228_s21 + $0x9c4] ss:$8 sps:$4 sm:$0xff]   ;;  %v4628_v30 = vld [vmem:[%s5228_s21 + $0x3c0] ss:$8 sps:$4 sm:$0xff]  }
 0x128   : > { %2989 = vmatpush1.bf16.msra.mxu1 %v4544_v31  ;;  %v4631_v31 = vld [vmem:[%s5228_s21 + $0x9c0] ss:$8 sps:$4 sm:$0xff]  }
 0x129   : > { %3235 = vmatpush1.bf16.msra.mxu0 %v4547_v32  ;;  %2990 = vmatprep.subr.bf16.mxu1 %v4552_v33  ;;  %v4636_v32 = vld [vmem:[%s5228_s21 + $0x3d4] ss:$8 sps:$4 sm:$0xff]  }
 0x12a   : > { %3236 = vmatprep.subr.bf16.mxu0 %v4555_v34  ;;  %v4639_v33 = vld [vmem:[%s5228_s21 + $0x9d4] ss:$8 sps:$4 sm:$0xff]   ;;  %v4634_v34 = vld [vmem:[%s5228_s21 + $0x3d0] ss:$8 sps:$4 sm:$0xff]  }
 0x12c   : > { %2991 = vmatpush1.bf16.msra.mxu1 %v4550_v18  ;;  %v4637_v18 = vld [vmem:[%s5228_s21 + $0x9d0] ss:$8 sps:$4 sm:$0xff]  }
 0x12d   : > { %3237 = vmatpush1.bf16.msra.mxu0 %v4553_v37  ;;  %3001 = vmatprep.subr.bf16.mxu1 %v4558_v38  ;;  %v4642_v37 = vld [vmem:[%s5228_s21 + $0x3e4] ss:$8 sps:$4 sm:$0xff]  }
 0x12e   : > { %3247 = vmatprep.subr.bf16.mxu0 %v4561_v39  ;;  %v4645_v38 = vld [vmem:[%s5228_s21 + $0x9e4] ss:$8 sps:$4 sm:$0xff]   ;;  %v790_v39 = vcombine.high %v5417_v36, %v5417_v36  ;;  %v4649_v36 = vld [vmem:[%s5228_s21 + $0x9f0] ss:$8 sps:$4 sm:$0xff]  }
 0x12f   : > { %2993 = vmatmul.mubr.bf16.vlgmr.msra.gmra.mrb[0].mxu1 %v5493_v41 }
 0x130   : > { %3239 = vmatmul.mubr.bf16.vlgmr.msra.gmra.mrb[0].mxu0 %v5497_v43  ;;  %3002 = vmatpush1.bf16.msra.mxu1 %v4556_v40  ;;  %v4640_v40 = vld [vmem:[%s5228_s21 + $0x3e0] ss:$8 sps:$4 sm:$0xff]  }
 0x131   : > { %3248 = vmatpush1.bf16.msra.mxu0 %v4559_v45  ;;  %3003 = vmatprep.subr.bf16.mxu1 %v4564_v46  ;;  %v4643_v45 = vld [vmem:[%s5228_s21 + $0x9e0] ss:$8 sps:$4 sm:$0xff]   ;;  %v4648_v46 = vld [vmem:[%s5228_s21 + $0x3f4] ss:$8 sps:$4 sm:$0xff]  }
 0x132   : > { %3249 = vmatprep.subr.bf16.mxu0 %v4567_v47  ;;  %3033 = vmatprep.mubr.bf16.mxu1 %v740_v48  ;;  %v4651_v47 = vld [vmem:[%s5228_s21 + $0x9f4] ss:$8 sps:$4 sm:$0xff]   ;;  %v5567_v48 = vld.sshfl [vmem:[%s5242_s13 + $0x8] sm:$0xff pattern:$0x75316420] }
 0x133   : > { %3279 = vmatprep.mubr.bf16.mxu0 %v837_v24  ;;  %v5570_v24 = vrot.slane %v790_v39, %v5293_v50  ;;  %v4721_v39 = vld [vmem:[%s5228_s21 + $0xab0] ss:$8 sps:$4 sm:$0xff]  }
 0x134   : > { %3004 = vmatpush1.bf16.msra.mxu1 %v4562_v19  ;;  %v4646_v19 = vld [vmem:[%s5228_s21 + $0x3f0] ss:$8 sps:$4 sm:$0xff]  }
 0x135   : > { %3250 = vmatpush1.bf16.msra.mxu0 %v4565_v49  ;;  %3005 = vmatprep.subr.bf16.mxu1 %v4570_v51  ;;  %v4654_v49 = vld [vmem:[%s5228_s21 + $0x404] ss:$8 sps:$4 sm:$0xff]  }
 0x136   : > { %3251 = vmatprep.subr.bf16.mxu0 %v4573_v35  ;;  %v4657_v51 = vld [vmem:[%s5228_s21 + $0xa04] ss:$8 sps:$4 sm:$0xff]   ;;  %v756_v35 = vcombine.high %v5567_v48, %v5567_v48 }
 0x138   : > { %3006 = vmatpush1.bf16.msra.mxu1 %v4568_v42  ;;  %v806_v42 = vcombine.high %v5570_v24, %v5570_v24 }
 0x139   : > { %3252 = vmatpush1.bf16.msra.mxu0 %v4571_v52  ;;  %3007 = vmatprep.subr.bf16.mxu1 %v4576_v54  ;;  %v4652_v52 = vld [vmem:[%s5228_s21 + $0x400] ss:$8 sps:$4 sm:$0xff]   ;;  %v738_v54 = vcombine.high %v5493_v41, %v5493_v41 }
 0x13a   : > { %3253 = vmatprep.subr.bf16.mxu0 %v4579_v55  ;;  %v835_v55 = vcombine.high %v5497_v43, %v5497_v43  ;;  %v5594_v41 = vrot.slane %v806_v42, %v5293_v50  ;;  %v4666_v43 = vld [vmem:[%s5228_s21 + $0x424] ss:$8 sps:$4 sm:$0xff]  }
 0x13b   : > { %v4741_v42 = vld [vmem:[%s5228_s21 + $0xae4] ss:$8 sps:$4 sm:$0xff]  }
 0x13c   : > { %3008 = vmatpush1.bf16.msra.mxu1 %v4574_v56  ;;  %v4655_v56 = vld [vmem:[%s5228_s21 + $0xa00] ss:$8 sps:$4 sm:$0xff]  }
 0x13d   : > { %3254 = vmatpush1.bf16.msra.mxu0 %v4577_v57  ;;  %3009 = vmatprep.subr.bf16.mxu1 %v4582_v58  ;;  %v4660_v57 = vld [vmem:[%s5228_s21 + $0x414] ss:$8 sps:$4 sm:$0xff]  }
 0x13e   : > { %3255 = vmatprep.subr.bf16.mxu0 %v4585_v59  ;;  %v4663_v58 = vld [vmem:[%s5228_s21 + $0xa14] ss:$8 sps:$4 sm:$0xff]   ;;  %v4658_v59 = vld [vmem:[%s5228_s21 + $0x410] ss:$8 sps:$4 sm:$0xff]  }
 0x140   : > { %3010 = vmatpush1.bf16.msra.mxu1 %v4580_v60  ;;  %v4661_v60 = vld [vmem:[%s5228_s21 + $0xa10] ss:$8 sps:$4 sm:$0xff]  }
 0x141   : > { %3256 = vmatpush1.bf16.msra.mxu0 %v4583_v61  ;;  %3011 = vmatprep.subr.bf16.mxu1 %v4588_v62  ;;  %v5591_v61 = vrot.slane %v756_v35, %v5293_v50  ;;  %v4669_v62 = vld [vmem:[%s5228_s21 + $0xa24] ss:$8 sps:$4 sm:$0xff]  }
 0x142   : > { %3257 = vmatprep.subr.bf16.mxu0 %v4591_v63  ;;  %v4664_v63 = vld [vmem:[%s5228_s21 + $0x420] ss:$8 sps:$4 sm:$0xff]   ;;  %v4738_v35 = vld [vmem:[%s5228_s21 + $0x4e4] ss:$8 sps:$4 sm:$0xff]  }
 0x144   : > { %3012 = vmatpush1.bf16.msra.mxu1 %v4586_v0  ;;  %v4667_v0 = vld [vmem:[%s5228_s21 + $0xa20] ss:$8 sps:$4 sm:$0xff]  }
 0x145   : > { %3258 = vmatpush1.bf16.msra.mxu0 %v4589_v1  ;;  %3013 = vmatprep.subr.bf16.mxu1 %v4594_v2  ;;  %v4672_v1 = vld [vmem:[%s5228_s21 + $0x434] ss:$8 sps:$4 sm:$0xff]  }
 0x146   : > { %3259 = vmatprep.subr.bf16.mxu0 %v4597_v3  ;;  %v4675_v2 = vld [vmem:[%s5228_s21 + $0xa34] ss:$8 sps:$4 sm:$0xff]   ;;  %v4670_v3 = vld [vmem:[%s5228_s21 + $0x430] ss:$8 sps:$4 sm:$0xff]  }
 0x148   : > { %3014 = vmatpush1.bf16.msra.mxu1 %v4592_v4  ;;  %v4673_v4 = vld [vmem:[%s5228_s21 + $0xa30] ss:$8 sps:$4 sm:$0xff]  }
 0x149   : > { %3260 = vmatpush1.bf16.msra.mxu0 %v4595_v5  ;;  %3015 = vmatprep.subr.bf16.mxu1 %v4600_v6  ;;  %v4678_v5 = vld [vmem:[%s5228_s21 + $0x444] ss:$8 sps:$4 sm:$0xff]  }
 0x14a   : > { %3261 = vmatprep.subr.bf16.mxu0 %v4603_v7  ;;  %v4681_v6 = vld [vmem:[%s5228_s21 + $0xa44] ss:$8 sps:$4 sm:$0xff]   ;;  %v4676_v7 = vld [vmem:[%s5228_s21 + $0x440] ss:$8 sps:$4 sm:$0xff]  }
 0x14c   : > { %3016 = vmatpush1.bf16.msra.mxu1 %v4598_v8  ;;  %v4679_v8 = vld [vmem:[%s5228_s21 + $0xa40] ss:$8 sps:$4 sm:$0xff]  }
 0x14d   : > { %3262 = vmatpush1.bf16.msra.mxu0 %v4601_v9  ;;  %3017 = vmatprep.subr.bf16.mxu1 %v4606_v10  ;;  %v4684_v9 = vld [vmem:[%s5228_s21 + $0x454] ss:$8 sps:$4 sm:$0xff]  }
 0x14e   : > { %3263 = vmatprep.subr.bf16.mxu0 %v4609_v11  ;;  %v4687_v10 = vld [vmem:[%s5228_s21 + $0xa54] ss:$8 sps:$4 sm:$0xff]   ;;  %v4682_v11 = vld [vmem:[%s5228_s21 + $0x450] ss:$8 sps:$4 sm:$0xff]  }
 0x150   : > { %3018 = vmatpush1.bf16.msra.mxu1 %v4604_v12  ;;  %v4685_v12 = vld [vmem:[%s5228_s21 + $0xa50] ss:$8 sps:$4 sm:$0xff]  }
 0x151   : > { %3264 = vmatpush1.bf16.msra.mxu0 %v4607_v13  ;;  %3019 = vmatprep.subr.bf16.mxu1 %v4612_v14  ;;  %v4690_v13 = vld [vmem:[%s5228_s21 + $0x464] ss:$8 sps:$4 sm:$0xff]  }
 0x152   : > { %3265 = vmatprep.subr.bf16.mxu0 %v4615_v15  ;;  %v4693_v14 = vld [vmem:[%s5228_s21 + $0xa64] ss:$8 sps:$4 sm:$0xff]   ;;  %v4688_v15 = vld [vmem:[%s5228_s21 + $0x460] ss:$8 sps:$4 sm:$0xff]  }
 0x154   : > { %3020 = vmatpush1.bf16.msra.mxu1 %v4610_v16  ;;  %v4691_v16 = vld [vmem:[%s5228_s21 + $0xa60] ss:$8 sps:$4 sm:$0xff]  }
 0x155   : > { %3266 = vmatpush1.bf16.msra.mxu0 %v4613_v17  ;;  %3021 = vmatprep.subr.bf16.mxu1 %v4618_v20  ;;  %v4696_v17 = vld [vmem:[%s5228_s21 + $0x474] ss:$8 sps:$4 sm:$0xff]  }
 0x156   : > { %3267 = vmatprep.subr.bf16.mxu0 %v4621_v21  ;;  %v4699_v20 = vld [vmem:[%s5228_s21 + $0xa74] ss:$8 sps:$4 sm:$0xff]   ;;  %v4694_v21 = vld [vmem:[%s5228_s21 + $0x470] ss:$8 sps:$4 sm:$0xff]  }
 0x158   : > { %3022 = vmatpush1.bf16.msra.mxu1 %v4616_v22  ;;  %v4697_v22 = vld [vmem:[%s5228_s21 + $0xa70] ss:$8 sps:$4 sm:$0xff]  }
 0x159   : > { %3268 = vmatpush1.bf16.msra.mxu0 %v4619_v23  ;;  %3023 = vmatprep.subr.bf16.mxu1 %v4624_v25  ;;  %v4702_v23 = vld [vmem:[%s5228_s21 + $0x484] ss:$8 sps:$4 sm:$0xff]  }
 0x15a   : > { %3269 = vmatprep.subr.bf16.mxu0 %v4627_v53  ;;  %v4705_v25 = vld [vmem:[%s5228_s21 + $0xa84] ss:$8 sps:$4 sm:$0xff]   ;;  %v4700_v53 = vld [vmem:[%s5228_s21 + $0x480] ss:$8 sps:$4 sm:$0xff]  }
 0x15c   : > { %3024 = vmatpush1.bf16.msra.mxu1 %v4622_v26  ;;  %v4703_v26 = vld [vmem:[%s5228_s21 + $0xa80] ss:$8 sps:$4 sm:$0xff]  }
 0x15d   : > { %3270 = vmatpush1.bf16.msra.mxu0 %v4625_v27  ;;  %3025 = vmatprep.subr.bf16.mxu1 %v4630_v28  ;;  %v4708_v27 = vld [vmem:[%s5228_s21 + $0x494] ss:$8 sps:$4 sm:$0xff]  }
 0x15e   : > { %3271 = vmatprep.subr.bf16.mxu0 %v4633_v29  ;;  %v4711_v28 = vld [vmem:[%s5228_s21 + $0xa94] ss:$8 sps:$4 sm:$0xff]   ;;  %v4706_v29 = vld [vmem:[%s5228_s21 + $0x490] ss:$8 sps:$4 sm:$0xff]  }
 0x160   : > { %3026 = vmatpush1.bf16.msra.mxu1 %v4628_v30  ;;  %v4709_v30 = vld [vmem:[%s5228_s21 + $0xa90] ss:$8 sps:$4 sm:$0xff]  }
 0x161   : > { %3272 = vmatpush1.bf16.msra.mxu0 %v4631_v31  ;;  %3027 = vmatprep.subr.bf16.mxu1 %v4636_v32  ;;  %v4714_v31 = vld [vmem:[%s5228_s21 + $0x4a4] ss:$8 sps:$4 sm:$0xff]  }
 0x162   : > { %3273 = vmatprep.subr.bf16.mxu0 %v4639_v33  ;;  %v4717_v32 = vld [vmem:[%s5228_s21 + $0xaa4] ss:$8 sps:$4 sm:$0xff]   ;;  %v4712_v33 = vld [vmem:[%s5228_s21 + $0x4a0] ss:$8 sps:$4 sm:$0xff]  }
 0x164   : > { %3028 = vmatpush1.bf16.msra.mxu1 %v4634_v34  ;;  %v4715_v34 = vld [vmem:[%s5228_s21 + $0xaa0] ss:$8 sps:$4 sm:$0xff]  }
 0x165   : > { %3274 = vmatpush1.bf16.msra.mxu0 %v4637_v18  ;;  %3029 = vmatprep.subr.bf16.mxu1 %v4642_v37  ;;  %v4720_v18 = vld [vmem:[%s5228_s21 + $0x4b4] ss:$8 sps:$4 sm:$0xff]  }
 0x166   : > { %3275 = vmatprep.subr.bf16.mxu0 %v4645_v38  ;;  %v4723_v37 = vld [vmem:[%s5228_s21 + $0xab4] ss:$8 sps:$4 sm:$0xff]   ;;  %v4718_v38 = vld [vmem:[%s5228_s21 + $0x4b0] ss:$8 sps:$4 sm:$0xff]  }
 0x168   : > { %3030 = vmatpush1.bf16.msra.mxu1 %v4640_v40  ;;  %v4726_v40 = vld [vmem:[%s5228_s21 + $0x4c4] ss:$8 sps:$4 sm:$0xff]  }
 0x169   : > { %3276 = vmatpush1.bf16.msra.mxu0 %v4643_v45  ;;  %3031 = vmatprep.subr.bf16.mxu1 %v4648_v46  ;;  %v4729_v45 = vld [vmem:[%s5228_s21 + $0xac4] ss:$8 sps:$4 sm:$0xff]   ;;  %v4724_v46 = vld [vmem:[%s5228_s21 + $0x4c0] ss:$8 sps:$4 sm:$0xff]  }
 0x16a   : > { %3277 = vmatprep.subr.bf16.mxu0 %v4651_v47  ;;  %v4727_v47 = vld [vmem:[%s5228_s21 + $0xac0] ss:$8 sps:$4 sm:$0xff]  }
 0x16c   : > { %3032 = vmatpush1.bf16.msra.mxu1 %v4646_v19  ;;  %v4732_v19 = vld [vmem:[%s5228_s21 + $0x4d4] ss:$8 sps:$4 sm:$0xff]  }
 0x16d   : > { %3278 = vmatpush1.bf16.msra.mxu0 %v4649_v36  ;;  %3042 = vmatprep.subr.bf16.mxu1 %v4654_v49  ;;  %v4735_v36 = vld [vmem:[%s5228_s21 + $0xad4] ss:$8 sps:$4 sm:$0xff]   ;;  %v4730_v49 = vld [vmem:[%s5228_s21 + $0x4d0] ss:$8 sps:$4 sm:$0xff]  }
 0x16e   : > { %3288 = vmatprep.subr.bf16.mxu0 %v4657_v51  ;;  %v4733_v51 = vld [vmem:[%s5228_s21 + $0xad0] ss:$8 sps:$4 sm:$0xff]  }
 0x16f   : > { %3034 = vmatmul.mubr.bf16.vlgmr.msra.gmra.mrb[0].mxu1 %v738_v54  ;;  %v4739_v54 = vld [vmem:[%s5228_s21 + $0xae0] ss:$8 sps:$4 sm:$0xff]  }
 0x170   : > { %3280 = vmatmul.mubr.bf16.vlgmr.msra.gmra.mrb[0].mxu0 %v835_v55  ;;  %3043 = vmatpush1.bf16.msra.mxu1 %v4652_v52  ;;  %v4736_v52 = vld [vmem:[%s5228_s21 + $0x4e0] ss:$8 sps:$4 sm:$0xff]   ;;  %v4744_v55 = vld [vmem:[%s5228_s21 + $0x4f4] ss:$8 sps:$4 sm:$0xff]  }
 0x171   : > { %3289 = vmatpush1.bf16.msra.mxu0 %v4655_v56  ;;  %3044 = vmatprep.subr.bf16.mxu1 %v4660_v57  ;;  %v4747_v56 = vld [vmem:[%s5228_s21 + $0xaf4] ss:$8 sps:$4 sm:$0xff]   ;;  %v4742_v57 = vld [vmem:[%s5228_s21 + $0x4f0] ss:$8 sps:$4 sm:$0xff]  }
 0x172   : > { %3290 = vmatprep.subr.bf16.mxu0 %v4663_v58  ;;  %3074 = vmatprep.mubr.bf16.mxu1 %v5591_v61  ;;  %v4745_v58 = vld [vmem:[%s5228_s21 + $0xaf0] ss:$8 sps:$4 sm:$0xff]  }
 0x173   : > { %3320 = vmatprep.mubr.bf16.mxu0 %v5594_v41 }
 0x174   : > { %3045 = vmatpush1.bf16.msra.mxu1 %v4658_v59  ;;  %v4750_v59 = vld [vmem:[%s5228_s21 + $0x504] ss:$8 sps:$4 sm:$0xff]  }
 0x175   : > { %3291 = vmatpush1.bf16.msra.mxu0 %v4661_v60  ;;  %3046 = vmatprep.subr.bf16.mxu1 %v4666_v43  ;;  %v4754_v60 = vld [vmem:[%s5228_s21 + $0xb04] ss:$8 sps:$4 sm:$0xff]   ;;  %v5658_v43 = vrot.slane %v5567_v48, %v5293_v50  ;;  %v788_v48 = vcombine.high %v5591_v61, %v5591_v61 }
 0x176   : > { %3292 = vmatprep.subr.bf16.mxu0 %v4669_v62  ;;  %v5662_v62 = vrot.slane %v5570_v24, %v5293_v50  ;;  %v4755_v24 = vld [vmem:[%s5228_s21 + $0x510] ss:$8 sps:$4 sm:$0xff]   ;;  %v4763_v61 = vld [vmem:[%s5228_s21 + $0x524] ss:$8 sps:$4 sm:$0xff]  }
 0x178   : > { %3047 = vmatpush1.bf16.msra.mxu1 %v4664_v63  ;;  %v4748_v63 = vld [vmem:[%s5228_s21 + $0x500] ss:$8 sps:$4 sm:$0xff]  }
 0x179   : > { %3293 = vmatpush1.bf16.msra.mxu0 %v4667_v0  ;;  %3048 = vmatprep.subr.bf16.mxu1 %v4672_v1  ;;  %v4752_v0 = vld [vmem:[%s5228_s21 + $0xb00] ss:$8 sps:$4 sm:$0xff]   ;;  %v4757_v1 = vld [vmem:[%s5228_s21 + $0x514] ss:$8 sps:$4 sm:$0xff]  }
 0x17a   : > { %3294 = vmatprep.subr.bf16.mxu0 %v4675_v2  ;;  %v4760_v2 = vld [vmem:[%s5228_s21 + $0xb14] ss:$8 sps:$4 sm:$0xff]  }
 0x17c   : > { %3049 = vmatpush1.bf16.msra.mxu1 %v4670_v3  ;;  %v838_v3 = vcombine.high %v5594_v41, %v5594_v41  ;;  %v4761_v41 = vld [vmem:[%s5228_s21 + $0x520] ss:$8 sps:$4 sm:$0xff]  }
 0x17d   : > { %3295 = vmatpush1.bf16.msra.mxu0 %v4673_v4  ;;  %3050 = vmatprep.subr.bf16.mxu1 %v4678_v5  ;;  %v4758_v4 = vld [vmem:[%s5228_s21 + $0xb10] ss:$8 sps:$4 sm:$0xff]   ;;  %v4766_v5 = vld [vmem:[%s5228_s21 + $0xb24] ss:$8 sps:$4 sm:$0xff]  }
 0x17e   : > { %3296 = vmatprep.subr.bf16.mxu0 %v4681_v6  ;;  %v4764_v6 = vld [vmem:[%s5228_s21 + $0xb20] ss:$8 sps:$4 sm:$0xff]  }
 0x180   : > { %3051 = vmatpush1.bf16.msra.mxu1 %v4676_v7  ;;  %v4769_v7 = vld [vmem:[%s5228_s21 + $0x534] ss:$8 sps:$4 sm:$0xff]  }
 0x181   : > { %3297 = vmatpush1.bf16.msra.mxu0 %v4679_v8  ;;  %3052 = vmatprep.subr.bf16.mxu1 %v4684_v9  ;;  %v4772_v8 = vld [vmem:[%s5228_s21 + $0xb34] ss:$8 sps:$4 sm:$0xff]   ;;  %v4767_v9 = vld [vmem:[%s5228_s21 + $0x530] ss:$8 sps:$4 sm:$0xff]  }
 0x182   : > { %3298 = vmatprep.subr.bf16.mxu0 %v4687_v10  ;;  %v4770_v10 = vld [vmem:[%s5228_s21 + $0xb30] ss:$8 sps:$4 sm:$0xff]  }
 0x184   : > { %3053 = vmatpush1.bf16.msra.mxu1 %v4682_v11  ;;  %v4775_v11 = vld [vmem:[%s5228_s21 + $0x544] ss:$8 sps:$4 sm:$0xff]  }
 0x185   : > { %3299 = vmatpush1.bf16.msra.mxu0 %v4685_v12  ;;  %3054 = vmatprep.subr.bf16.mxu1 %v4690_v13  ;;  %v4778_v12 = vld [vmem:[%s5228_s21 + $0xb44] ss:$8 sps:$4 sm:$0xff]   ;;  %v4773_v13 = vld [vmem:[%s5228_s21 + $0x540] ss:$8 sps:$4 sm:$0xff]  }
 0x186   : > { %3300 = vmatprep.subr.bf16.mxu0 %v4693_v14  ;;  %v4776_v14 = vld [vmem:[%s5228_s21 + $0xb40] ss:$8 sps:$4 sm:$0xff]  }
 0x188   : > { %3055 = vmatpush1.bf16.msra.mxu1 %v4688_v15  ;;  %v4781_v15 = vld [vmem:[%s5228_s21 + $0x554] ss:$8 sps:$4 sm:$0xff]  }
 0x189   : > { %3301 = vmatpush1.bf16.msra.mxu0 %v4691_v16  ;;  %3056 = vmatprep.subr.bf16.mxu1 %v4696_v17  ;;  %v4784_v16 = vld [vmem:[%s5228_s21 + $0xb54] ss:$8 sps:$4 sm:$0xff]   ;;  %v4779_v17 = vld [vmem:[%s5228_s21 + $0x550] ss:$8 sps:$4 sm:$0xff]  }
 0x18a   : > { %3302 = vmatprep.subr.bf16.mxu0 %v4699_v20  ;;  %v4782_v20 = vld [vmem:[%s5228_s21 + $0xb50] ss:$8 sps:$4 sm:$0xff]  }
 0x18c   : > { %3057 = vmatpush1.bf16.msra.mxu1 %v4694_v21  ;;  %v4787_v21 = vld [vmem:[%s5228_s21 + $0x564] ss:$8 sps:$4 sm:$0xff]  }
 0x18d   : > { %3303 = vmatpush1.bf16.msra.mxu0 %v4697_v22  ;;  %3058 = vmatprep.subr.bf16.mxu1 %v4702_v23  ;;  %v4790_v22 = vld [vmem:[%s5228_s21 + $0xb64] ss:$8 sps:$4 sm:$0xff]   ;;  %v4785_v23 = vld [vmem:[%s5228_s21 + $0x560] ss:$8 sps:$4 sm:$0xff]  }
 0x18e   : > { %3304 = vmatprep.subr.bf16.mxu0 %v4705_v25  ;;  %v4788_v25 = vld [vmem:[%s5228_s21 + $0xb60] ss:$8 sps:$4 sm:$0xff]  }
 0x190   : > { %3059 = vmatpush1.bf16.msra.mxu1 %v4700_v53  ;;  %v4793_v53 = vld [vmem:[%s5228_s21 + $0x574] ss:$8 sps:$4 sm:$0xff]  }
 0x191   : > { %3305 = vmatpush1.bf16.msra.mxu0 %v4703_v26  ;;  %3060 = vmatprep.subr.bf16.mxu1 %v4708_v27  ;;  %v4796_v26 = vld [vmem:[%s5228_s21 + $0xb74] ss:$8 sps:$4 sm:$0xff]   ;;  %v4791_v27 = vld [vmem:[%s5228_s21 + $0x570] ss:$8 sps:$4 sm:$0xff]  }
 0x192   : > { %3306 = vmatprep.subr.bf16.mxu0 %v4711_v28  ;;  %v4794_v28 = vld [vmem:[%s5228_s21 + $0xb70] ss:$8 sps:$4 sm:$0xff]  }
 0x194   : > { %3061 = vmatpush1.bf16.msra.mxu1 %v4706_v29  ;;  %v4799_v29 = vld [vmem:[%s5228_s21 + $0x584] ss:$8 sps:$4 sm:$0xff]  }
 0x195   : > { %3307 = vmatpush1.bf16.msra.mxu0 %v4709_v30  ;;  %3062 = vmatprep.subr.bf16.mxu1 %v4714_v31  ;;  %v4802_v30 = vld [vmem:[%s5228_s21 + $0xb84] ss:$8 sps:$4 sm:$0xff]   ;;  %v4797_v31 = vld [vmem:[%s5228_s21 + $0x580] ss:$8 sps:$4 sm:$0xff]  }
 0x196   : > { %3308 = vmatprep.subr.bf16.mxu0 %v4717_v32  ;;  %v4800_v32 = vld [vmem:[%s5228_s21 + $0xb80] ss:$8 sps:$4 sm:$0xff]  }
 0x198   : > { %3063 = vmatpush1.bf16.msra.mxu1 %v4712_v33  ;;  %v4805_v33 = vld [vmem:[%s5228_s21 + $0x594] ss:$8 sps:$4 sm:$0xff]  }
 0x199   : > { %3309 = vmatpush1.bf16.msra.mxu0 %v4715_v34  ;;  %3064 = vmatprep.subr.bf16.mxu1 %v4720_v18  ;;  %v4808_v34 = vld [vmem:[%s5228_s21 + $0xb94] ss:$8 sps:$4 sm:$0xff]   ;;  %v4803_v18 = vld [vmem:[%s5228_s21 + $0x590] ss:$8 sps:$4 sm:$0xff]  }
 0x19a   : > { %3310 = vmatprep.subr.bf16.mxu0 %v4723_v37  ;;  %v4806_v37 = vld [vmem:[%s5228_s21 + $0xb90] ss:$8 sps:$4 sm:$0xff]  }
 0x19c   : > { %3065 = vmatpush1.bf16.msra.mxu1 %v4718_v38  ;;  %v4811_v38 = vld [vmem:[%s5228_s21 + $0x5a4] ss:$8 sps:$4 sm:$0xff]  }
 0x19d   : > { %3311 = vmatpush1.bf16.msra.mxu0 %v4721_v39  ;;  %3066 = vmatprep.subr.bf16.mxu1 %v4726_v40  ;;  %v4814_v39 = vld [vmem:[%s5228_s21 + $0xba4] ss:$8 sps:$4 sm:$0xff]   ;;  %v4809_v40 = vld [vmem:[%s5228_s21 + $0x5a0] ss:$8 sps:$4 sm:$0xff]  }
 0x19e   : > { %3312 = vmatprep.subr.bf16.mxu0 %v4729_v45  ;;  %v4812_v45 = vld [vmem:[%s5228_s21 + $0xba0] ss:$8 sps:$4 sm:$0xff]  }
 0x1a0   : > { %3067 = vmatpush1.bf16.msra.mxu1 %v4724_v46  ;;  %v4817_v46 = vld [vmem:[%s5228_s21 + $0x5b4] ss:$8 sps:$4 sm:$0xff]  }
 0x1a1   : > { %3313 = vmatpush1.bf16.msra.mxu0 %v4727_v47  ;;  %3068 = vmatprep.subr.bf16.mxu1 %v4732_v19  ;;  %v4820_v47 = vld [vmem:[%s5228_s21 + $0xbb4] ss:$8 sps:$4 sm:$0xff]   ;;  %v4815_v19 = vld [vmem:[%s5228_s21 + $0x5b0] ss:$8 sps:$4 sm:$0xff]  }
 0x1a2   : > { %3314 = vmatprep.subr.bf16.mxu0 %v4735_v36  ;;  %v4818_v36 = vld [vmem:[%s5228_s21 + $0xbb0] ss:$8 sps:$4 sm:$0xff]  }
 0x1a4   : > { %3069 = vmatpush1.bf16.msra.mxu1 %v4730_v49  ;;  %v4823_v49 = vld [vmem:[%s5228_s21 + $0x5c4] ss:$8 sps:$4 sm:$0xff]  }
 0x1a5   : > { %3315 = vmatpush1.bf16.msra.mxu0 %v4733_v51  ;;  %3070 = vmatprep.subr.bf16.mxu1 %v4738_v35  ;;  %v4826_v51 = vld [vmem:[%s5228_s21 + $0xbc4] ss:$8 sps:$4 sm:$0xff]   ;;  %v4821_v35 = vld [vmem:[%s5228_s21 + $0x5c0] ss:$8 sps:$4 sm:$0xff]  }
 0x1a6   : > { %3316 = vmatprep.subr.bf16.mxu0 %v4741_v42  ;;  %v4824_v42 = vld [vmem:[%s5228_s21 + $0xbc0] ss:$8 sps:$4 sm:$0xff]  }
 0x1a8   : > { %3071 = vmatpush1.bf16.msra.mxu1 %v4736_v52  ;;  %v4829_v52 = vld [vmem:[%s5228_s21 + $0x5d4] ss:$8 sps:$4 sm:$0xff]  }
 0x1a9   : > { %3317 = vmatpush1.bf16.msra.mxu0 %v4739_v54  ;;  %3072 = vmatprep.subr.bf16.mxu1 %v4744_v55  ;;  %v4832_v54 = vld [vmem:[%s5228_s21 + $0xbd4] ss:$8 sps:$4 sm:$0xff]   ;;  %v4827_v55 = vld [vmem:[%s5228_s21 + $0x5d0] ss:$8 sps:$4 sm:$0xff]  }
 0x1aa   : > { %3318 = vmatprep.subr.bf16.mxu0 %v4747_v56  ;;  %v4830_v56 = vld [vmem:[%s5228_s21 + $0xbd0] ss:$8 sps:$4 sm:$0xff]  }
 0x1ac   : > { %3073 = vmatpush1.bf16.msra.mxu1 %v4742_v57  ;;  %v4835_v57 = vld [vmem:[%s5228_s21 + $0x5e4] ss:$8 sps:$4 sm:$0xff]  }
 0x1ad   : > { %3319 = vmatpush1.bf16.msra.mxu0 %v4745_v58  ;;  %3083 = vmatprep.subr.bf16.mxu1 %v4750_v59  ;;  %v4838_v58 = vld [vmem:[%s5228_s21 + $0xbe4] ss:$8 sps:$4 sm:$0xff]   ;;  %v4833_v59 = vld [vmem:[%s5228_s21 + $0x5e0] ss:$8 sps:$4 sm:$0xff]  }
 0x1ae   : > { %3329 = vmatprep.subr.bf16.mxu0 %v4754_v60  ;;  %v4836_v60 = vld [vmem:[%s5228_s21 + $0xbe0] ss:$8 sps:$4 sm:$0xff]  }
 0x1af   : > { %3075 = vmatmul.mubr.bf16.vlgmr.msra.gmra.mrb[0].mxu1 %v5658_v43 }
 0x1b0   : > { %3321 = vmatmul.mubr.bf16.vlgmr.msra.gmra.mrb[0].mxu0 %v5662_v62  ;;  %3084 = vmatpush1.bf16.msra.mxu1 %v4748_v63  ;;  %v4841_v63 = vld [vmem:[%s5228_s21 + $0x5f4] ss:$8 sps:$4 sm:$0xff]  }
 0x1b1   : > { %3330 = vmatpush1.bf16.msra.mxu0 %v4752_v0  ;;  %3085 = vmatprep.subr.bf16.mxu1 %v4757_v1  ;;  %v4844_v0 = vld [vmem:[%s5228_s21 + $0xbf4] ss:$8 sps:$4 sm:$0xff]   ;;  %v4839_v1 = vld [vmem:[%s5228_s21 + $0x5f0] ss:$8 sps:$4 sm:$0xff]  }
 0x1b2   : > { %3331 = vmatprep.subr.bf16.mxu0 %v4760_v2  ;;  %3115 = vmatprep.mubr.bf16.mxu1 %v788_v48  ;;  %v4842_v2 = vld [vmem:[%s5228_s21 + $0xbf0] ss:$8 sps:$4 sm:$0xff]   ;;  %v4847_v48 = vld [vmem:[%s5228_s21 + $0xc04] ss:$8 sps:$4 sm:$0xff]  }
 0x1b3   : > { %3361 = vmatprep.mubr.bf16.mxu0 %v838_v3  ;;  %v786_v3 = vcombine.high %v5658_v43, %v5658_v43  ;;  %v4853_v43 = vld [vmem:[%s5228_s21 + $0xc24] ss:$8 sps:$4 sm:$0xff]  }
 0x1b4   : > { %3086 = vmatpush1.bf16.msra.mxu1 %v4755_v24  ;;  %v836_v24 = vcombine.high %v5662_v62, %v5662_v62  ;;  %v4851_v62 = vld [vmem:[%s5228_s21 + $0xc20] ss:$8 sps:$4 sm:$0xff]  }
 0x1b5   : > { %3332 = vmatpush1.bf16.msra.mxu0 %v4758_v4  ;;  %3087 = vmatprep.subr.bf16.mxu1 %v4763_v61  ;;  %v4845_v4 = vld [vmem:[%s5228_s21 + $0xc00] ss:$8 sps:$4 sm:$0xff]   ;;  %v4850_v61 = vld [vmem:[%s5228_s21 + $0xc14] ss:$8 sps:$4 sm:$0xff]  }
 0x1b6   : > { %3333 = vmatprep.subr.bf16.mxu0 %v4766_v5  ;;  %v4848_v5 = vld [vmem:[%s5228_s21 + $0xc10] ss:$8 sps:$4 sm:$0xff]  }
 0x1b8   : > { %3088 = vmatpush1.bf16.msra.mxu1 %v4761_v41  ;;  %v5034_v41 = vmov 0  }
 0x1b9   : > { %3334 = vmatpush1.bf16.msra.mxu0 %v4764_v6  ;;  %3089 = vmatprep.subr.bf16.mxu1 %v4769_v7  ;;  %v4856_v6 = vld [vmem:[%s5228_s21 + $0xc34] ss:$8 sps:$4 sm:$0xff]   ;;  %v4854_v7 = vld [vmem:[%s5228_s21 + $0xc30] ss:$8 sps:$4 sm:$0xff]  }
 0x1ba   : > { %3335 = vmatprep.subr.bf16.mxu0 %v4772_v8  ;;  %v4859_v8 = vld [vmem:[%s5228_s21 + $0xc44] ss:$8 sps:$4 sm:$0xff]  }
 0x1bc   : > { %3090 = vmatpush1.bf16.msra.mxu1 %v4767_v9  ;;  %v4857_v9 = vld [vmem:[%s5228_s21 + $0xc40] ss:$8 sps:$4 sm:$0xff]  }
 0x1bd   : > { %3336 = vmatpush1.bf16.msra.mxu0 %v4770_v10  ;;  %3091 = vmatprep.subr.bf16.mxu1 %v4775_v11  ;;  %v4862_v10 = vld [vmem:[%s5228_s21 + $0xc54] ss:$8 sps:$4 sm:$0xff]   ;;  %v4860_v11 = vld [vmem:[%s5228_s21 + $0xc50] ss:$8 sps:$4 sm:$0xff]  }
 0x1be   : > { %3337 = vmatprep.subr.bf16.mxu0 %v4778_v12  ;;  %v4865_v12 = vld [vmem:[%s5228_s21 + $0xc64] ss:$8 sps:$4 sm:$0xff]  }
 0x1c0   : > { %3092 = vmatpush1.bf16.msra.mxu1 %v4773_v13  ;;  %v4863_v13 = vld [vmem:[%s5228_s21 + $0xc60] ss:$8 sps:$4 sm:$0xff]  }
 0x1c1   : > { %3338 = vmatpush1.bf16.msra.mxu0 %v4776_v14  ;;  %3093 = vmatprep.subr.bf16.mxu1 %v4781_v15  ;;  %v4868_v14 = vld [vmem:[%s5228_s21 + $0xc74] ss:$8 sps:$4 sm:$0xff]   ;;  %v4866_v15 = vld [vmem:[%s5228_s21 + $0xc70] ss:$8 sps:$4 sm:$0xff]  }
 0x1c2   : > { %3339 = vmatprep.subr.bf16.mxu0 %v4784_v16  ;;  %v3668_v16 = vld.sshfl [vmem:[%s5242_s13 + $0x18] sm:$0x1 pattern:$0x75316420] }
 0x1c4   : > { %3094 = vmatpush1.bf16.msra.mxu1 %v4779_v17  ;;  %v852_v17 = vrot.slane %v3668_v16, %v5293_v50  ;;  %v283_v50 = vld [vmem:[#allocation2] sm:$0xf]  ;;  %v3479_v16 = vld [vmem:[%s5898_s3 + $0xe8] sm:$0xff] (!%p4069_p6) }
 0x1c5   : > { %3340 = vmatpush1.bf16.msra.mxu0 %v4782_v20  ;;  %3095 = vmatprep.subr.bf16.mxu1 %v4787_v21 }
 0x1c6   : > { %3341 = vmatprep.subr.bf16.mxu0 %v4790_v22 }
 0x1c8   : > { %3096 = vmatpush1.bf16.msra.mxu1 %v4785_v23 }
 0x1c9   : > { %3342 = vmatpush1.bf16.msra.mxu0 %v4788_v25  ;;  %3097 = vmatprep.subr.bf16.mxu1 %v4793_v53  ;;  %v5035_v25 = vmov 1983009808  }
 0x1ca   : > { %3343 = vmatprep.subr.bf16.mxu0 %v4796_v26  ;;  %v3415_v53 = vunpack.c.l.s4 %v5035_v25  ;;  %v3463_v25 = vld [vmem:[%s5898_s3 + $0x68] sm:$0xff] (!%p4069_p6) }
 0x1cc   : > { %3098 = vmatpush1.bf16.msra.mxu1 %v4791_v27  ;;  %v3416_v26 = vunpack.c.0.s8 %v3415_v53  ;;  %v3480_v53 = vld [vmem:[%s5898_s3 + $0xf0] sm:$0xff] (!%p4069_p6) }
 0x1cd   : > { %3344 = vmatpush1.bf16.msra.mxu0 %v4794_v28  ;;  %3099 = vmatprep.subr.bf16.mxu1 %v4799_v29 }
 0x1ce   : > { %3345 = vmatprep.subr.bf16.mxu0 %v4802_v30 }
 0x1d0   : > { %3100 = vmatpush1.bf16.msra.mxu1 %v4797_v31  ;;  %v5755_v31 = vsub.s32 %v3416_v26, %v5285_v44  ;;  %v3481_v26 = vld [vmem:[%s5898_s3 + $0xf8] sm:$0xff] (!%p4069_p6) }
 0x1d1   : > { %3346 = vmatpush1.bf16.msra.mxu0 %v4800_v32  ;;  %3101 = vmatprep.subr.bf16.mxu1 %v4805_v33 }
 0x1d2   : > { %3347 = vmatprep.subr.bf16.mxu0 %v4808_v34 }
 0x1d4   : > { %3102 = vmatpush1.bf16.msra.mxu1 %v4803_v18 }
 0x1d5   : > { %3348 = vmatpush1.bf16.msra.mxu0 %v4806_v37  ;;  %3103 = vmatprep.subr.bf16.mxu1 %v4811_v38  ;;  %v3466_v38 = vld [vmem:[%s5898_s3 + $0x80] sm:$0xff] (!%p4069_p6) }
 0x1d6   : > { %3349 = vmatprep.subr.bf16.mxu0 %v4814_v39  ;;  %v3467_v39 = vld [vmem:[%s5898_s3 + $0x88] sm:$0xff] (!%p4069_p6) }
 0x1d8   : > { %3104 = vmatpush1.bf16.msra.mxu1 %v4809_v40  ;;  %v3450_v40 = vld [vmem:[%s5898_s3] sm:$0xff] (!%p4069_p6) }
 0x1d9   : > { %3350 = vmatpush1.bf16.msra.mxu0 %v4812_v45  ;;  %3105 = vmatprep.subr.bf16.mxu1 %v4817_v46  ;;  %v4113_v45 = vpack.c.bf16 (!%p4069_p6), %v3467_v39, %v3466_v38  ;;  %v3451_v46 = vld [vmem:[%s5898_s3 + $0x8] sm:$0xff] (!%p4069_p6) }
 0x1da   : > { %3351 = vmatprep.subr.bf16.mxu0 %v4820_v47  ;;  %v3468_v47 = vld [vmem:[%s5898_s3 + $0x90] sm:$0xff] (!%p4069_p6) }
 0x1dc   : > { %3106 = vmatpush1.bf16.msra.mxu1 %v4815_v19  ;;  %v3469_v19 = vld [vmem:[%s5898_s3 + $0x98] sm:$0xff] (!%p4069_p6) }
 0x1dd   : > { %3352 = vmatpush1.bf16.msra.mxu0 %v4818_v36  ;;  %3107 = vmatprep.subr.bf16.mxu1 %v4823_v49  ;;  %v4115_v36 = vpack.c.bf16 (!%p4069_p6), %v3451_v46, %v3450_v40  ;;  %v4117_v49 = vpack.c.bf16 (!%p4069_p6), %v3469_v19, %v3468_v47 }
 0x1de   : > { %3353 = vmatprep.subr.bf16.mxu0 %v4826_v51  ;;  %v3452_v51 = vld [vmem:[%s5898_s3 + $0x10] sm:$0xff] (!%p4069_p6) }
 0x1e0   : > { %3108 = vmatpush1.bf16.msra.mxu1 %v4821_v35  ;;  %v3453_v35 = vld [vmem:[%s5898_s3 + $0x18] sm:$0xff] (!%p4069_p6) }
 0x1e1   : > { %3354 = vmatpush1.bf16.msra.mxu0 %v4824_v42  ;;  %3109 = vmatprep.subr.bf16.mxu1 %v4829_v52  ;;  %v3470_v42 = vld [vmem:[%s5898_s3 + $0xa0] sm:$0xff] (!%p4069_p6)  ;;  %v3471_v52 = vld [vmem:[%s5898_s3 + $0xa8] sm:$0xff] (!%p4069_p6) }
 0x1e2   : > { %3355 = vmatprep.subr.bf16.mxu0 %v4832_v54  ;;  %v4119_v54 = vpack.c.bf16 (!%p4069_p6), %v3453_v35, %v3452_v51 }
 0x1e4   : > { %3110 = vmatpush1.bf16.msra.mxu1 %v4827_v55  ;;  %v4121_v55 = vpack.c.bf16 (!%p4069_p6), %v3471_v52, %v3470_v42 }
 0x1e5   : > { %3356 = vmatpush1.bf16.msra.mxu0 %v4830_v56  ;;  %3111 = vmatprep.subr.bf16.mxu1 %v4835_v57  ;;  %v3454_v56 = vld [vmem:[%s5898_s3 + $0x20] sm:$0xff] (!%p4069_p6)  ;;  %v3455_v57 = vld [vmem:[%s5898_s3 + $0x28] sm:$0xff] (!%p4069_p6) }
 0x1e6   : > { %3357 = vmatprep.subr.bf16.mxu0 %v4838_v58  ;;  %v3472_v58 = vld [vmem:[%s5898_s3 + $0xb0] sm:$0xff] (!%p4069_p6) }
 0x1e8   : > { %3112 = vmatpush1.bf16.msra.mxu1 %v4833_v59  ;;  %v3473_v59 = vld [vmem:[%s5898_s3 + $0xb8] sm:$0xff] (!%p4069_p6) }
 0x1e9   : > { %3358 = vmatpush1.bf16.msra.mxu0 %v4836_v60  ;;  %3113 = vmatprep.subr.bf16.mxu1 %v4841_v63  ;;  %v4123_v60 = vpack.c.bf16 (!%p4069_p6), %v3455_v57, %v3454_v56  ;;  %v3433_v63 = vsub.s32 (!%p4069_p6), 0, %v5285_v44 }
 0x1ea   : > { %3359 = vmatprep.subr.bf16.mxu0 %v4844_v0  ;;  %v3437_v0 = vsub.s32 (!%p4069_p6), 1, %v5285_v44 }
 0x1ec   : > { %3114 = vmatpush1.bf16.msra.mxu1 %v4839_v1  ;;  %v4125_v1 = vpack.c.bf16 (!%p4069_p6), %v3473_v59, %v3472_v58 }
 0x1ed   : > { %3360 = vmatpush1.bf16.msra.mxu0 %v4842_v2  ;;  %v3456_v2 = vld [vmem:[%s5898_s3 + $0x30] sm:$0xff] (!%p4069_p6) }
 0x1ee   : > { %3370 = vmatprep.subr.bf16.mxu0 %v4847_v48  ;;  %v3457_v48 = vld [vmem:[%s5898_s3 + $0x38] sm:$0xff] (!%p4069_p6) }
 0x1ef   : > { %3116 = vmatmul.mubr.bf16.vlgmr.msra.gmra.mrb[0].mxu1 %v786_v3  ;;  %v3474_v3 = vld [vmem:[%s5898_s3 + $0xc0] sm:$0xff] (!%p4069_p6)  ;;  %v4127_v44 = vpack.c.bf16 (!%p4069_p6), %v3457_v48, %v3456_v2 }
 0x1f0   : > { %3362 = vmatmul.mubr.bf16.vlgmr.msra.gmra.mrb[0].mxu0 %v836_v24  ;;  %v3475_v24 = vld [vmem:[%s5898_s3 + $0xc8] sm:$0xff] (!%p4069_p6) }
 0x1f1   : > { %3371 = vmatpush1.bf16.msra.mxu0 %v4845_v4  ;;  %3402 = vmatprep.mubr.bf16.mxu0 %v5034_v41  ;;  %v3429_v4 = vld [vmem:[#allocation6] sm:$0x3] (!%p4069_p6)  ;;  %v4129_v41 = vpack.c.bf16 (!%p4069_p6), %v3475_v24, %v3474_v3 }
 0x1f2   : > { %3372 = vmatprep.subr.bf16.mxu0 %v4850_v61  ;;  %v3434_v61 = vrot.slane (!%p4069_p6), %v3429_v4, %v3433_v63 }
 0x1f5   : > { %3373 = vmatpush1.bf16.msra.mxu0 %v4848_v5  ;;  %v3438_v5 = vrot.slane (!%p4069_p6), %v3429_v4, %v3437_v0 }
 0x1f6   : > { %3374 = vmatprep.subr.bf16.mxu0 %v4853_v43  ;;  %v3458_v43 = vld [vmem:[%s5898_s3 + $0x40] sm:$0xff] (!%p4069_p6) }
 0x1f9   : > { %3375 = vmatpush1.bf16.msra.mxu0 %v4851_v62  ;;  %v3459_v62 = vld [vmem:[%s5898_s3 + $0x48] sm:$0xff] (!%p4069_p6) }
 0x1fa   : > { %3376 = vmatprep.subr.bf16.mxu0 %v4856_v6  ;;  %v3476_v6 = vld [vmem:[%s5898_s3 + $0xd0] sm:$0xff] (!%p4069_p6) }
 0x1fd   : > { %3377 = vmatpush1.bf16.msra.mxu0 %v4854_v7  ;;  %v3477_v7 = vld [vmem:[%s5898_s3 + $0xd8] sm:$0xff] (!%p4069_p6) }
 0x1fe   : > { %3378 = vmatprep.subr.bf16.mxu0 %v4859_v8  ;;  %v3439_v8 = vcombine.low (!%p4069_p6), %v3434_v61, %v3438_v5 }
 0x201   : > { %3379 = vmatpush1.bf16.msra.mxu0 %v4857_v9 }
 0x202   : > { %3380 = vmatprep.subr.bf16.mxu0 %v4862_v10  ;;  %v4131_v10 = vpack.c.bf16 (!%p4069_p6), %v3459_v62, %v3458_v43 }
 0x205   : > { %3381 = vmatpush1.bf16.msra.mxu0 %v4860_v11  ;;  %v3446_v11 = vrot.slane (!%p4069_p6), %v3439_v8, %v5755_v31 }
 0x206   : > { %3382 = vmatprep.subr.bf16.mxu0 %v4865_v12  ;;  %v4133_v12 = vpack.c.bf16 (!%p4069_p6), %v3477_v7, %v3476_v6 }
 0x209   : > { %3383 = vmatpush1.bf16.msra.mxu0 %v4863_v13  ;;  %v3460_v13 = vld [vmem:[%s5898_s3 + $0x50] sm:$0xff] (!%p4069_p6) }
 0x20a   : > { %3384 = vmatprep.subr.bf16.mxu0 %v4868_v14  ;;  %v3461_v14 = vld [vmem:[%s5898_s3 + $0x58] sm:$0xff] (!%p4069_p6) }
 0x20d   : > { %3385 = vmatpush1.bf16.msra.mxu0 %v4866_v15  ;;  %v3478_v15 = vld [vmem:[%s5898_s3 + $0xe0] sm:$0xff] (!%p4069_p6) }
 0x20e   : > { %4114 = vmatprep.subr.bf16.mxu0 (!%p4069_p6), %v4113_v45 }
 0x210   : > { %3403 = vmatmul.mubr.bf16.vlgmr.msra.gmra.mrb[0].mxu0 %v852_v17 }
 0x211   : > { %4116 = vmatpush3.bf16.msra.mxu0 (!%p4069_p6), %v4115_v36 }
 0x212   : > { %4118 = vmatprep.subr.bf16.mxu0 (!%p4069_p6), %v4117_v49 }
 0x215   : > { %4120 = vmatpush3.bf16.msra.mxu0 (!%p4069_p6), %v4119_v54 }
 0x216   : > { %4122 = vmatprep.subr.bf16.mxu0 (!%p4069_p6), %v4121_v55 }
 0x219   : > { %4124 = vmatpush3.bf16.msra.mxu0 (!%p4069_p6), %v4123_v60 }
 0x21a   : > { %4126 = vmatprep.subr.bf16.mxu0 (!%p4069_p6), %v4125_v1 }
 0x21d   : > { %4128 = vmatpush3.bf16.msra.mxu0 (!%p4069_p6), %v4127_v44 }
 0x21e   : > { %4130 = vmatprep.subr.bf16.mxu0 (!%p4069_p6), %v4129_v41 }
 0x221   : > { %4132 = vmatpush3.bf16.msra.mxu0 (!%p4069_p6), %v4131_v10 }
 0x222   : > { %4134 = vmatprep.subr.bf16.mxu0 (!%p4069_p6), %v4133_v12 }
 0x2c2   : > { %v3117_v20 = vpop.f32.mrb[0].mxu1 }
 0x2c3   : > { %v3119_v21 = vpop.f32.mrb[1].mxu1 }
 0x2c4   : > { %v3121_v22 = vpop.f32.mrb[2].mxu1 }
 0x2c5   : > { %v3122_v23 = vpop.f32.mrb[3].mxu1  ;;  %v4137_v22 = vpack.c.bf16 (!%p4069_p6), %v3479_v16, %v3478_v15 }
 0x2c6   : > { %v3462_v23 = vld [vmem:[%s5898_s3 + $0x60] sm:$0xff] (!%p4069_p6) }
 0x2e3   : > { %v3404_v27 = vpop.f32.mrb[0].mxu0 }
 0x2e4   : > { %v4145_v28 = vadd.f32 %v3404_v27, %v3117_v20  ;;  %v3406_v29 = vpop.f32.mrb[1].mxu0  ;;  %v4135_v20 = vpack.c.bf16 (!%p4069_p6), %v3461_v14, %v3460_v13 }
 0x2e5   : > { %v4146_v30 = vadd.f32 %v3406_v29, %v3119_v21  ;;  %v3408_v32 = vpop.f32.mrb[2].mxu0 }
 0x2e6   : > { %v3409_v33 = vpop.f32.mrb[3].mxu0  ;;  %4136 = vmatpush3.bf16.msra.mxu0 (!%p4069_p6), %v4135_v20  ;;  %v3464_v32 = vld [vmem:[%s5898_s3 + $0x70] sm:$0xff] (!%p4069_p6) }
 0x2e7   : > { %v3413_v34 = vcombine.low %v4145_v28, %v4146_v30  ;;  %3427 = sbr.rel (%p4069_p6) target bundleno = 984 (0x3d8), region = 60  ;;  %v4139_v28 = vpack.c.bf16 (!%p4069_p6), %v3463_v25, %v3462_v23  ;;  %4138 = vmatprep.subr.bf16.mxu0 (!%p4069_p6), %v4137_v22  ;;  %v4141_v30 = vpack.c.bf16 (!%p4069_p6), %v3481_v26, %v3480_v53  ;;  %v3465_v33 = vld [vmem:[%s5898_s3 + $0x78] sm:$0xff] (!%p4069_p6) }
 0x2e9   : > { %v3420_v18 = vrot.slane %v3413_v34, %v5755_v31  ;;  %v4143_v34 = vpack.c.bf16 (!%p4069_p6), %v3465_v33, %v3464_v32 }
 0x2ea   : > { %4140 = vmatpush3.bf16.msra.mxu0 (!%p4069_p6), %v4139_v28 }
 0x2eb   : > { %v3422_v37 = vadd.f32 %v3420_v18, %v283_v50  ;;  %4142 = vmatprep.subr.bf16.mxu0 (!%p4069_p6), %v4141_v30  ;;  %v4070_v50 = vld [vmem:[#allocation8] ss:$0 sm:$0xff] (!%p4069_p6) }
 0x2ed   : > { %3423 = vst [vmem:[#allocation2] sm:$0xf] %v3422_v37 }
 0x2ee   : > { %4144 = vmatpush3.bf16.msra.mxu0 %v4143_v34 }
 0x2f4   : > { %v3428_v9 = vld [vmem:[#allocation2] sm:$0xf] }
 0x2f5   : > { %v3448_v17 = vadd.f32 %v3446_v11, %v3428_v9 }
 0x2f7   : > { %v3449_v21 = vmax.f32 %v3448_v17, 0.0 }
 0x2f9   : > { %v3496_v27 = vrot.slane %v3449_v21, %v5755_v31 }
 0x2fb   : > { %v3497_v29 = vcombine.high %v3496_v27, %v3496_v27 }
 0x2fd   : > { %3564 = vmatprep.mubr.f32.mxu0 %v3497_v29 }
 0x2fe   : > { %3565 = vmatmul.mubr.f32.vlgmr.msra.gmra.mrb[0].mxu0 %v3496_v27 }
 0x3d1   : > { %v4110_v31 = vpop.f32.mrb[0].mxu0 }
 0x3d2   : > { %v4111_v18 = vpop.f32.mrb[1].mxu0 }
 0x3d3   : > { %v4112_v37 = vadd.f32 %v4111_v18, %v4110_v31 }
 0x3d5   : > { %v3567_v38 = vadd.f32 %v4112_v37, %v4070_v50 }
 0x3d7   : > { %3571 = vst.msk [vmem:[#allocation9] sm:$0x3] %vm3570_vm0, %v3567_v38 }
 0x3d8 PF: > { %p4223_p7 = scmp.eq.s32.totalorder %s5086_s22, 1  ;;  %s5036_s6 = smov [#allocation9]  }
 0x3d9   : > { %s3579_s17 = sshll.u32 %s5036_s6, 4  ;;  %s3580_s17 = int_to_ptr.vmem [resolvable:$true] %s3579_s17 }
 0x3da   : > { %s4957_s11 = scalar_lea.vmem %s3580_s17, 32  ;;  %p4964_p5 = scmp.lt.s32.totalorder %s3580_s17, %s3580_s17 }
 0x3db   : > { %p4958_p11 = scmp.ne.s32.totalorder %s3580_s17, %s4957_s11  ;;  %p4965_p9 = scmp.lt.s32.totalorder %s4957_s11, %s4957_s11 }
 0x3dd   : > { %p4959_p12 = pnand %p4958_p11, %p4223_p7  ;;  %p4966_p10 = por %p4965_p9, %p4964_p5 }
 0x3df   : > { %p4960_p13 = pneg %p4959_p12 }
 0x3e1   : > { %p4967_p1 = pnand %p4966_p10, %p4960_p13 }
 0x3e3   : > { %4970 = shalt.err (!%p4967_p1)
}
 0x3e4   : > { %s4971_s25 = scalar_lea.hbm %s5900_s5, 32 }
 0x3e5   : > { %p4972_p8 = scmp.ne.s32.totalorder %s5900_s5, %s4971_s25  ;;  %p4977_p3 = scmp.lt.u32.totalorder %s4971_s25, %s5900_s5 }
 0x3e7   : > { %p4973_p0 = pnand %p4972_p8, %p4223_p7 }
 0x3e9   : > { %p4974_p2 = pneg %p4973_p0 }
 0x3eb   : > { %p4979_p4 = pnand %p4977_p3, %p4974_p2 }
 0x3ed   : > { %4982 = shalt.err (!%p4979_p4)
}
 0x3ee   : > { %4204 = dma.vmem_to_hbm [thread:$0]  (%p4223_p7), %s3580_s17, 32, %s5900_s5, [#allocation5]  }
 0x3ef   : > { %5008 = dma.done.wait (%p4223_p7), [#allocation5], 32  }
 0x3f0   : > { %5010 = vsyncadd (%p4223_p7), [#allocation5], 4294967264 }
 0x3f1 PF: > { %p17_p6 = scmp.ge.s32.totalorder %s5089_s23, 4   ;;  %s5916_s18 = smov %s5017_s19 }
 0x3f2   : > { %s5917_s19 = smov %s5021_s20  ;;  %s5918_s20 = smov %s5099_s26 }
 0x3f3   : > { %s5919_s21 = smov %s5089_s23  ;;  %19 = sbr.rel (!%p17_p6) target bundleno = 5 (0x5), region = 96 }
 0x3fa   :  { %3592 = vsyncpa [#allocation4], 1 }
 0x3fb   :  { %3594 = vsyncpa [#allocation4 + $0x1], 1 }
 0x3fc   :  { %3595 = vsyncpa [#allocation7], 1 }
 0x3fd   :  { %3596 = vsyncpa [#allocation5], 1 }
 0x3fe   :  { %3598 = vsyncpa [#allocation5 + $0x1], 1 }

</bundles_post_ra>
